<compile_context>
chip_gen: v7x
topology: tpu7x:2x2x1
jax: 0.10.0
libtpu: 0.0.40
codegen_flags: <defaults>
</compile_context>

<pallas_src>
import numpy as np
import jax
import jax.numpy as jnp
from jax.experimental import pallas as pl
from jax.experimental.pallas import tpu as pltpu

KSIZE = 3
PADDING = 3   # Conv_block(16, [32,16,6], 3) -> every nn.Conv2d uses padding=3


# --------------------------- static planning ---------------------------------

def _cpad(c):
    """Pad channel counts to a multiple of 16 (bf16 sublane tile)."""
    return ((c + 15) // 16) * 16


def _make_plan(in_ch, hin, win, filters):
    """Static geometry of Conv_block(in_ch, filters, padding=3) in canvas layout."""
    convs = []
    h, w, cin = hin, win, in_ch
    for si, f in enumerate(filters):
        if si > 0:
            # AvgPool2d(2,2) between stages requires even spatial dims.
            assert h % 2 == 0 and w % 2 == 0, "AvgPool2d(2,2) requires even H/W"
            h, w = h // 2, w // 2
        stride = w + 10                          # canvas row stride for this stage
        for _ in range(2):                       # two 3x3 convs per stage
            c = dict(cin=cin, cout=f, cinp=_cpad(cin), coutp=_cpad(f),
                     hin=h, win=w, s=stride, hout=h + 4, wout=w + 4)
            c["n"] = c["hout"] * stride          # flattened (over-wide) output length
            convs.append(c)
            cin, h, w = f, h + 4, w + 4
    for i, c in enumerate(convs):
        if i == len(convs) - 1:
            c["next"] = "final"
        elif i % 2 == 1:
            c["next"] = "pool"
            nxt = convs[i + 1]
            c["pool_lout"] = (nxt["hin"] + 7) * nxt["s"]
        else:
            c["next"] = "store"
    return convs


def _canvas_sizes(plan):
    a_ch = a_len = b_ch = b_len = 16
    for i, c in enumerate(plan):
        if c["next"] == "store":
            nxt = plan[i + 1]
            a_ch = max(a_ch, c["coutp"], nxt["cinp"])
            a_len = max(a_len, 3 * c["s"] + 3 + c["n"],
                        (nxt["hout"] + 2) * nxt["s"] + 2)
        elif c["next"] == "pool":
            b_ch = max(b_ch, c["coutp"])
            b_len = max(b_len, c["pool_lout"])
    return (a_ch, a_len), (b_ch, b_len)


def _pool_matrix(ho, wo, s_in, s_out, l_out):
    """Constant 0/0.25 matrix: conv-output flat (ho*s_in) -> pooled+padded canvas (l_out)."""
    q = np.arange(ho * s_in)
    y, x = q // s_in, q % s_in
    r = np.arange(l_out)
    py, px = r // s_out - PADDING, r % s_out - PADDING
    m = ((x[:, None] < wo)
         & (py[None, :] >= 0) & (py[None, :] < ho // 2)
         & (px[None, :] >= 0) & (px[None, :] < wo // 2)
         & (y[:, None] // 2 == py[None, :])
         & (x[:, None] // 2 == px[None, :]))
    return (0.25 * m).astype(np.float32)


# --------------------------- fused Pallas kernel ------------------------------

def _build_kernel(plan, npool):
    nconv = len(plan)
    dst = ["A" if c["next"] == "store" else ("B" if c["next"] == "pool" else None)
           for c in plan]
    src = [None] + dst[:-1]

    def kernel(*args):
        x_ref = args[0]
        w_refs = args[1:1 + nconv]
        b_refs = args[1 + nconv:1 + 2 * nconv]
        pm_refs = args[1 + 2 * nconv:1 + 2 * nconv + npool]
        z_ref = args[1 + 2 * nconv + npool]
        o_ref = args[2 + 2 * nconv + npool]
        cnv_a, cnv_b, xcol = args[3 + 2 * nconv + npool:]
        canv = {"A": cnv_a, "B": cnv_b}

        pool_idx = 0
        feats, feat_cfg = None, None
        for i, c in enumerate(plan):
            cinp, coutp, s, n = c["cinp"], c["coutp"], c["s"], c["n"]
            # im2col panel in VMEM: xcol[(3*kh+kw)*cinp + ch, q] = src[ch, q + kh*s + kw]
            for kh in range(KSIZE):
                for kw in range(KSIZE):
                    off = kh * s + kw
                    row0 = (kh * KSIZE + kw) * cinp
                    if i == 0:
                        panel = x_ref[0, :, off:off + n]
                    else:
                        panel = canv[src[i]][0:cinp, off:off + n]
                    xcol[row0:row0 + cinp, 0:n] = panel
            # single K = 9*Cin MXU matmul, lane-dense (Cout, Ho*S) output
            acc = jnp.dot(w_refs[i][...], xcol[0:KSIZE * KSIZE * cinp, 0:n],
                          preferred_element_type=jnp.float32)
            acc = jnp.maximum(acc + b_refs[i][...], 0.0)          # bias + ReLU (f32)
            # TODO(synk): nn.Dropout2d(0.1) after the first conv of each stage is a
            # no-op in eval mode; training-mode channel dropout is not emulated.

            if c["next"] == "store":
                # zero the junk columns, then write at spatial offset (3,3): this IS the
                # next conv's zero-padded input canvas (same row stride within a stage).
                lane = jax.lax.broadcasted_iota(jnp.int32, (1, n), 1)
                acc = acc * ((lane % s) < c["wout"]).astype(jnp.float32)
                d = canv[dst[i]]
                d[...] = jnp.zeros_like(d)
                d[0:coutp, 3 * s + 3:3 * s + 3 + n] = acc.astype(d.dtype)
            elif c["next"] == "pool":
                # fused AvgPool2d(2,2) + re-pad: one matmul against a constant 0/0.25
                # scatter matrix emits the next stage's zero-padded canvas directly.
                pooled = jnp.dot(acc.astype(jnp.bfloat16), pm_refs[pool_idx][...],
                                 preferred_element_type=jnp.float32)
                d = canv[dst[i]]
                d[0:coutp, 0:c["pool_lout"]] = pooled.astype(d.dtype)
                pool_idx += 1
            else:
                feats, feat_cfg = acc, c

        # AdaptiveAvgPool2d([1,1]) -> bmm -> softmax(dim=2) -> bmm, all in-kernel.
        s, n = feat_cfg["s"], feat_cfg["n"]
        hv, wv = feat_cfg["hout"], feat_cfg["wout"]
        z = z_ref[0].astype(jnp.float32)                              # (K, Cp)
        zf = jnp.dot(z, feats, preferred_element_type=jnp.float32)    # (K, n)
        lane = jax.lax.broadcasted_iota(jnp.int32, (1, n), 1)
        zf = zf * ((lane % s) < wv).astype(jnp.float32)               # mask junk columns
        sim = jnp.sum(zf, axis=1, keepdims=True) * (1.0 / (hv * wv))  # (K,1) = z_set @ z_expert
        sim = sim - jnp.max(sim, axis=0, keepdims=True)
        e = jnp.exp(sim)
        p = e * pl.reciprocal(jnp.sum(e, axis=0, keepdims=True), approx=True)
        o_ref[0] = jnp.sum(z * p, axis=0, keepdims=True)              # (1, Cp)

    return kernel


# --------------------------- wrapper ------------------------------------------

@jax.jit
def projection_forward(feature_map, z_set, head_params):
    """feature_map: (B, Cin, H, W) NCHW; z_set: (B, K, latent); head_params: [(w_hwio, b)]."""
    bsz, in_ch, hin, win = feature_map.shape
    nconv = len(head_params)
    filters = [head_params[2 * i][0].shape[-1] for i in range(nconv // 2)]
    plan = _make_plan(in_ch, hin, win, filters)
    latent = head_params[-1][0].shape[-1]
    kz = z_set.shape[1]
    cp_last = plan[-1]["coutp"]

    # layout glue: zero-padded bf16 input canvas (B, Cin_p, (H+7)*(W+10)) flattened row-major.
    c0 = plan[0]
    hc0 = c0["hin"] + 7
    x = jnp.pad(feature_map,
                ((0, 0), (0, c0["cinp"] - in_ch),
                 (PADDING, hc0 - PADDING - hin),
                 (PADDING, c0["s"] - PADDING - win)))
    x = x.reshape(bsz, c0["cinp"], hc0 * c0["s"]).astype(jnp.bfloat16)

    # pack weights (3,3,Cin,Cout) -> (Cout_p, 9*Cin_p) bf16; biases -> (Cout_p, 1) f32.
    ws, bs = [], []
    for c, (w, bias) in zip(plan, head_params):
        wp = jnp.pad(w, ((0, 0), (0, 0),
                         (0, c["cinp"] - c["cin"]), (0, c["coutp"] - c["cout"])))
        wp = jnp.transpose(wp, (3, 0, 1, 2)).reshape(c["coutp"], KSIZE * KSIZE * c["cinp"])
        ws.append(wp.astype(jnp.bfloat16))
        bs.append(jnp.pad(bias, (0, c["coutp"] - c["cout"]))
                  .reshape(c["coutp"], 1).astype(jnp.float32))

    # constant AvgPool(2,2)+re-pad scatter matrices (exact 0 / 0.25 values in bf16).
    pms = []
    for i, c in enumerate(plan):
        if c["next"] == "pool":
            nxt = plan[i + 1]
            pms.append(jnp.asarray(
                _pool_matrix(c["hout"], c["wout"], c["s"], nxt["s"], c["pool_lout"]),
                dtype=jnp.bfloat16))

    z_pad = jnp.pad(z_set, ((0, 0), (0, 0), (0, cp_last - latent))).astype(jnp.float32)

    (a_ch, a_len), (b_ch, b_len) = _canvas_sizes(plan)
    xcol_rows = max(KSIZE * KSIZE * c["cinp"] for c in plan)
    xcol_cols = max(c["n"] for c in plan)

    kernel = _build_kernel(plan, len(pms))
    const_spec = lambda a: pl.BlockSpec(a.shape, lambda i: (0, 0))
    out = pl.pallas_call(
        kernel,
        out_shape=jax.ShapeDtypeStruct((bsz, 1, cp_last), jnp.float32),
        grid=(bsz,),
        in_specs=([pl.BlockSpec((1,) + x.shape[1:], lambda i: (i, 0, 0))]
                  + [const_spec(a) for a in ws]
                  + [const_spec(a) for a in bs]
                  + [const_spec(a) for a in pms]
                  + [pl.BlockSpec((1, kz, cp_last), lambda i: (i, 0, 0))]),
        out_specs=pl.BlockSpec((1, 1, cp_last), lambda i: (i, 0, 0)),
        scratch_shapes=[pltpu.VMEM((a_ch, a_len), jnp.bfloat16),   # canvas A (same-stage hand-off)
                        pltpu.VMEM((b_ch, b_len), jnp.bfloat16),   # canvas B (pooled stage input)
                        pltpu.VMEM((xcol_rows, xcol_cols), jnp.bfloat16)],  # im2col panel
        compiler_params=pltpu.CompilerParams(dimension_semantics=("parallel",)),
    )(x, *ws, *bs, *pms, z_pad)
    return out[:, :, :latent]


# --------------------------- pure-JAX reference ------------------------------

def _projection_ref(feature_map_nchw, z_set, head_params):
    x = jnp.transpose(feature_map_nchw, (0, 2, 3, 1))
    h = x
    for i, (w, b) in enumerate(head_params):
        if i in (2, 4):
            bsz, hh, ww, c = h.shape
            h = h.reshape(bsz, hh // 2, 2, ww // 2, 2, c).mean(axis=(2, 4))
        h = jax.lax.conv_general_dilated(
            h, w, (1, 1), [(PADDING, PADDING)] * 2,
            dimension_numbers=("NHWC", "HWIO", "NHWC"))
        h = jnp.maximum(h + b, 0.0)
    gz = jnp.mean(h, axis=(1, 2))[:, None, :]              # (B, 1, C)
    sim = jax.nn.softmax(jnp.einsum("bqc,bkc->bqk", gz, z_set), axis=2)
    return jnp.einsum("bqk,bkc->bqc", sim, z_set)


# --------------------------- deterministic params ----------------------------

def init_conv_block_params(key, in_ch, num_filters):
    params = []
    cin = in_ch
    for f in num_filters:
        for cout in (f, f):               # two 3x3 convs per stage
            key, kw_, kb_ = jax.random.split(key, 3)
            w = 0.05 * jax.random.normal(kw_, (KSIZE, KSIZE, cin, cout), jnp.float32)
            b = 0.05 * jax.random.normal(kb_, (cout,), jnp.float32)
            params.append((w, b))
            cin = cout
    return params


if __name__ == "__main__":
    key = jax.random.PRNGKey(0)
    batch, in_ch, spatial = 2, 16, 16       # feature_map NCHW: (2, 16, 16, 16)
    num_experts, latent_dim, num_z = 2, 6, 4
    k_x, k_z, k_p = jax.random.split(key, 3)
    feature_map = jax.random.normal(k_x, (batch, in_ch, spatial, spatial), jnp.float32)
    z_set = jax.random.normal(k_z, (batch, num_z, latent_dim), jnp.float32)
    expert_keys = jax.random.split(k_p, num_experts)
    all_params = [init_conv_block_params(ek, in_ch, [32, 16, latent_dim])
                  for ek in expert_keys]
    idx = 1

    out = projection_forward(feature_map, z_set, all_params[idx])
    out = jax.block_until_ready(out)
    assert out.shape == (batch, 1, latent_dim), out.shape
    assert bool(jnp.all(jnp.isfinite(out)))

    ref = _projection_ref(feature_map, z_set, all_params[idx])
    assert bool(jnp.allclose(out, ref, rtol=2e-2, atol=2e-2)), (out, ref)
    print("KERNEL_OK")
</pallas_src>

<mosaic_0001>
module attributes {stable_mosaic.version = 11 : i64} {
  func.func @kernel(%arg0: i32, %arg1: memref<1x16x598xbf16, #tpu.memory_space<vmem>>, %arg2: memref<32x144xbf16, #tpu.memory_space<vmem>>, %arg3: memref<32x288xbf16, #tpu.memory_space<vmem>>, %arg4: memref<16x288xbf16, #tpu.memory_space<vmem>>, %arg5: memref<16x144xbf16, #tpu.memory_space<vmem>>, %arg6: memref<16x144xbf16, #tpu.memory_space<vmem>>, %arg7: memref<16x144xbf16, #tpu.memory_space<vmem>>, %arg8: memref<32x1xf32, #tpu.memory_space<vmem>>, %arg9: memref<32x1xf32, #tpu.memory_space<vmem>>, %arg10: memref<16x1xf32, #tpu.memory_space<vmem>>, %arg11: memref<16x1xf32, #tpu.memory_space<vmem>>, %arg12: memref<16x1xf32, #tpu.memory_space<vmem>>, %arg13: memref<16x1xf32, #tpu.memory_space<vmem>>, %arg14: memref<624x418xbf16, #tpu.memory_space<vmem>>, %arg15: memref<440x340xbf16, #tpu.memory_space<vmem>>, %arg16: memref<1x4x16xf32, #tpu.memory_space<vmem>>, %arg17: memref<1x1x16xf32, #tpu.memory_space<vmem>>, %arg18: memref<32x678xbf16, #tpu.memory_space<vmem>>, %arg19: memref<32x418xbf16, #tpu.memory_space<vmem>>, %arg20: memref<288x624xbf16, #tpu.memory_space<vmem>>) attributes {dimension_semantics = [#tpu.dimension_semantics<parallel>], iteration_bounds = array<i64: 2>, scalar_prefetch = 0 : i64, scratch_operands = 3 : i64, tpu.core_type = #tpu.core_type<tc>, window_params = [{transform_indices = @transform_0, window_bounds = array<i64: 1, 16, 598>}, {pipeline_mode = #tpu.pipeline_mode<synchronous>, transform_indices = @transform_1, window_bounds = array<i64: 32, 144>}, {pipeline_mode = #tpu.pipeline_mode<synchronous>, transform_indices = @transform_2, window_bounds = array<i64: 32, 288>}, {pipeline_mode = #tpu.pipeline_mode<synchronous>, transform_indices = @transform_3, window_bounds = array<i64: 16, 288>}, {pipeline_mode = #tpu.pipeline_mode<synchronous>, transform_indices = @transform_4, window_bounds = array<i64: 16, 144>}, {pipeline_mode = #tpu.pipeline_mode<synchronous>, transform_indices = @transform_5, window_bounds = array<i64: 16, 144>}, {pipeline_mode = #tpu.pipeline_mode<synchronous>, transform_indices = @transform_6, window_bounds = array<i64: 16, 144>}, {pipeline_mode = #tpu.pipeline_mode<synchronous>, transform_indices = @transform_7, window_bounds = array<i64: 32, 1>}, {pipeline_mode = #tpu.pipeline_mode<synchronous>, transform_indices = @transform_8, window_bounds = array<i64: 32, 1>}, {pipeline_mode = #tpu.pipeline_mode<synchronous>, transform_indices = @transform_9, window_bounds = array<i64: 16, 1>}, {pipeline_mode = #tpu.pipeline_mode<synchronous>, transform_indices = @transform_10, window_bounds = array<i64: 16, 1>}, {pipeline_mode = #tpu.pipeline_mode<synchronous>, transform_indices = @transform_11, window_bounds = array<i64: 16, 1>}, {pipeline_mode = #tpu.pipeline_mode<synchronous>, transform_indices = @transform_12, window_bounds = array<i64: 16, 1>}, {pipeline_mode = #tpu.pipeline_mode<synchronous>, transform_indices = @transform_13, window_bounds = array<i64: 624, 418>}, {pipeline_mode = #tpu.pipeline_mode<synchronous>, transform_indices = @transform_14, window_bounds = array<i64: 440, 340>}, {transform_indices = @transform_15, window_bounds = array<i64: 1, 4, 16>}, {transform_indices = @transform_16, window_bounds = array<i64: 1, 1, 16>}]} {
    %c0 = arith.constant 0 : index
    %c0_0 = arith.constant 0 : index
    %c0_1 = arith.constant 0 : index
    %0 = vector.load %arg1[%c0, %c0_0, %c0_1] : memref<1x16x598xbf16, #tpu.memory_space<vmem>>, vector<1x16x520xbf16>
    %1 = vector.shape_cast %0 : vector<1x16x520xbf16> to vector<16x520xbf16>
    %c0_2 = arith.constant 0 : index
    %c0_3 = arith.constant 0 : index
    %2 = vector.load %arg20[%c0_2, %c0_3] : memref<288x624xbf16, #tpu.memory_space<vmem>>, vector<16x520xbf16>
    tpu.vector_store %arg20[%c0_2, %c0_3], %1 {strides = array<i32>} : memref<288x624xbf16, #tpu.memory_space<vmem>>, vector<16x520xbf16>,
    %c0_4 = arith.constant 0 : index
    %c0_5 = arith.constant 0 : index
    %c1 = arith.constant 1 : index
    %3 = vector.load %arg1[%c0_4, %c0_5, %c1] : memref<1x16x598xbf16, #tpu.memory_space<vmem>>, vector<1x16x520xbf16>
    %4 = vector.shape_cast %3 : vector<1x16x520xbf16> to vector<16x520xbf16>
    %c16 = arith.constant 16 : index
    %c0_6 = arith.constant 0 : index
    %5 = vector.load %arg20[%c16, %c0_6] : memref<288x624xbf16, #tpu.memory_space<vmem>>, vector<16x520xbf16>
    tpu.vector_store %arg20[%c16, %c0_6], %4 {strides = array<i32>} : memref<288x624xbf16, #tpu.memory_space<vmem>>, vector<16x520xbf16>,
    %c0_7 = arith.constant 0 : index
    %c0_8 = arith.constant 0 : index
    %c2 = arith.constant 2 : index
    %6 = vector.load %arg1[%c0_7, %c0_8, %c2] : memref<1x16x598xbf16, #tpu.memory_space<vmem>>, vector<1x16x520xbf16>
    %7 = vector.shape_cast %6 : vector<1x16x520xbf16> to vector<16x520xbf16>
    %c32 = arith.constant 32 : index
    %c0_9 = arith.constant 0 : index
    %8 = vector.load %arg20[%c32, %c0_9] : memref<288x624xbf16, #tpu.memory_space<vmem>>, vector<16x520xbf16>
    tpu.vector_store %arg20[%c32, %c0_9], %7 {strides = array<i32>} : memref<288x624xbf16, #tpu.memory_space<vmem>>, vector<16x520xbf16>,
    %c0_10 = arith.constant 0 : index
    %c0_11 = arith.constant 0 : index
    %c26 = arith.constant 26 : index
    %9 = vector.load %arg1[%c0_10, %c0_11, %c26] : memref<1x16x598xbf16, #tpu.memory_space<vmem>>, vector<1x16x520xbf16>
    %10 = vector.shape_cast %9 : vector<1x16x520xbf16> to vector<16x520xbf16>
    %c48 = arith.constant 48 : index
    %c0_12 = arith.constant 0 : index
    %11 = vector.load %arg20[%c48, %c0_12] : memref<288x624xbf16, #tpu.memory_space<vmem>>, vector<16x520xbf16>
    tpu.vector_store %arg20[%c48, %c0_12], %10 {strides = array<i32>} : memref<288x624xbf16, #tpu.memory_space<vmem>>, vector<16x520xbf16>,
    %c0_13 = arith.constant 0 : index
    %c0_14 = arith.constant 0 : index
    %c27 = arith.constant 27 : index
    %12 = vector.load %arg1[%c0_13, %c0_14, %c27] : memref<1x16x598xbf16, #tpu.memory_space<vmem>>, vector<1x16x520xbf16>
    %13 = vector.shape_cast %12 : vector<1x16x520xbf16> to vector<16x520xbf16>
    %c64 = arith.constant 64 : index
    %c0_15 = arith.constant 0 : index
    %14 = vector.load %arg20[%c64, %c0_15] : memref<288x624xbf16, #tpu.memory_space<vmem>>, vector<16x520xbf16>
    tpu.vector_store %arg20[%c64, %c0_15], %13 {strides = array<i32>} : memref<288x624xbf16, #tpu.memory_space<vmem>>, vector<16x520xbf16>,
    %c0_16 = arith.constant 0 : index
    %c0_17 = arith.constant 0 : index
    %c28 = arith.constant 28 : index
    %15 = vector.load %arg1[%c0_16, %c0_17, %c28] : memref<1x16x598xbf16, #tpu.memory_space<vmem>>, vector<1x16x520xbf16>
    %16 = vector.shape_cast %15 : vector<1x16x520xbf16> to vector<16x520xbf16>
    %c80 = arith.constant 80 : index
    %c0_18 = arith.constant 0 : index
    %17 = vector.load %arg20[%c80, %c0_18] : memref<288x624xbf16, #tpu.memory_space<vmem>>, vector<16x520xbf16>
    tpu.vector_store %arg20[%c80, %c0_18], %16 {strides = array<i32>} : memref<288x624xbf16, #tpu.memory_space<vmem>>, vector<16x520xbf16>,
    %c0_19 = arith.constant 0 : index
    %c0_20 = arith.constant 0 : index
    %c52 = arith.constant 52 : index
    %18 = vector.load %arg1[%c0_19, %c0_20, %c52] : memref<1x16x598xbf16, #tpu.memory_space<vmem>>, vector<1x16x520xbf16>
    %19 = vector.shape_cast %18 : vector<1x16x520xbf16> to vector<16x520xbf16>
    %c96 = arith.constant 96 : index
    %c0_21 = arith.constant 0 : index
    %20 = vector.load %arg20[%c96, %c0_21] : memref<288x624xbf16, #tpu.memory_space<vmem>>, vector<16x520xbf16>
    tpu.vector_store %arg20[%c96, %c0_21], %19 {strides = array<i32>} : memref<288x624xbf16, #tpu.memory_space<vmem>>, vector<16x520xbf16>,
    %c0_22 = arith.constant 0 : index
    %c0_23 = arith.constant 0 : index
    %c53 = arith.constant 53 : index
    %21 = vector.load %arg1[%c0_22, %c0_23, %c53] : memref<1x16x598xbf16, #tpu.memory_space<vmem>>, vector<1x16x520xbf16>
    %22 = vector.shape_cast %21 : vector<1x16x520xbf16> to vector<16x520xbf16>
    %c112 = arith.constant 112 : index
    %c0_24 = arith.constant 0 : index
    %23 = vector.load %arg20[%c112, %c0_24] : memref<288x624xbf16, #tpu.memory_space<vmem>>, vector<16x520xbf16>
    tpu.vector_store %arg20[%c112, %c0_24], %22 {strides = array<i32>} : memref<288x624xbf16, #tpu.memory_space<vmem>>, vector<16x520xbf16>,
    %c0_25 = arith.constant 0 : index
    %c0_26 = arith.constant 0 : index
    %c54 = arith.constant 54 : index
    %24 = vector.load %arg1[%c0_25, %c0_26, %c54] : memref<1x16x598xbf16, #tpu.memory_space<vmem>>, vector<1x16x520xbf16>
    %25 = vector.shape_cast %24 : vector<1x16x520xbf16> to vector<16x520xbf16>
    %c128 = arith.constant 128 : index
    %c0_27 = arith.constant 0 : index
    %26 = vector.load %arg20[%c128, %c0_27] : memref<288x624xbf16, #tpu.memory_space<vmem>>, vector<16x520xbf16>
    tpu.vector_store %arg20[%c128, %c0_27], %25 {strides = array<i32>} : memref<288x624xbf16, #tpu.memory_space<vmem>>, vector<16x520xbf16>,
    %c0_28 = arith.constant 0 : index
    %c0_29 = arith.constant 0 : index
    %27 = vector.load %arg2[%c0_28, %c0_29] : memref<32x144xbf16, #tpu.memory_space<vmem>>, vector<32x144xbf16>
    %c0_30 = arith.constant 0 : index
    %c0_31 = arith.constant 0 : index
    %28 = vector.load %arg20[%c0_30, %c0_31] : memref<288x624xbf16, #tpu.memory_space<vmem>>, vector<144x520xbf16>
    %cst = arith.constant dense<0.000000e+00> : vector<32x520xf32>
    %29 = tpu.matmul %27, %28, %cst {dimension_numbers = #tpu.dot_dimension_numbers<[1], [0], [0], [1], [0, 0, 1, 1], [], []>} : vector<32x144xbf16>, vector<144x520xbf16>, vector<32x520xf32> -> vector<32x520xf32>
    %c0_32 = arith.constant 0 : index
    %c0_33 = arith.constant 0 : index
    %30 = vector.load %arg8[%c0_32, %c0_33] : memref<32x1xf32, #tpu.memory_space<vmem>>, vector<32x1xf32>
    %31 = vector.broadcast %30 : vector<32x1xf32> to vector<32x520xf32>
    %32 = arith.addf %29, %31 : vector<32x520xf32>
    %cst_34 = arith.constant 0.000000e+00 : f32
    %33 = vector.broadcast %cst_34 : f32 to vector<32x520xf32>
    %34 = arith.maximumf %32, %33 : vector<32x520xf32>
    %35 = tpu.iota {dimensions = array<i32: 1>} : vector<1x520xi32>
    %c26_i32 = arith.constant 26 : i32
    %c0_i32 = arith.constant 0 : i32
    %36 = arith.cmpi eq, %c26_i32, %c0_i32 : i32
    %c1_i32 = arith.constant 1 : i32
    %37 = arith.select %36, %c1_i32, %c26_i32 : i32
    %38 = vector.broadcast %37 : i32 to vector<1x520xi32>
    %39 = arith.remsi %35, %38 : vector<1x520xi32>
    %c0_i32_35 = arith.constant 0 : i32
    %40 = vector.broadcast %c0_i32_35 : i32 to vector<1x520xi32>
    %41 = arith.cmpi ne, %39, %40 : vector<1x520xi32>
    %c0_i32_36 = arith.constant 0 : i32
    %42 = vector.broadcast %c0_i32_36 : i32 to vector<1x520xi32>
    %43 = arith.cmpi slt, %39, %42 : vector<1x520xi32>
    %c0_i32_37 = arith.constant 0 : i32
    %44 = arith.cmpi slt, %37, %c0_i32_37 : i32
    %45 = vector.broadcast %44 : i1 to vector<1x520xi1>
    %46 = vector.broadcast %45 : vector<1x520xi1> to vector<1x520xi1>
    %47 = arith.xori %43, %46 : vector<1x520xi1>
    %48 = arith.andi %47, %41 : vector<1x520xi1>
    %49 = vector.broadcast %37 : i32 to vector<1x520xi32>
    %50 = arith.addi %39, %49 : vector<1x520xi32>
    %51 = arith.select %48, %50, %39 : vector<1x520xi1>, vector<1x520xi32>
    %c20_i32 = arith.constant 20 : i32
    %52 = vector.broadcast %c20_i32 : i32 to vector<1x520xi32>
    %53 = arith.cmpi slt, %51, %52 : vector<1x520xi32>
    %54 = arith.extui %53 : vector<1x520xi1> to vector<1x520xi32>
    %55 = arith.sitofp %54 : vector<1x520xi32> to vector<1x520xf32>
    %56 = vector.broadcast %55 : vector<1x520xf32> to vector<32x520xf32>
    %57 = arith.mulf %34, %56 : vector<32x520xf32>
    %cst_38 = arith.constant 0.000000e+00 : bf16
    %58 = vector.broadcast %cst_38 : bf16 to vector<32x678xbf16>
    %c0_39 = arith.constant 0 : index
    %c0_40 = arith.constant 0 : index
    %59 = vector.load %arg18[%c0_39, %c0_40] : memref<32x678xbf16, #tpu.memory_space<vmem>>, vector<32x678xbf16>
    tpu.vector_store %arg18[%c0_39, %c0_40], %58 {strides = array<i32>} : memref<32x678xbf16, #tpu.memory_space<vmem>>, vector<32x678xbf16>,
    %60 = arith.truncf %57 : vector<32x520xf32> to vector<32x520xbf16>
    %c0_41 = arith.constant 0 : index
    %c81 = arith.constant 81 : index
    %61 = vector.load %arg18[%c0_41, %c81] : memref<32x678xbf16, #tpu.memory_space<vmem>>, vector<32x520xbf16>
    tpu.vector_store %arg18[%c0_41, %c81], %60 {strides = array<i32>} : memref<32x678xbf16, #tpu.memory_space<vmem>>, vector<32x520xbf16>,
    %c0_42 = arith.constant 0 : index
    %c0_43 = arith.constant 0 : index
    %62 = vector.load %arg18[%c0_42, %c0_43] : memref<32x678xbf16, #tpu.memory_space<vmem>>, vector<32x624xbf16>
    %c0_44 = arith.constant 0 : index
    %c0_45 = arith.constant 0 : index
    %63 = vector.load %arg20[%c0_44, %c0_45] : memref<288x624xbf16, #tpu.memory_space<vmem>>, vector<32x624xbf16>
    tpu.vector_store %arg20[%c0_44, %c0_45], %62 {strides = array<i32>} : memref<288x624xbf16, #tpu.memory_space<vmem>>, vector<32x624xbf16>,
    %c0_46 = arith.constant 0 : index
    %c1_47 = arith.constant 1 : index
    %64 = vector.load %arg18[%c0_46, %c1_47] : memref<32x678xbf16, #tpu.memory_space<vmem>>, vector<32x624xbf16>
    %c32_48 = arith.constant 32 : index
    %c0_49 = arith.constant 0 : index
    %65 = vector.load %arg20[%c32_48, %c0_49] : memref<288x624xbf16, #tpu.memory_space<vmem>>, vector<32x624xbf16>
    tpu.vector_store %arg20[%c32_48, %c0_49], %64 {strides = array<i32>} : memref<288x624xbf16, #tpu.memory_space<vmem>>, vector<32x624xbf16>,
    %c0_50 = arith.constant 0 : index
    %c2_51 = arith.constant 2 : index
    %66 = vector.load %arg18[%c0_50, %c2_51] : memref<32x678xbf16, #tpu.memory_space<vmem>>, vector<32x624xbf16>
    %c64_52 = arith.constant 64 : index
    %c0_53 = arith.constant 0 : index
    %67 = vector.load %arg20[%c64_52, %c0_53] : memref<288x624xbf16, #tpu.memory_space<vmem>>, vector<32x624xbf16>
    tpu.vector_store %arg20[%c64_52, %c0_53], %66 {strides = array<i32>} : memref<288x624xbf16, #tpu.memory_space<vmem>>, vector<32x624xbf16>,
    %c0_54 = arith.constant 0 : index
    %c26_55 = arith.constant 26 : index
    %68 = vector.load %arg18[%c0_54, %c26_55] : memref<32x678xbf16, #tpu.memory_space<vmem>>, vector<32x624xbf16>
    %c96_56 = arith.constant 96 : index
    %c0_57 = arith.constant 0 : index
    %69 = vector.load %arg20[%c96_56, %c0_57] : memref<288x624xbf16, #tpu.memory_space<vmem>>, vector<32x624xbf16>
    tpu.vector_store %arg20[%c96_56, %c0_57], %68 {strides = array<i32>} : memref<288x624xbf16, #tpu.memory_space<vmem>>, vector<32x624xbf16>,
    %c0_58 = arith.constant 0 : index
    %c27_59 = arith.constant 27 : index
    %70 = vector.load %arg18[%c0_58, %c27_59] : memref<32x678xbf16, #tpu.memory_space<vmem>>, vector<32x624xbf16>
    %c128_60 = arith.constant 128 : index
    %c0_61 = arith.constant 0 : index
    %71 = vector.load %arg20[%c128_60, %c0_61] : memref<288x624xbf16, #tpu.memory_space<vmem>>, vector<32x624xbf16>
    tpu.vector_store %arg20[%c128_60, %c0_61], %70 {strides = array<i32>} : memref<288x624xbf16, #tpu.memory_space<vmem>>, vector<32x624xbf16>,
    %c0_62 = arith.constant 0 : index
    %c28_63 = arith.constant 28 : index
    %72 = vector.load %arg18[%c0_62, %c28_63] : memref<32x678xbf16, #tpu.memory_space<vmem>>, vector<32x624xbf16>
    %c160 = arith.constant 160 : index
    %c0_64 = arith.constant 0 : index
    %73 = vector.load %arg20[%c160, %c0_64] : memref<288x624xbf16, #tpu.memory_space<vmem>>, vector<32x624xbf16>
    tpu.vector_store %arg20[%c160, %c0_64], %72 {strides = array<i32>} : memref<288x624xbf16, #tpu.memory_space<vmem>>, vector<32x624xbf16>,
    %c0_65 = arith.constant 0 : index
    %c52_66 = arith.constant 52 : index
    %74 = vector.load %arg18[%c0_65, %c52_66] : memref<32x678xbf16, #tpu.memory_space<vmem>>, vector<32x624xbf16>
    %c192 = arith.constant 192 : index
    %c0_67 = arith.constant 0 : index
    %75 = vector.load %arg20[%c192, %c0_67] : memref<288x624xbf16, #tpu.memory_space<vmem>>, vector<32x624xbf16>
    tpu.vector_store %arg20[%c192, %c0_67], %74 {strides = array<i32>} : memref<288x624xbf16, #tpu.memory_space<vmem>>, vector<32x624xbf16>,
    %c0_68 = arith.constant 0 : index
    %c53_69 = arith.constant 53 : index
    %76 = vector.load %arg18[%c0_68, %c53_69] : memref<32x678xbf16, #tpu.memory_space<vmem>>, vector<32x624xbf16>
    %c224 = arith.constant 224 : index
    %c0_70 = arith.constant 0 : index
    %77 = vector.load %arg20[%c224, %c0_70] : memref<288x624xbf16, #tpu.memory_space<vmem>>, vector<32x624xbf16>
    tpu.vector_store %arg20[%c224, %c0_70], %76 {strides = array<i32>} : memref<288x624xbf16, #tpu.memory_space<vmem>>, vector<32x624xbf16>,
    %c0_71 = arith.constant 0 : index
    %c54_72 = arith.constant 54 : index
    %78 = vector.load %arg18[%c0_71, %c54_72] : memref<32x678xbf16, #tpu.memory_space<vmem>>, vector<32x624xbf16>
    %c256 = arith.constant 256 : index
    %c0_73 = arith.constant 0 : index
    %79 = vector.load %arg20[%c256, %c0_73] : memref<288x624xbf16, #tpu.memory_space<vmem>>, vector<32x624xbf16>
    tpu.vector_store %arg20[%c256, %c0_73], %78 {strides = array<i32>} : memref<288x624xbf16, #tpu.memory_space<vmem>>, vector<32x624xbf16>,
    %c0_74 = arith.constant 0 : index
    %c0_75 = arith.constant 0 : index
    %80 = vector.load %arg3[%c0_74, %c0_75] : memref<32x288xbf16, #tpu.memory_space<vmem>>, vector<32x288xbf16>
    %c0_76 = arith.constant 0 : index
    %c0_77 = arith.constant 0 : index
    %81 = vector.load %arg20[%c0_76, %c0_77] : memref<288x624xbf16, #tpu.memory_space<vmem>>, vector<288x624xbf16>
    %cst_78 = arith.constant dense<0.000000e+00> : vector<32x624xf32>
    %82 = tpu.matmul %80, %81, %cst_78 {dimension_numbers = #tpu.dot_dimension_numbers<[1], [0], [0], [1], [0, 0, 1, 1], [], []>} : vector<32x288xbf16>, vector<288x624xbf16>, vector<32x624xf32> -> vector<32x624xf32>
    %c0_79 = arith.constant 0 : index
    %c0_80 = arith.constant 0 : index
    %83 = vector.load %arg9[%c0_79, %c0_80] : memref<32x1xf32, #tpu.memory_space<vmem>>, vector<32x1xf32>
    %84 = vector.broadcast %83 : vector<32x1xf32> to vector<32x624xf32>
    %85 = arith.addf %82, %84 : vector<32x624xf32>
    %cst_81 = arith.constant 0.000000e+00 : f32
    %86 = vector.broadcast %cst_81 : f32 to vector<32x624xf32>
    %87 = arith.maximumf %85, %86 : vector<32x624xf32>
    %88 = arith.truncf %87 : vector<32x624xf32> to vector<32x624xbf16>
    %c0_82 = arith.constant 0 : index
    %c0_83 = arith.constant 0 : index
    %89 = vector.load %arg14[%c0_82, %c0_83] : memref<624x418xbf16, #tpu.memory_space<vmem>>, vector<624x418xbf16>
    %cst_84 = arith.constant dense<0.000000e+00> : vector<32x418xf32>
    %90 = tpu.matmul %88, %89, %cst_84 {dimension_numbers = #tpu.dot_dimension_numbers<[1], [0], [0], [1], [0, 0, 1, 1], [], []>} : vector<32x624xbf16>, vector<624x418xbf16>, vector<32x418xf32> -> vector<32x418xf32>
    %91 = arith.truncf %90 : vector<32x418xf32> to vector<32x418xbf16>
    %c0_85 = arith.constant 0 : index
    %c0_86 = arith.constant 0 : index
    %92 = vector.load %arg19[%c0_85, %c0_86] : memref<32x418xbf16, #tpu.memory_space<vmem>>, vector<32x418xbf16>
    tpu.vector_store %arg19[%c0_85, %c0_86], %91 {strides = array<i32>} : memref<32x418xbf16, #tpu.memory_space<vmem>>, vector<32x418xbf16>,
    %c0_87 = arith.constant 0 : index
    %c0_88 = arith.constant 0 : index
    %93 = vector.load %arg19[%c0_87, %c0_88] : memref<32x418xbf16, #tpu.memory_space<vmem>>, vector<32x352xbf16>
    %c0_89 = arith.constant 0 : index
    %c0_90 = arith.constant 0 : index
    %94 = vector.load %arg20[%c0_89, %c0_90] : memref<288x624xbf16, #tpu.memory_space<vmem>>, vector<32x352xbf16>
    tpu.vector_store %arg20[%c0_89, %c0_90], %93 {strides = array<i32>} : memref<288x624xbf16, #tpu.memory_space<vmem>>, vector<32x352xbf16>,
    %c0_91 = arith.constant 0 : index
    %c1_92 = arith.constant 1 : index
    %95 = vector.load %arg19[%c0_91, %c1_92] : memref<32x418xbf16, #tpu.memory_space<vmem>>, vector<32x352xbf16>
    %c32_93 = arith.constant 32 : index
    %c0_94 = arith.constant 0 : index
    %96 = vector.load %arg20[%c32_93, %c0_94] : memref<288x624xbf16, #tpu.memory_space<vmem>>, vector<32x352xbf16>
    tpu.vector_store %arg20[%c32_93, %c0_94], %95 {strides = array<i32>} : memref<288x624xbf16, #tpu.memory_space<vmem>>, vector<32x352xbf16>,
    %c0_95 = arith.constant 0 : index
    %c2_96 = arith.constant 2 : index
    %97 = vector.load %arg19[%c0_95, %c2_96] : memref<32x418xbf16, #tpu.memory_space<vmem>>, vector<32x352xbf16>
    %c64_97 = arith.constant 64 : index
    %c0_98 = arith.constant 0 : index
    %98 = vector.load %arg20[%c64_97, %c0_98] : memref<288x624xbf16, #tpu.memory_space<vmem>>, vector<32x352xbf16>
    tpu.vector_store %arg20[%c64_97, %c0_98], %97 {strides = array<i32>} : memref<288x624xbf16, #tpu.memory_space<vmem>>, vector<32x352xbf16>,
    %c0_99 = arith.constant 0 : index
    %c22 = arith.constant 22 : index
    %99 = vector.load %arg19[%c0_99, %c22] : memref<32x418xbf16, #tpu.memory_space<vmem>>, vector<32x352xbf16>
    %c96_100 = arith.constant 96 : index
    %c0_101 = arith.constant 0 : index
    %100 = vector.load %arg20[%c96_100, %c0_101] : memref<288x624xbf16, #tpu.memory_space<vmem>>, vector<32x352xbf16>
    tpu.vector_store %arg20[%c96_100, %c0_101], %99 {strides = array<i32>} : memref<288x624xbf16, #tpu.memory_space<vmem>>, vector<32x352xbf16>,
    %c0_102 = arith.constant 0 : index
    %c23 = arith.constant 23 : index
    %101 = vector.load %arg19[%c0_102, %c23] : memref<32x418xbf16, #tpu.memory_space<vmem>>, vector<32x352xbf16>
    %c128_103 = arith.constant 128 : index
    %c0_104 = arith.constant 0 : index
    %102 = vector.load %arg20[%c128_103, %c0_104] : memref<288x624xbf16, #tpu.memory_space<vmem>>, vector<32x352xbf16>
    tpu.vector_store %arg20[%c128_103, %c0_104], %101 {strides = array<i32>} : memref<288x624xbf16, #tpu.memory_space<vmem>>, vector<32x352xbf16>,
    %c0_105 = arith.constant 0 : index
    %c24 = arith.constant 24 : index
    %103 = vector.load %arg19[%c0_105, %c24] : memref<32x418xbf16, #tpu.memory_space<vmem>>, vector<32x352xbf16>
    %c160_106 = arith.constant 160 : index
    %c0_107 = arith.constant 0 : index
    %104 = vector.load %arg20[%c160_106, %c0_107] : memref<288x624xbf16, #tpu.memory_space<vmem>>, vector<32x352xbf16>
    tpu.vector_store %arg20[%c160_106, %c0_107], %103 {strides = array<i32>} : memref<288x624xbf16, #tpu.memory_space<vmem>>, vector<32x352xbf16>,
    %c0_108 = arith.constant 0 : index
    %c44 = arith.constant 44 : index
    %105 = vector.load %arg19[%c0_108, %c44] : memref<32x418xbf16, #tpu.memory_space<vmem>>, vector<32x352xbf16>
    %c192_109 = arith.constant 192 : index
    %c0_110 = arith.constant 0 : index
    %106 = vector.load %arg20[%c192_109, %c0_110] : memref<288x624xbf16, #tpu.memory_space<vmem>>, vector<32x352xbf16>
    tpu.vector_store %arg20[%c192_109, %c0_110], %105 {strides = array<i32>} : memref<288x624xbf16, #tpu.memory_space<vmem>>, vector<32x352xbf16>,
    %c0_111 = arith.constant 0 : index
    %c45 = arith.constant 45 : index
    %107 = vector.load %arg19[%c0_111, %c45] : memref<32x418xbf16, #tpu.memory_space<vmem>>, vector<32x352xbf16>
    %c224_112 = arith.constant 224 : index
    %c0_113 = arith.constant 0 : index
    %108 = vector.load %arg20[%c224_112, %c0_113] : memref<288x624xbf16, #tpu.memory_space<vmem>>, vector<32x352xbf16>
    tpu.vector_store %arg20[%c224_112, %c0_113], %107 {strides = array<i32>} : memref<288x624xbf16, #tpu.memory_space<vmem>>, vector<32x352xbf16>,
    %c0_114 = arith.constant 0 : index
    %c46 = arith.constant 46 : index
    %109 = vector.load %arg19[%c0_114, %c46] : memref<32x418xbf16, #tpu.memory_space<vmem>>, vector<32x352xbf16>
    %c256_115 = arith.constant 256 : index
    %c0_116 = arith.constant 0 : index
    %110 = vector.load %arg20[%c256_115, %c0_116] : memref<288x624xbf16, #tpu.memory_space<vmem>>, vector<32x352xbf16>
    tpu.vector_store %arg20[%c256_115, %c0_116], %109 {strides = array<i32>} : memref<288x624xbf16, #tpu.memory_space<vmem>>, vector<32x352xbf16>,
    %c0_117 = arith.constant 0 : index
    %c0_118 = arith.constant 0 : index
    %111 = vector.load %arg4[%c0_117, %c0_118] : memref<16x288xbf16, #tpu.memory_space<vmem>>, vector<16x288xbf16>
    %c0_119 = arith.constant 0 : index
    %c0_120 = arith.constant 0 : index
    %112 = vector.load %arg20[%c0_119, %c0_120] : memref<288x624xbf16, #tpu.memory_space<vmem>>, vector<288x352xbf16>
    %cst_121 = arith.constant dense<0.000000e+00> : vector<16x352xf32>
    %113 = tpu.matmul %111, %112, %cst_121 {dimension_numbers = #tpu.dot_dimension_numbers<[1], [0], [0], [1], [0, 0, 1, 1], [], []>} : vector<16x288xbf16>, vector<288x352xbf16>, vector<16x352xf32> -> vector<16x352xf32>
    %c0_122 = arith.constant 0 : index
    %c0_123 = arith.constant 0 : index
    %114 = vector.load %arg10[%c0_122, %c0_123] : memref<16x1xf32, #tpu.memory_space<vmem>>, vector<16x1xf32>
    %115 = vector.broadcast %114 : vector<16x1xf32> to vector<16x352xf32>
    %116 = arith.addf %113, %115 : vector<16x352xf32>
    %cst_124 = arith.constant 0.000000e+00 : f32
    %117 = vector.broadcast %cst_124 : f32 to vector<16x352xf32>
    %118 = arith.maximumf %116, %117 : vector<16x352xf32>
    %119 = tpu.iota {dimensions = array<i32: 1>} : vector<1x352xi32>
    %c22_i32 = arith.constant 22 : i32
    %c0_i32_125 = arith.constant 0 : i32
    %120 = arith.cmpi eq, %c22_i32, %c0_i32_125 : i32
    %c1_i32_126 = arith.constant 1 : i32
    %121 = arith.select %120, %c1_i32_126, %c22_i32 : i32
    %122 = vector.broadcast %121 : i32 to vector<1x352xi32>
    %123 = arith.remsi %119, %122 : vector<1x352xi32>
    %c0_i32_127 = arith.constant 0 : i32
    %124 = vector.broadcast %c0_i32_127 : i32 to vector<1x352xi32>
    %125 = arith.cmpi ne, %123, %124 : vector<1x352xi32>
    %c0_i32_128 = arith.constant 0 : i32
    %126 = vector.broadcast %c0_i32_128 : i32 to vector<1x352xi32>
    %127 = arith.cmpi slt, %123, %126 : vector<1x352xi32>
    %c0_i32_129 = arith.constant 0 : i32
    %128 = arith.cmpi slt, %121, %c0_i32_129 : i32
    %129 = vector.broadcast %128 : i1 to vector<1x352xi1>
    %130 = vector.broadcast %129 : vector<1x352xi1> to vector<1x352xi1>
    %131 = arith.xori %127, %130 : vector<1x352xi1>
    %132 = arith.andi %131, %125 : vector<1x352xi1>
    %133 = vector.broadcast %121 : i32 to vector<1x352xi32>
    %134 = arith.addi %123, %133 : vector<1x352xi32>
    %135 = arith.select %132, %134, %123 : vector<1x352xi1>, vector<1x352xi32>
    %c16_i32 = arith.constant 16 : i32
    %136 = vector.broadcast %c16_i32 : i32 to vector<1x352xi32>
    %137 = arith.cmpi slt, %135, %136 : vector<1x352xi32>
    %138 = arith.extui %137 : vector<1x352xi1> to vector<1x352xi32>
    %139 = arith.sitofp %138 : vector<1x352xi32> to vector<1x352xf32>
    %140 = vector.broadcast %139 : vector<1x352xf32> to vector<16x352xf32>
    %141 = arith.mulf %118, %140 : vector<16x352xf32>
    %cst_130 = arith.constant 0.000000e+00 : bf16
    %142 = vector.broadcast %cst_130 : bf16 to vector<32x678xbf16>
    %c0_131 = arith.constant 0 : index
    %c0_132 = arith.constant 0 : index
    %143 = vector.load %arg18[%c0_131, %c0_132] : memref<32x678xbf16, #tpu.memory_space<vmem>>, vector<32x678xbf16>
    tpu.vector_store %arg18[%c0_131, %c0_132], %142 {strides = array<i32>} : memref<32x678xbf16, #tpu.memory_space<vmem>>, vector<32x678xbf16>,
    %144 = arith.truncf %141 : vector<16x352xf32> to vector<16x352xbf16>
    %c0_133 = arith.constant 0 : index
    %c69 = arith.constant 69 : index
    %145 = vector.load %arg18[%c0_133, %c69] : memref<32x678xbf16, #tpu.memory_space<vmem>>, vector<16x352xbf16>
    tpu.vector_store %arg18[%c0_133, %c69], %144 {strides = array<i32>} : memref<32x678xbf16, #tpu.memory_space<vmem>>, vector<16x352xbf16>,
    %c0_134 = arith.constant 0 : index
    %c0_135 = arith.constant 0 : index
    %146 = vector.load %arg18[%c0_134, %c0_135] : memref<32x678xbf16, #tpu.memory_space<vmem>>, vector<16x440xbf16>
    %c0_136 = arith.constant 0 : index
    %c0_137 = arith.constant 0 : index
    %147 = vector.load %arg20[%c0_136, %c0_137] : memref<288x624xbf16, #tpu.memory_space<vmem>>, vector<16x440xbf16>
    tpu.vector_store %arg20[%c0_136, %c0_137], %146 {strides = array<i32>} : memref<288x624xbf16, #tpu.memory_space<vmem>>, vector<16x440xbf16>,
    %c0_138 = arith.constant 0 : index
    %c1_139 = arith.constant 1 : index
    %148 = vector.load %arg18[%c0_138, %c1_139] : memref<32x678xbf16, #tpu.memory_space<vmem>>, vector<16x440xbf16>
    %c16_140 = arith.constant 16 : index
    %c0_141 = arith.constant 0 : index
    %149 = vector.load %arg20[%c16_140, %c0_141] : memref<288x624xbf16, #tpu.memory_space<vmem>>, vector<16x440xbf16>
    tpu.vector_store %arg20[%c16_140, %c0_141], %148 {strides = array<i32>} : memref<288x624xbf16, #tpu.memory_space<vmem>>, vector<16x440xbf16>,
    %c0_142 = arith.constant 0 : index
    %c2_143 = arith.constant 2 : index
    %150 = vector.load %arg18[%c0_142, %c2_143] : memref<32x678xbf16, #tpu.memory_space<vmem>>, vector<16x440xbf16>
    %c32_144 = arith.constant 32 : index
    %c0_145 = arith.constant 0 : index
    %151 = vector.load %arg20[%c32_144, %c0_145] : memref<288x624xbf16, #tpu.memory_space<vmem>>, vector<16x440xbf16>
    tpu.vector_store %arg20[%c32_144, %c0_145], %150 {strides = array<i32>} : memref<288x624xbf16, #tpu.memory_space<vmem>>, vector<16x440xbf16>,
    %c0_146 = arith.constant 0 : index
    %c22_147 = arith.constant 22 : index
    %152 = vector.load %arg18[%c0_146, %c22_147] : memref<32x678xbf16, #tpu.memory_space<vmem>>, vector<16x440xbf16>
    %c48_148 = arith.constant 48 : index
    %c0_149 = arith.constant 0 : index
    %153 = vector.load %arg20[%c48_148, %c0_149] : memref<288x624xbf16, #tpu.memory_space<vmem>>, vector<16x440xbf16>
    tpu.vector_store %arg20[%c48_148, %c0_149], %152 {strides = array<i32>} : memref<288x624xbf16, #tpu.memory_space<vmem>>, vector<16x440xbf16>,
    %c0_150 = arith.constant 0 : index
    %c23_151 = arith.constant 23 : index
    %154 = vector.load %arg18[%c0_150, %c23_151] : memref<32x678xbf16, #tpu.memory_space<vmem>>, vector<16x440xbf16>
    %c64_152 = arith.constant 64 : index
    %c0_153 = arith.constant 0 : index
    %155 = vector.load %arg20[%c64_152, %c0_153] : memref<288x624xbf16, #tpu.memory_space<vmem>>, vector<16x440xbf16>
    tpu.vector_store %arg20[%c64_152, %c0_153], %154 {strides = array<i32>} : memref<288x624xbf16, #tpu.memory_space<vmem>>, vector<16x440xbf16>,
    %c0_154 = arith.constant 0 : index
    %c24_155 = arith.constant 24 : index
    %156 = vector.load %arg18[%c0_154, %c24_155] : memref<32x678xbf16, #tpu.memory_space<vmem>>, vector<16x440xbf16>
    %c80_156 = arith.constant 80 : index
    %c0_157 = arith.constant 0 : index
    %157 = vector.load %arg20[%c80_156, %c0_157] : memref<288x624xbf16, #tpu.memory_space<vmem>>, vector<16x440xbf16>
    tpu.vector_store %arg20[%c80_156, %c0_157], %156 {strides = array<i32>} : memref<288x624xbf16, #tpu.memory_space<vmem>>, vector<16x440xbf16>,
    %c0_158 = arith.constant 0 : index
    %c44_159 = arith.constant 44 : index
    %158 = vector.load %arg18[%c0_158, %c44_159] : memref<32x678xbf16, #tpu.memory_space<vmem>>, vector<16x440xbf16>
    %c96_160 = arith.constant 96 : index
    %c0_161 = arith.constant 0 : index
    %159 = vector.load %arg20[%c96_160, %c0_161] : memref<288x624xbf16, #tpu.memory_space<vmem>>, vector<16x440xbf16>
    tpu.vector_store %arg20[%c96_160, %c0_161], %158 {strides = array<i32>} : memref<288x624xbf16, #tpu.memory_space<vmem>>, vector<16x440xbf16>,
    %c0_162 = arith.constant 0 : index
    %c45_163 = arith.constant 45 : index
    %160 = vector.load %arg18[%c0_162, %c45_163] : memref<32x678xbf16, #tpu.memory_space<vmem>>, vector<16x440xbf16>
    %c112_164 = arith.constant 112 : index
    %c0_165 = arith.constant 0 : index
    %161 = vector.load %arg20[%c112_164, %c0_165] : memref<288x624xbf16, #tpu.memory_space<vmem>>, vector<16x440xbf16>
    tpu.vector_store %arg20[%c112_164, %c0_165], %160 {strides = array<i32>} : memref<288x624xbf16, #tpu.memory_space<vmem>>, vector<16x440xbf16>,
    %c0_166 = arith.constant 0 : index
    %c46_167 = arith.constant 46 : index
    %162 = vector.load %arg18[%c0_166, %c46_167] : memref<32x678xbf16, #tpu.memory_space<vmem>>, vector<16x440xbf16>
    %c128_168 = arith.constant 128 : index
    %c0_169 = arith.constant 0 : index
    %163 = vector.load %arg20[%c128_168, %c0_169] : memref<288x624xbf16, #tpu.memory_space<vmem>>, vector<16x440xbf16>
    tpu.vector_store %arg20[%c128_168, %c0_169], %162 {strides = array<i32>} : memref<288x624xbf16, #tpu.memory_space<vmem>>, vector<16x440xbf16>,
    %c0_170 = arith.constant 0 : index
    %c0_171 = arith.constant 0 : index
    %164 = vector.load %arg5[%c0_170, %c0_171] : memref<16x144xbf16, #tpu.memory_space<vmem>>, vector<16x144xbf16>
    %c0_172 = arith.constant 0 : index
    %c0_173 = arith.constant 0 : index
    %165 = vector.load %arg20[%c0_172, %c0_173] : memref<288x624xbf16, #tpu.memory_space<vmem>>, vector<144x440xbf16>
    %cst_174 = arith.constant dense<0.000000e+00> : vector<16x440xf32>
    %166 = tpu.matmul %164, %165, %cst_174 {dimension_numbers = #tpu.dot_dimension_numbers<[1], [0], [0], [1], [0, 0, 1, 1], [], []>} : vector<16x144xbf16>, vector<144x440xbf16>, vector<16x440xf32> -> vector<16x440xf32>
    %c0_175 = arith.constant 0 : index
    %c0_176 = arith.constant 0 : index
    %167 = vector.load %arg11[%c0_175, %c0_176] : memref<16x1xf32, #tpu.memory_space<vmem>>, vector<16x1xf32>
    %168 = vector.broadcast %167 : vector<16x1xf32> to vector<16x440xf32>
    %169 = arith.addf %166, %168 : vector<16x440xf32>
    %cst_177 = arith.constant 0.000000e+00 : f32
    %170 = vector.broadcast %cst_177 : f32 to vector<16x440xf32>
    %171 = arith.maximumf %169, %170 : vector<16x440xf32>
    %172 = arith.truncf %171 : vector<16x440xf32> to vector<16x440xbf16>
    %c0_178 = arith.constant 0 : index
    %c0_179 = arith.constant 0 : index
    %173 = vector.load %arg15[%c0_178, %c0_179] : memref<440x340xbf16, #tpu.memory_space<vmem>>, vector<440x340xbf16>
    %cst_180 = arith.constant dense<0.000000e+00> : vector<16x340xf32>
    %174 = tpu.matmul %172, %173, %cst_180 {dimension_numbers = #tpu.dot_dimension_numbers<[1], [0], [0], [1], [0, 0, 1, 1], [], []>} : vector<16x440xbf16>, vector<440x340xbf16>, vector<16x340xf32> -> vector<16x340xf32>
    %175 = arith.truncf %174 : vector<16x340xf32> to vector<16x340xbf16>
    %c0_181 = arith.constant 0 : index
    %c0_182 = arith.constant 0 : index
    %176 = vector.load %arg19[%c0_181, %c0_182] : memref<32x418xbf16, #tpu.memory_space<vmem>>, vector<16x340xbf16>
    tpu.vector_store %arg19[%c0_181, %c0_182], %175 {strides = array<i32>} : memref<32x418xbf16, #tpu.memory_space<vmem>>, vector<16x340xbf16>,
    %c0_183 = arith.constant 0 : index
    %c0_184 = arith.constant 0 : index
    %177 = vector.load %arg19[%c0_183, %c0_184] : memref<32x418xbf16, #tpu.memory_space<vmem>>, vector<16x280xbf16>
    %c0_185 = arith.constant 0 : index
    %c0_186 = arith.constant 0 : index
    %178 = vector.load %arg20[%c0_185, %c0_186] : memref<288x624xbf16, #tpu.memory_space<vmem>>, vector<16x280xbf16>
    tpu.vector_store %arg20[%c0_185, %c0_186], %177 {strides = array<i32>} : memref<288x624xbf16, #tpu.memory_space<vmem>>, vector<16x280xbf16>,
    %c0_187 = arith.constant 0 : index
    %c1_188 = arith.constant 1 : index
    %179 = vector.load %arg19[%c0_187, %c1_188] : memref<32x418xbf16, #tpu.memory_space<vmem>>, vector<16x280xbf16>
    %c16_189 = arith.constant 16 : index
    %c0_190 = arith.constant 0 : index
    %180 = vector.load %arg20[%c16_189, %c0_190] : memref<288x624xbf16, #tpu.memory_space<vmem>>, vector<16x280xbf16>
    tpu.vector_store %arg20[%c16_189, %c0_190], %179 {strides = array<i32>} : memref<288x624xbf16, #tpu.memory_space<vmem>>, vector<16x280xbf16>,
    %c0_191 = arith.constant 0 : index
    %c2_192 = arith.constant 2 : index
    %181 = vector.load %arg19[%c0_191, %c2_192] : memref<32x418xbf16, #tpu.memory_space<vmem>>, vector<16x280xbf16>
    %c32_193 = arith.constant 32 : index
    %c0_194 = arith.constant 0 : index
    %182 = vector.load %arg20[%c32_193, %c0_194] : memref<288x624xbf16, #tpu.memory_space<vmem>>, vector<16x280xbf16>
    tpu.vector_store %arg20[%c32_193, %c0_194], %181 {strides = array<i32>} : memref<288x624xbf16, #tpu.memory_space<vmem>>, vector<16x280xbf16>,
    %c0_195 = arith.constant 0 : index
    %c20 = arith.constant 20 : index
    %183 = vector.load %arg19[%c0_195, %c20] : memref<32x418xbf16, #tpu.memory_space<vmem>>, vector<16x280xbf16>
    %c48_196 = arith.constant 48 : index
    %c0_197 = arith.constant 0 : index
    %184 = vector.load %arg20[%c48_196, %c0_197] : memref<288x624xbf16, #tpu.memory_space<vmem>>, vector<16x280xbf16>
    tpu.vector_store %arg20[%c48_196, %c0_197], %183 {strides = array<i32>} : memref<288x624xbf16, #tpu.memory_space<vmem>>, vector<16x280xbf16>,
    %c0_198 = arith.constant 0 : index
    %c21 = arith.constant 21 : index
    %185 = vector.load %arg19[%c0_198, %c21] : memref<32x418xbf16, #tpu.memory_space<vmem>>, vector<16x280xbf16>
    %c64_199 = arith.constant 64 : index
    %c0_200 = arith.constant 0 : index
    %186 = vector.load %arg20[%c64_199, %c0_200] : memref<288x624xbf16, #tpu.memory_space<vmem>>, vector<16x280xbf16>
    tpu.vector_store %arg20[%c64_199, %c0_200], %185 {strides = array<i32>} : memref<288x624xbf16, #tpu.memory_space<vmem>>, vector<16x280xbf16>,
    %c0_201 = arith.constant 0 : index
    %c22_202 = arith.constant 22 : index
    %187 = vector.load %arg19[%c0_201, %c22_202] : memref<32x418xbf16, #tpu.memory_space<vmem>>, vector<16x280xbf16>
    %c80_203 = arith.constant 80 : index
    %c0_204 = arith.constant 0 : index
    %188 = vector.load %arg20[%c80_203, %c0_204] : memref<288x624xbf16, #tpu.memory_space<vmem>>, vector<16x280xbf16>
    tpu.vector_store %arg20[%c80_203, %c0_204], %187 {strides = array<i32>} : memref<288x624xbf16, #tpu.memory_space<vmem>>, vector<16x280xbf16>,
    %c0_205 = arith.constant 0 : index
    %c40 = arith.constant 40 : index
    %189 = vector.load %arg19[%c0_205, %c40] : memref<32x418xbf16, #tpu.memory_space<vmem>>, vector<16x280xbf16>
    %c96_206 = arith.constant 96 : index
    %c0_207 = arith.constant 0 : index
    %190 = vector.load %arg20[%c96_206, %c0_207] : memref<288x624xbf16, #tpu.memory_space<vmem>>, vector<16x280xbf16>
    tpu.vector_store %arg20[%c96_206, %c0_207], %189 {strides = array<i32>} : memref<288x624xbf16, #tpu.memory_space<vmem>>, vector<16x280xbf16>,
    %c0_208 = arith.constant 0 : index
    %c41 = arith.constant 41 : index
    %191 = vector.load %arg19[%c0_208, %c41] : memref<32x418xbf16, #tpu.memory_space<vmem>>, vector<16x280xbf16>
    %c112_209 = arith.constant 112 : index
    %c0_210 = arith.constant 0 : index
    %192 = vector.load %arg20[%c112_209, %c0_210] : memref<288x624xbf16, #tpu.memory_space<vmem>>, vector<16x280xbf16>
    tpu.vector_store %arg20[%c112_209, %c0_210], %191 {strides = array<i32>} : memref<288x624xbf16, #tpu.memory_space<vmem>>, vector<16x280xbf16>,
    %c0_211 = arith.constant 0 : index
    %c42 = arith.constant 42 : index
    %193 = vector.load %arg19[%c0_211, %c42] : memref<32x418xbf16, #tpu.memory_space<vmem>>, vector<16x280xbf16>
    %c128_212 = arith.constant 128 : index
    %c0_213 = arith.constant 0 : index
    %194 = vector.load %arg20[%c128_212, %c0_213] : memref<288x624xbf16, #tpu.memory_space<vmem>>, vector<16x280xbf16>
    tpu.vector_store %arg20[%c128_212, %c0_213], %193 {strides = array<i32>} : memref<288x624xbf16, #tpu.memory_space<vmem>>, vector<16x280xbf16>,
    %c0_214 = arith.constant 0 : index
    %c0_215 = arith.constant 0 : index
    %195 = vector.load %arg6[%c0_214, %c0_215] : memref<16x144xbf16, #tpu.memory_space<vmem>>, vector<16x144xbf16>
    %c0_216 = arith.constant 0 : index
    %c0_217 = arith.constant 0 : index
    %196 = vector.load %arg20[%c0_216, %c0_217] : memref<288x624xbf16, #tpu.memory_space<vmem>>, vector<144x280xbf16>
    %cst_218 = arith.constant dense<0.000000e+00> : vector<16x280xf32>
    %197 = tpu.matmul %195, %196, %cst_218 {dimension_numbers = #tpu.dot_dimension_numbers<[1], [0], [0], [1], [0, 0, 1, 1], [], []>} : vector<16x144xbf16>, vector<144x280xbf16>, vector<16x280xf32> -> vector<16x280xf32>
    %c0_219 = arith.constant 0 : index
    %c0_220 = arith.constant 0 : index
    %198 = vector.load %arg12[%c0_219, %c0_220] : memref<16x1xf32, #tpu.memory_space<vmem>>, vector<16x1xf32>
    %199 = vector.broadcast %198 : vector<16x1xf32> to vector<16x280xf32>
    %200 = arith.addf %197, %199 : vector<16x280xf32>
    %cst_221 = arith.constant 0.000000e+00 : f32
    %201 = vector.broadcast %cst_221 : f32 to vector<16x280xf32>
    %202 = arith.maximumf %200, %201 : vector<16x280xf32>
    %203 = tpu.iota {dimensions = array<i32: 1>} : vector<1x280xi32>
    %c20_i32_222 = arith.constant 20 : i32
    %c0_i32_223 = arith.constant 0 : i32
    %204 = arith.cmpi eq, %c20_i32_222, %c0_i32_223 : i32
    %c1_i32_224 = arith.constant 1 : i32
    %205 = arith.select %204, %c1_i32_224, %c20_i32_222 : i32
    %206 = vector.broadcast %205 : i32 to vector<1x280xi32>
    %207 = arith.remsi %203, %206 : vector<1x280xi32>
    %c0_i32_225 = arith.constant 0 : i32
    %208 = vector.broadcast %c0_i32_225 : i32 to vector<1x280xi32>
    %209 = arith.cmpi ne, %207, %208 : vector<1x280xi32>
    %c0_i32_226 = arith.constant 0 : i32
    %210 = vector.broadcast %c0_i32_226 : i32 to vector<1x280xi32>
    %211 = arith.cmpi slt, %207, %210 : vector<1x280xi32>
    %c0_i32_227 = arith.constant 0 : i32
    %212 = arith.cmpi slt, %205, %c0_i32_227 : i32
    %213 = vector.broadcast %212 : i1 to vector<1x280xi1>
    %214 = vector.broadcast %213 : vector<1x280xi1> to vector<1x280xi1>
    %215 = arith.xori %211, %214 : vector<1x280xi1>
    %216 = arith.andi %215, %209 : vector<1x280xi1>
    %217 = vector.broadcast %205 : i32 to vector<1x280xi32>
    %218 = arith.addi %207, %217 : vector<1x280xi32>
    %219 = arith.select %216, %218, %207 : vector<1x280xi1>, vector<1x280xi32>
    %c14_i32 = arith.constant 14 : i32
    %220 = vector.broadcast %c14_i32 : i32 to vector<1x280xi32>
    %221 = arith.cmpi slt, %219, %220 : vector<1x280xi32>
    %222 = arith.extui %221 : vector<1x280xi1> to vector<1x280xi32>
    %223 = arith.sitofp %222 : vector<1x280xi32> to vector<1x280xf32>
    %224 = vector.broadcast %223 : vector<1x280xf32> to vector<16x280xf32>
    %225 = arith.mulf %202, %224 : vector<16x280xf32>
    %cst_228 = arith.constant 0.000000e+00 : bf16
    %226 = vector.broadcast %cst_228 : bf16 to vector<32x678xbf16>
    %c0_229 = arith.constant 0 : index
    %c0_230 = arith.constant 0 : index
    %227 = vector.load %arg18[%c0_229, %c0_230] : memref<32x678xbf16, #tpu.memory_space<vmem>>, vector<32x678xbf16>
    tpu.vector_store %arg18[%c0_229, %c0_230], %226 {strides = array<i32>} : memref<32x678xbf16, #tpu.memory_space<vmem>>, vector<32x678xbf16>,
    %228 = arith.truncf %225 : vector<16x280xf32> to vector<16x280xbf16>
    %c0_231 = arith.constant 0 : index
    %c63 = arith.constant 63 : index
    %229 = vector.load %arg18[%c0_231, %c63] : memref<32x678xbf16, #tpu.memory_space<vmem>>, vector<16x280xbf16>
    tpu.vector_store %arg18[%c0_231, %c63], %228 {strides = array<i32>} : memref<32x678xbf16, #tpu.memory_space<vmem>>, vector<16x280xbf16>,
    %c0_232 = arith.constant 0 : index
    %c0_233 = arith.constant 0 : index
    %230 = vector.load %arg18[%c0_232, %c0_233] : memref<32x678xbf16, #tpu.memory_space<vmem>>, vector<16x360xbf16>
    %c0_234 = arith.constant 0 : index
    %c0_235 = arith.constant 0 : index
    %231 = vector.load %arg20[%c0_234, %c0_235] : memref<288x624xbf16, #tpu.memory_space<vmem>>, vector<16x360xbf16>
    tpu.vector_store %arg20[%c0_234, %c0_235], %230 {strides = array<i32>} : memref<288x624xbf16, #tpu.memory_space<vmem>>, vector<16x360xbf16>,
    %c0_236 = arith.constant 0 : index
    %c1_237 = arith.constant 1 : index
    %232 = vector.load %arg18[%c0_236, %c1_237] : memref<32x678xbf16, #tpu.memory_space<vmem>>, vector<16x360xbf16>
    %c16_238 = arith.constant 16 : index
    %c0_239 = arith.constant 0 : index
    %233 = vector.load %arg20[%c16_238, %c0_239] : memref<288x624xbf16, #tpu.memory_space<vmem>>, vector<16x360xbf16>
    tpu.vector_store %arg20[%c16_238, %c0_239], %232 {strides = array<i32>} : memref<288x624xbf16, #tpu.memory_space<vmem>>, vector<16x360xbf16>,
    %c0_240 = arith.constant 0 : index
    %c2_241 = arith.constant 2 : index
    %234 = vector.load %arg18[%c0_240, %c2_241] : memref<32x678xbf16, #tpu.memory_space<vmem>>, vector<16x360xbf16>
    %c32_242 = arith.constant 32 : index
    %c0_243 = arith.constant 0 : index
    %235 = vector.load %arg20[%c32_242, %c0_243] : memref<288x624xbf16, #tpu.memory_space<vmem>>, vector<16x360xbf16>
    tpu.vector_store %arg20[%c32_242, %c0_243], %234 {strides = array<i32>} : memref<288x624xbf16, #tpu.memory_space<vmem>>, vector<16x360xbf16>,
    %c0_244 = arith.constant 0 : index
    %c20_245 = arith.constant 20 : index
    %236 = vector.load %arg18[%c0_244, %c20_245] : memref<32x678xbf16, #tpu.memory_space<vmem>>, vector<16x360xbf16>
    %c48_246 = arith.constant 48 : index
    %c0_247 = arith.constant 0 : index
    %237 = vector.load %arg20[%c48_246, %c0_247] : memref<288x624xbf16, #tpu.memory_space<vmem>>, vector<16x360xbf16>
    tpu.vector_store %arg20[%c48_246, %c0_247], %236 {strides = array<i32>} : memref<288x624xbf16, #tpu.memory_space<vmem>>, vector<16x360xbf16>,
    %c0_248 = arith.constant 0 : index
    %c21_249 = arith.constant 21 : index
    %238 = vector.load %arg18[%c0_248, %c21_249] : memref<32x678xbf16, #tpu.memory_space<vmem>>, vector<16x360xbf16>
    %c64_250 = arith.constant 64 : index
    %c0_251 = arith.constant 0 : index
    %239 = vector.load %arg20[%c64_250, %c0_251] : memref<288x624xbf16, #tpu.memory_space<vmem>>, vector<16x360xbf16>
    tpu.vector_store %arg20[%c64_250, %c0_251], %238 {strides = array<i32>} : memref<288x624xbf16, #tpu.memory_space<vmem>>, vector<16x360xbf16>,
    %c0_252 = arith.constant 0 : index
    %c22_253 = arith.constant 22 : index
    %240 = vector.load %arg18[%c0_252, %c22_253] : memref<32x678xbf16, #tpu.memory_space<vmem>>, vector<16x360xbf16>
    %c80_254 = arith.constant 80 : index
    %c0_255 = arith.constant 0 : index
    %241 = vector.load %arg20[%c80_254, %c0_255] : memref<288x624xbf16, #tpu.memory_space<vmem>>, vector<16x360xbf16>
    tpu.vector_store %arg20[%c80_254, %c0_255], %240 {strides = array<i32>} : memref<288x624xbf16, #tpu.memory_space<vmem>>, vector<16x360xbf16>,
    %c0_256 = arith.constant 0 : index
    %c40_257 = arith.constant 40 : index
    %242 = vector.load %arg18[%c0_256, %c40_257] : memref<32x678xbf16, #tpu.memory_space<vmem>>, vector<16x360xbf16>
    %c96_258 = arith.constant 96 : index
    %c0_259 = arith.constant 0 : index
    %243 = vector.load %arg20[%c96_258, %c0_259] : memref<288x624xbf16, #tpu.memory_space<vmem>>, vector<16x360xbf16>
    tpu.vector_store %arg20[%c96_258, %c0_259], %242 {strides = array<i32>} : memref<288x624xbf16, #tpu.memory_space<vmem>>, vector<16x360xbf16>,
    %c0_260 = arith.constant 0 : index
    %c41_261 = arith.constant 41 : index
    %244 = vector.load %arg18[%c0_260, %c41_261] : memref<32x678xbf16, #tpu.memory_space<vmem>>, vector<16x360xbf16>
    %c112_262 = arith.constant 112 : index
    %c0_263 = arith.constant 0 : index
    %245 = vector.load %arg20[%c112_262, %c0_263] : memref<288x624xbf16, #tpu.memory_space<vmem>>, vector<16x360xbf16>
    tpu.vector_store %arg20[%c112_262, %c0_263], %244 {strides = array<i32>} : memref<288x624xbf16, #tpu.memory_space<vmem>>, vector<16x360xbf16>,
    %c0_264 = arith.constant 0 : index
    %c42_265 = arith.constant 42 : index
    %246 = vector.load %arg18[%c0_264, %c42_265] : memref<32x678xbf16, #tpu.memory_space<vmem>>, vector<16x360xbf16>
    %c128_266 = arith.constant 128 : index
    %c0_267 = arith.constant 0 : index
    %247 = vector.load %arg20[%c128_266, %c0_267] : memref<288x624xbf16, #tpu.memory_space<vmem>>, vector<16x360xbf16>
    tpu.vector_store %arg20[%c128_266, %c0_267], %246 {strides = array<i32>} : memref<288x624xbf16, #tpu.memory_space<vmem>>, vector<16x360xbf16>,
    %c0_268 = arith.constant 0 : index
    %c0_269 = arith.constant 0 : index
    %248 = vector.load %arg7[%c0_268, %c0_269] : memref<16x144xbf16, #tpu.memory_space<vmem>>, vector<16x144xbf16>
    %c0_270 = arith.constant 0 : index
    %c0_271 = arith.constant 0 : index
    %249 = vector.load %arg20[%c0_270, %c0_271] : memref<288x624xbf16, #tpu.memory_space<vmem>>, vector<144x360xbf16>
    %cst_272 = arith.constant dense<0.000000e+00> : vector<16x360xf32>
    %250 = tpu.matmul %248, %249, %cst_272 {dimension_numbers = #tpu.dot_dimension_numbers<[1], [0], [0], [1], [0, 0, 1, 1], [], []>} : vector<16x144xbf16>, vector<144x360xbf16>, vector<16x360xf32> -> vector<16x360xf32>
    %c0_273 = arith.constant 0 : index
    %c0_274 = arith.constant 0 : index
    %251 = vector.load %arg13[%c0_273, %c0_274] : memref<16x1xf32, #tpu.memory_space<vmem>>, vector<16x1xf32>
    %252 = vector.broadcast %251 : vector<16x1xf32> to vector<16x360xf32>
    %253 = arith.addf %250, %252 : vector<16x360xf32>
    %cst_275 = arith.constant 0.000000e+00 : f32
    %254 = vector.broadcast %cst_275 : f32 to vector<16x360xf32>
    %255 = arith.maximumf %253, %254 : vector<16x360xf32>
    %c0_276 = arith.constant 0 : index
    %c0_277 = arith.constant 0 : index
    %c0_278 = arith.constant 0 : index
    %256 = vector.load %arg16[%c0_276, %c0_277, %c0_278] : memref<1x4x16xf32, #tpu.memory_space<vmem>>, vector<1x4x16xf32>
    %257 = vector.shape_cast %256 : vector<1x4x16xf32> to vector<4x16xf32>
    %cst_279 = arith.constant dense<0.000000e+00> : vector<4x360xf32>
    %258 = tpu.matmul %257, %255, %cst_279 {dimension_numbers = #tpu.dot_dimension_numbers<[1], [0], [0], [1], [0, 0, 1, 1], [], []>} : vector<4x16xf32>, vector<16x360xf32>, vector<4x360xf32> -> vector<4x360xf32>
    %259 = tpu.iota {dimensions = array<i32: 1>} : vector<1x360xi32>
    %c20_i32_280 = arith.constant 20 : i32
    %c0_i32_281 = arith.constant 0 : i32
    %260 = arith.cmpi eq, %c20_i32_280, %c0_i32_281 : i32
    %c1_i32_282 = arith.constant 1 : i32
    %261 = arith.select %260, %c1_i32_282, %c20_i32_280 : i32
    %262 = vector.broadcast %261 : i32 to vector<1x360xi32>
    %263 = arith.remsi %259, %262 : vector<1x360xi32>
    %c0_i32_283 = arith.constant 0 : i32
    %264 = vector.broadcast %c0_i32_283 : i32 to vector<1x360xi32>
    %265 = arith.cmpi ne, %263, %264 : vector<1x360xi32>
    %c0_i32_284 = arith.constant 0 : i32
    %266 = vector.broadcast %c0_i32_284 : i32 to vector<1x360xi32>
    %267 = arith.cmpi slt, %263, %266 : vector<1x360xi32>
    %c0_i32_285 = arith.constant 0 : i32
    %268 = arith.cmpi slt, %261, %c0_i32_285 : i32
    %269 = vector.broadcast %268 : i1 to vector<1x360xi1>
    %270 = vector.broadcast %269 : vector<1x360xi1> to vector<1x360xi1>
    %271 = arith.xori %267, %270 : vector<1x360xi1>
    %272 = arith.andi %271, %265 : vector<1x360xi1>
    %273 = vector.broadcast %261 : i32 to vector<1x360xi32>
    %274 = arith.addi %263, %273 : vector<1x360xi32>
    %275 = arith.select %272, %274, %263 : vector<1x360xi1>, vector<1x360xi32>
    %c18_i32 = arith.constant 18 : i32
    %276 = vector.broadcast %c18_i32 : i32 to vector<1x360xi32>
    %277 = arith.cmpi slt, %275, %276 : vector<1x360xi32>
    %278 = arith.extui %277 : vector<1x360xi1> to vector<1x360xi32>
    %279 = arith.sitofp %278 : vector<1x360xi32> to vector<1x360xf32>
    %280 = vector.broadcast %279 : vector<1x360xf32> to vector<4x360xf32>
    %281 = arith.mulf %258, %280 : vector<4x360xf32>
    %cst_286 = arith.constant dense<0.000000e+00> : vector<4xf32>
    %282 = vector.multi_reduction <add>, %281, %cst_286 [1] : vector<4x360xf32> to vector<4xf32>
    %283 = vector.shape_cast %282 : vector<4xf32> to vector<4x1xf32>
    %cst_287 = arith.constant 0.00308641978 : f32
    %284 = vector.broadcast %cst_287 : f32 to vector<4x1xf32>
    %285 = arith.mulf %283, %284 : vector<4x1xf32>
    %cst_288 = arith.constant dense<0xFF800000> : vector<1xf32>
    %286 = vector.multi_reduction <maximumf>, %285, %cst_288 [0] : vector<4x1xf32> to vector<1xf32>
    %287 = vector.shape_cast %286 : vector<1xf32> to vector<1x1xf32>
    %288 = vector.broadcast %287 : vector<1x1xf32> to vector<4x1xf32>
    %289 = arith.subf %285, %288 : vector<4x1xf32>
    %290 = math.exp %289 : vector<4x1xf32>
    %cst_289 = arith.constant dense<0.000000e+00> : vector<1xf32>
    %291 = vector.multi_reduction <add>, %290, %cst_289 [0] : vector<4x1xf32> to vector<1xf32>
    %292 = vector.shape_cast %291 : vector<1xf32> to vector<1x1xf32>
    %293 = tpu.reciprocal %292 {approx = true} : vector<1x1xf32> -> vector<1x1xf32>
    %294 = vector.broadcast %293 : vector<1x1xf32> to vector<4x1xf32>
    %295 = arith.mulf %290, %294 : vector<4x1xf32>
    %296 = vector.broadcast %295 : vector<4x1xf32> to vector<4x16xf32>
    %297 = arith.mulf %257, %296 : vector<4x16xf32>
    %cst_290 = arith.constant dense<0.000000e+00> : vector<16xf32>
    %298 = vector.multi_reduction <add>, %297, %cst_290 [0] : vector<4x16xf32> to vector<16xf32>
    %299 = vector.shape_cast %298 : vector<16xf32> to vector<1x16xf32>
    %c0_291 = arith.constant 0 : index
    %c0_292 = arith.constant 0 : index
    %c0_293 = arith.constant 0 : index
    %300 = vector.load %arg17[%c0_291, %c0_292, %c0_293] : memref<1x1x16xf32, #tpu.memory_space<vmem>>, vector<1x1x16xf32>
    %301 = vector.shape_cast %300 : vector<1x1x16xf32> to vector<1x16xf32>
    %302 = vector.shape_cast %299 : vector<1x16xf32> to vector<1x1x16xf32>
    tpu.vector_store %arg17[%c0_291, %c0_292, %c0_293], %302 {strides = array<i32>} : memref<1x1x16xf32, #tpu.memory_space<vmem>>, vector<1x1x16xf32>,
    return
  }
  func.func @transform_0(%arg0: i32) -> (i32, i32, i32) {
    %c0_i32 = arith.constant 0 : i32
    %c0_i32_0 = arith.constant 0 : i32
    %c0_i32_1 = arith.constant 0 : i32
    return %arg0, %c0_i32, %c0_i32_0 : i32, i32, i32
  }
  func.func @transform_1(%arg0: i32) -> (i32, i32) {
    %c0_i32 = arith.constant 0 : i32
    %c0_i32_0 = arith.constant 0 : i32
    %c0_i32_1 = arith.constant 0 : i32
    return %c0_i32, %c0_i32_0 : i32, i32
  }
  func.func @transform_2(%arg0: i32) -> (i32, i32) {
    %c0_i32 = arith.constant 0 : i32
    %c0_i32_0 = arith.constant 0 : i32
    %c0_i32_1 = arith.constant 0 : i32
    return %c0_i32, %c0_i32_0 : i32, i32
  }
  func.func @transform_3(%arg0: i32) -> (i32, i32) {
    %c0_i32 = arith.constant 0 : i32
    %c0_i32_0 = arith.constant 0 : i32
    %c0_i32_1 = arith.constant 0 : i32
    return %c0_i32, %c0_i32_0 : i32, i32
  }
  func.func @transform_4(%arg0: i32) -> (i32, i32) {
    %c0_i32 = arith.constant 0 : i32
    %c0_i32_0 = arith.constant 0 : i32
    %c0_i32_1 = arith.constant 0 : i32
    return %c0_i32, %c0_i32_0 : i32, i32
  }
  func.func @transform_5(%arg0: i32) -> (i32, i32) {
    %c0_i32 = arith.constant 0 : i32
    %c0_i32_0 = arith.constant 0 : i32
    %c0_i32_1 = arith.constant 0 : i32
    return %c0_i32, %c0_i32_0 : i32, i32
  }
  func.func @transform_6(%arg0: i32) -> (i32, i32) {
    %c0_i32 = arith.constant 0 : i32
    %c0_i32_0 = arith.constant 0 : i32
    %c0_i32_1 = arith.constant 0 : i32
    return %c0_i32, %c0_i32_0 : i32, i32
  }
  func.func @transform_7(%arg0: i32) -> (i32, i32) {
    %c0_i32 = arith.constant 0 : i32
    %c0_i32_0 = arith.constant 0 : i32
    %c0_i32_1 = arith.constant 0 : i32
    return %c0_i32, %c0_i32_0 : i32, i32
  }
  func.func @transform_8(%arg0: i32) -> (i32, i32) {
    %c0_i32 = arith.constant 0 : i32
    %c0_i32_0 = arith.constant 0 : i32
    %c0_i32_1 = arith.constant 0 : i32
    return %c0_i32, %c0_i32_0 : i32, i32
  }
  func.func @transform_9(%arg0: i32) -> (i32, i32) {
    %c0_i32 = arith.constant 0 : i32
    %c0_i32_0 = arith.constant 0 : i32
    %c0_i32_1 = arith.constant 0 : i32
    return %c0_i32, %c0_i32_0 : i32, i32
  }
  func.func @transform_10(%arg0: i32) -> (i32, i32) {
    %c0_i32 = arith.constant 0 : i32
    %c0_i32_0 = arith.constant 0 : i32
    %c0_i32_1 = arith.constant 0 : i32
    return %c0_i32, %c0_i32_0 : i32, i32
  }
  func.func @transform_11(%arg0: i32) -> (i32, i32) {
    %c0_i32 = arith.constant 0 : i32
    %c0_i32_0 = arith.constant 0 : i32
    %c0_i32_1 = arith.constant 0 : i32
    return %c0_i32, %c0_i32_0 : i32, i32
  }
  func.func @transform_12(%arg0: i32) -> (i32, i32) {
    %c0_i32 = arith.constant 0 : i32
    %c0_i32_0 = arith.constant 0 : i32
    %c0_i32_1 = arith.constant 0 : i32
    return %c0_i32, %c0_i32_0 : i32, i32
  }
  func.func @transform_13(%arg0: i32) -> (i32, i32) {
    %c0_i32 = arith.constant 0 : i32
    %c0_i32_0 = arith.constant 0 : i32
    %c0_i32_1 = arith.constant 0 : i32
    return %c0_i32, %c0_i32_0 : i32, i32
  }
  func.func @transform_14(%arg0: i32) -> (i32, i32) {
    %c0_i32 = arith.constant 0 : i32
    %c0_i32_0 = arith.constant 0 : i32
    %c0_i32_1 = arith.constant 0 : i32
    return %c0_i32, %c0_i32_0 : i32, i32
  }
  func.func @transform_15(%arg0: i32) -> (i32, i32, i32) {
    %c0_i32 = arith.constant 0 : i32
    %c0_i32_0 = arith.constant 0 : i32
    %c0_i32_1 = arith.constant 0 : i32
    return %arg0, %c0_i32, %c0_i32_0 : i32, i32, i32
  }
  func.func @transform_16(%arg0: i32) -> (i32, i32, i32) {
    %c0_i32 = arith.constant 0 : i32
    %c0_i32_0 = arith.constant 0 : i32
    %c0_i32_1 = arith.constant 0 : i32
    return %arg0, %c0_i32, %c0_i32_0 : i32, i32, i32
  }
}

</mosaic_0001>

<bundles_post_ra>
// kernel: projection_forward.1
= control target key start
LH: loop header
LB: loop body
LE: loop exit
PB: predicated region body
PF: predicated region fallthrough
CT: control target
= control target key end

     0   :  { %s10193_s0 = inlined_call_operand.vmem [shape: bf16[2,16,598], index: 0, kind: input, shape index: {}]   ;;  %s10194_s1 = inlined_call_operand.vmem [shape: bf16[32,144], index: 1, kind: input, shape index: {}]   ;;  %s10195_s2 = inlined_call_operand.vmem [shape: bf16[32,288], index: 2, kind: input, shape index: {}]   ;;  %s10196_s3 = inlined_call_operand.vmem [shape: bf16[16,288], index: 3, kind: input, shape index: {}]   ;;  %s10197_s4 = inlined_call_operand.vmem [shape: bf16[16,144], index: 4, kind: input, shape index: {}]   ;;  %s10198_s5 = inlined_call_operand.vmem [shape: bf16[16,144], index: 5, kind: input, shape index: {}]   ;;  %s10199_s6 = inlined_call_operand.vmem [shape: bf16[16,144], index: 6, kind: input, shape index: {}]   ;;  %s10200_s7 = inlined_call_operand.vmem [shape: f32[32,1], index: 7, kind: input, shape index: {}]   ;;  %s10201_s8 = inlined_call_operand.vmem [shape: f32[32,1], index: 8, kind: input, shape index: {}]   ;;  %s10202_s9 = inlined_call_operand.vmem [shape: f32[16,1], index: 9, kind: input, shape index: {}]   ;;  %s10203_s10 = inlined_call_operand.vmem [shape: f32[16,1], index: 10, kind: input, shape index: {}]   ;;  %s10204_s11 = inlined_call_operand.vmem [shape: f32[16,1], index: 11, kind: input, shape index: {}]   ;;  %s10205_s12 = inlined_call_operand.vmem [shape: f32[16,1], index: 12, kind: input, shape index: {}]   ;;  %s10206_s13 = inlined_call_operand.vmem [shape: bf16[624,418], index: 13, kind: input, shape index: {}]   ;;  %s10207_s14 = inlined_call_operand.vmem [shape: bf16[440,340], index: 14, kind: input, shape index: {}]   ;;  %s10208_s15 = inlined_call_operand.vmem [shape: f32[2,4,16], index: 15, kind: input, shape index: {}]   ;;  %s10209_s16 = inlined_call_operand.hbm [shape: f32[2,1,16], index: 16, kind: output, shape index: {}]  }
   0x1   :  { %10238 = sst [smem:[#allocation12_spill]] %s10193_s0 }
   0x2   :  { %10239 = sst [smem:[#allocation13_spill]] %s10194_s1 }
   0x3   :  { %10240 = sst [smem:[#allocation14_spill]] %s10195_s2 }
   0x4   :  { %10241 = sst [smem:[#allocation15_spill]] %s10200_s7 }
   0x5   :  { %21 = vsyncpa [#allocation6], 0 }
   0x6   :  { %23 = vsyncpa [#allocation6 + $0x1], 0  ;;  %s7943_s21 = smov 0   ;;  %s7945_s22 = smov 0  }
   0x7   :  { %s7947_s23 = smov 0   ;;  %s7949_s24 = smov 0  }
   0x8 LB: > { %10242 = sst [smem:[#allocation8_spill]] %s7825_s23  ;;  %s7964_s25 = sadd.s32 4294967295, %s7829_s24   ;;  %s7829_s24 = sphi %s7949_s24, %s10314_s24   ;;  %s7825_s23 = sphi %s7947_s23, %s10316_s23   ;;  %s7821_s22 = sphi %s7945_s22, %s10318_s22   ;;  %s7817_s21 = sphi %s7943_s21, %s10317_s21  }
   0x9   : > { %s6738_s26 = sadd.s32 4294967294, %s7829_s24   ;;  %s7968_s27 = sadd.s32 1, %s7829_s24  }
   0xa   : > { %10243 = sst [smem:[#allocation9_spill]] %s7968_s27  ;;  %s382_s28 = sadd.s32 1, %s7825_s23 }
   0xb   : > { %s379_s29 = ssub.s32 %s7829_s24, %s7968_s27  ;;  %p392_p0 = scmp.ne.s32.totalorder %s7825_s23, %s7821_s22 }
   0xc   : > { %p380_p1 = scmp.eq.s32.totalorder %s379_s29, 0  ;;  %p393_p2 = scmp.eq.s32.totalorder %s7964_s25, 1 }
   0xd   : > { %p398_p3 = scmp.ne.s32.totalorder %s7821_s22, %s7817_s21  ;;  %p399_p4 = scmp.eq.s32.totalorder %s6738_s26, 1 }
   0xe   : > { %s7979_s30 = scalar_select %p380_p1, %s7825_s23, %s382_s28  }
   0xf   : > { %p7981_p5 = por %p393_p2, %p392_p0  ;;  %p7985_p6 = por %p399_p4, %p398_p3 }
  0x10   : > { %10244 = sst [smem:[#allocation10_spill]] %s7979_s30  ;;  %p6741_p7 = scmp.ge.s32.totalorder %s7829_s24, 1 }
  0x11   : > { %s10246_s17 = scalar_select %p7985_p6, 1, 0 }
  0x12   : > { %p474_p8 = scmp.lt.s32.totalorder %s7829_s24, 3 }
  0x13   : > { %10247 = sst [smem:[#allocation11_spill]] %s10246_s17 }
  0x14   : > { %p475_p9 = pnand %p6741_p7, %p474_p8 }
  0x15   : > { %p527_p10 = scmp.lt.s32.totalorder (!%p475_p9), %s7964_s25, 1  ;;  %s10248_s28 = sld [smem:[#allocation12_spill]] (!%p475_p9)  ;;  %vm573_vm0 = vcmask (!%p475_p9), 64512   ;;  %vm10228_vm1 = vcmask (!%p475_p9), 130048   ;;  %v7838_v13 = vmov (!%p475_p9), 0   ;;  %vm612_vm2 = vcmask (!%p475_p9), 1039360  }
  0x16   : > { %478 = sbr.rel (%p475_p9) target bundleno = 3902 (0xf3e), region = 84  ;;  %s10222_s30 = smov (!%p475_p9), 127   ;;  %1385 = vst [vmem:[#allocation2] sm:$0xff] (!%p475_p9), %v7838_v13  ;;  %1389 = vst [vmem:[#allocation2 + $0x20] sm:$0xff] (!%p475_p9), %v7838_v13  ;;  %7371 = vset.pattern.permute.xlu1 (!%p475_p9), %v7838_v13  ;;  %7370 = vset.pattern.permute.xlu0 (!%p475_p9), %v7838_v13  ;;  %vm664_vm3 = vcmask (!%p475_p9), 1031168   ;;  %vm716_vm4 = vcmask (!%p475_p9), 834560  }
  0x17   : > { %s10210_s20 = smov (!%p475_p9), 102   ;;  %s10214_s26 = smov (!%p475_p9), 101   ;;  %1392 = vst [vmem:[#allocation2 + $0x30] sm:$0xff] (!%p475_p9), %v7838_v13  ;;  %1396 = vst [vmem:[#allocation2 + $0x50] sm:$0xff] (!%p475_p9), %v7838_v13  ;;  %vm768_vm5 = vcmask (!%p475_p9), 826368   ;;  %vm820_vm6 = vcmask (!%p475_p9), 818176  }
  0x18   : > { %s10249_s1 = sld [smem:[#allocation13_spill]] (!%p475_p9)  ;;  %6110 = vst [vmem:[#allocation2 + $0x40] sm:$0xff] (!%p475_p9), %v7838_v13  ;;  %4567 = vst [vmem:[#allocation2 + $0x18] sm:$0xff] (!%p475_p9), %v7838_v13  ;;  %s10250_s7 = sld [smem:[#allocation15_spill]] (!%p475_p9)  ;;  %vm872_vm7 = vcmask (!%p475_p9), 621568   ;;  %vm10230_vm8 = vcmask (!%p475_p9), 613376  }
  0x19   : > { %6104 = vst [vmem:[#allocation2 + $0x10] sm:$0xff] (!%p475_p9), %v7838_v13  ;;  %vm10229_vm9 = vcmask (!%p475_p9), 605184   ;;  %s10260_s23 = smov (!%p475_p9), 126   ;;  %s10261_s27 = smov (!%p475_p9), 102  }
  0x1a   : > { %s10263_s17 = smov (!%p475_p9), 100   ;;  %s10266_s2 = sld [smem:[#allocation14_spill]] (!%p475_p9) }
  0x1d   : > { %s7993_s18 = scalar_select %p527_p10, %s7964_s25, 1 }
  0x1e   : > { %v8086_v11 = vld [vmem:[%s10249_s1 + $0x4] ss:$8 sps:$4 sm:$0xff]   ;;  %v1043_v17 = vld [vmem:[%s10250_s7 + $0x18] sm:$0xff]  ;;  %v1042_v18 = vld [vmem:[%s10250_s7 + $0x10] sm:$0xff] }
  0x1f   : > { %s7282_s19 = smul.u32 40, %s7993_s18  ;;  %6793 = vmatprep.mubr.msk.bf16.mxu0 %vm10228_vm1, %v8086_v11  ;;  %6795 = vmatprep.mubr.msk.bf16.mxu1 %vm10228_vm1, %v8086_v11  ;;  %v1040_v15 = vld [vmem:[%s10250_s7] sm:$0xff]  ;;  %v1041_v16 = vld [vmem:[%s10250_s7 + $0x8] sm:$0xff]  ;;  %s7852_s7 = smov 88  }
  0x21   : > { %s7999_s29 = scalar_lea.vmem %s10248_s28, %s7282_s19  ;;  %s10216_s19 = smov 126  }
  0x22   : > { %v8002_v0 = vld [vmem:[%s7999_s29 + $0x4] ss:$20 sps:$4 sm:$0xff]   ;;  %v8005_v1 = vld [vmem:[%s7999_s29] ss:$20 sps:$4 sm:$0xff]   ;;  %v8010_v2 = vld [vmem:[%s7999_s29 + $0x8] ss:$20 sps:$4 sm:$0xff]  }
  0x23   : > { %604 = vrot.lane.b32.xlu0 %v8002_v0, %s10222_s30  ;;  %v8013_v3 = vld [vmem:[%s7999_s29 + $0xc] ss:$20 sps:$4 sm:$0xff]   ;;  %1089 = vmatprep.subr.bf16.mxu0 %v8002_v0  ;;  %v7378_v4 = vld [vmem:[%s7999_s29 + $0x10] ss:$20 sps:$4 sm:$0xff]   ;;  %s10212_s28 = smov 100  }
  0x24   : > { %602 = vrot.lane.b32.xlu1 %v8005_v1, %s10222_s30  ;;  %1090 = vmatpush1.bf16.msra.mxu0 %v8005_v1  ;;  %v7379_v5 = vld [vmem:[%s7999_s29 + $0x10] ss:$20 sps:$4 sm:$0xff]  }
  0x25   : > { %1142 = vmatprep.subr.bf16.mxu1 %v8013_v3  ;;  %v7380_v6 = vld [vmem:[%s7999_s29 + $0x10] ss:$20 sps:$4 sm:$0xff]  }
  0x26   : > { %1143 = vmatpush1.bf16.msra.mxu1 %v8010_v2  ;;  %v7381_v7 = vld [vmem:[%s7999_s29 + $0x10] ss:$20 sps:$4 sm:$0xff]  }
  0x27   : > { %606 = vrot.lane.b32.xlu0 %v8010_v2, %s10222_s30  ;;  %v7382_v8 = vld [vmem:[%s7999_s29 + $0x10] ss:$20 sps:$4 sm:$0xff]  }
  0x28   : > { %608 = vrot.lane.b32.xlu1 %v8013_v3, %s10222_s30  ;;  %v7383_v9 = vld [vmem:[%s7999_s29 + $0x10] ss:$20 sps:$4 sm:$0xff]  }
  0x29   : > { %v7389_v10 = vld [vmem:[%s7999_s29 + $0x10] ss:$20 sps:$4 sm:$0xff]  }
  0x2a   : > { %574 = vst.msk [vmem:[#allocation4 + $0x20] sm:$0xff] %vm573_vm0, %v7389_v10  ;;  %v7384_v12 = vld [vmem:[%s7999_s29 + $0x10] ss:$20 sps:$4 sm:$0xff]  }
  0x2b   : > { %610 = vrot.lane.b32.xlu0 %v7378_v4, %s10222_s30  ;;  %v7385_v14 = vld [vmem:[%s7999_s29 + $0x10] ss:$20 sps:$4 sm:$0xff]   ;;  %s10259_s29 = smov 127   ;;  %s10262_s30 = smov 101  }
  0x2c   : > { %656 = vrot.lane.b32.xlu1 %v8002_v0, %s10216_s19 }
  0x2f   : > { %658 = vrot.lane.b32.xlu0 %v8010_v2, %s10216_s19 }
  0x30   : > { %654 = vrot.lane.b32.xlu1 %v8005_v1, %s10216_s19 }
  0x33   : > { %660 = vrot.lane.b32.xlu0 %v8013_v3, %s10216_s19 }
  0x34   : > { %662 = vrot.lane.b32.xlu1 %v7379_v5, %s10216_s19  ;;  %s7839_s19 = smov 74  }
  0x37   : > { %708 = vrot.lane.b32.xlu0 %v8002_v0, %s10210_s20 }
  0x38   : > { %710 = vrot.lane.b32.xlu1 %v8010_v2, %s10210_s20 }
  0x3b   : > { %706 = vrot.lane.b32.xlu0 %v8005_v1, %s10210_s20 }
  0x3c   : > { %712 = vrot.lane.b32.xlu1 %v8013_v3, %s10210_s20 }
  0x3f   : > { %714 = vrot.lane.b32.xlu0 %v7380_v6, %s10210_s20  ;;  %s10218_s20 = smov 76  }
  0x40   : > { %760 = vrot.lane.b32.xlu1 %v8002_v0, %s10214_s26 }
  0x43   : > { %762 = vrot.lane.b32.xlu0 %v8010_v2, %s10214_s26 }
  0x44   : > { %758 = vrot.lane.b32.xlu1 %v8005_v1, %s10214_s26 }
  0x47   : > { %764 = vrot.lane.b32.xlu0 %v8013_v3, %s10214_s26 }
  0x48   : > { %766 = vrot.lane.b32.xlu1 %v7381_v7, %s10214_s26  ;;  %s7841_s26 = smov 81  }
  0x4b   : > { %812 = vrot.lane.b32.xlu0 %v8002_v0, %s10212_s28 }
  0x4c   : > { %814 = vrot.lane.b32.xlu1 %v8010_v2, %s10212_s28 }
  0x4f   : > { %810 = vrot.lane.b32.xlu0 %v8005_v1, %s10212_s28 }
  0x50   : > { %816 = vrot.lane.b32.xlu1 %v8013_v3, %s10212_s28 }
  0x53   : > { %818 = vrot.lane.b32.xlu0 %v7382_v8, %s10212_s28  ;;  %s10220_s28 = smov 75  }
  0x54   : > { %864 = vrot.lane.b32.xlu1 %v8002_v0, %s10218_s20 }
  0x57   : > { %866 = vrot.lane.b32.xlu0 %v8010_v2, %s10218_s20 }
  0x58   : > { %862 = vrot.lane.b32.xlu1 %v8005_v1, %s10218_s20 }
  0x5b   : > { %868 = vrot.lane.b32.xlu0 %v8013_v3, %s10218_s20 }
  0x5c   : > { %870 = vrot.lane.b32.xlu1 %v7383_v9, %s10218_s20  ;;  %s10264_s20 = smov 76  }
  0x5f   : > { %916 = vrot.lane.b32.xlu0 %v8002_v0, %s10220_s28 }
  0x60   : > { %918 = vrot.lane.b32.xlu1 %v8010_v2, %s10220_s28 }
  0x63   : > { %914 = vrot.lane.b32.xlu0 %v8005_v1, %s10220_s28 }
  0x64   : > { %920 = vrot.lane.b32.xlu1 %v8013_v3, %s10220_s28 }
  0x67   : > { %922 = vrot.lane.b32.xlu0 %v7384_v12, %s10220_s28  ;;  %s10265_s28 = smov 75  }
  0x68   : > { %968 = vrot.lane.b32.xlu1 %v8002_v0, %s7839_s19 }
  0x6b   : > { %970 = vrot.lane.b32.xlu0 %v8010_v2, %s7839_s19 }
  0x6c   : > { %966 = vrot.lane.b32.xlu1 %v8005_v1, %s7839_s19 }
  0x6f   : > { %972 = vrot.lane.b32.xlu0 %v8013_v3, %s7839_s19 }
  0x70   : > { %974 = vrot.lane.b32.xlu1 %v7385_v14, %s7839_s19 }
  0x73   : > { %1046 = vperm.xlu0 %7370, %v1040_v15  }
  0x74   : > { %1051 = vperm.xlu1 %7371, %v1041_v16  }
  0x77   : > { %1061 = vperm.xlu0 %7370, %v1043_v17  }
  0x78   : > { %1056 = vperm.xlu1 %7371, %v1042_v18  }
  0x95   : > { %v605_v19 = vpop.permute.xlu0 %604 }
  0x96   : > { %v603_v20 = vpop.permute.xlu1 %602 }
  0x97   : > { %v613_v24 = vsel %vm612_vm2, %v603_v20, %v605_v19 }
  0x99   : > { %v607_v21 = vpop.permute.xlu0 %606 }
  0x9a   : > { %v614_v22 = vsel %vm612_vm2, %v605_v19, %v607_v21  ;;  %v609_v23 = vpop.permute.xlu1 %608 }
  0x9b   : > { %1091 = vmatprep.subr.bf16.mxu0 %v614_v22  ;;  %v615_v28 = vsel %vm612_vm2, %v607_v21, %v609_v23 }
  0x9c   : > { %1092 = vmatpush1.bf16.msra.mxu0 %v613_v24 }
  0x9d   : > { %v611_v25 = vpop.permute.xlu0 %610 }
  0x9e   : > { %v616_v26 = vsel %vm612_vm2, %v609_v23, %v611_v25  ;;  %626 = vst.msk [vmem:[#allocation4 + $0x48] sm:$0xff] %vm573_vm0, %v611_v25  ;;  %v657_v27 = vpop.permute.xlu1 %656  ;;  %v7388_v25 = vld [vmem:[%s10249_s1] ss:$8 sps:$4 sm:$0xff]  }
  0x9f   : > { %1144 = vmatprep.subr.bf16.mxu1 %v616_v26 }
  0xa0   : > { %1145 = vmatpush1.bf16.msra.mxu1 %v615_v28 }
  0xa1   : > { %v659_v29 = vpop.permute.xlu0 %658 }
  0xa2   : > { %v666_v30 = vsel %vm664_vm3, %v657_v27, %v659_v29  ;;  %v655_v31 = vpop.permute.xlu1 %654 }
  0xa3   : > { %v665_v32 = vsel %vm664_vm3, %v655_v31, %v657_v27  ;;  %1093 = vmatprep.subr.bf16.mxu0 %v666_v30  ;;  %v999_v27 = vld [vmem:[#allocation4 + $0x20] sm:$0xff]  ;;  %v7390_v30 = vld [vmem:[%s10249_s1 + $0x14] ss:$8 sps:$4 sm:$0xff]  }
  0xa4   : > { %1094 = vmatpush1.bf16.msra.mxu0 %v665_v32 }
  0xa5   : > { %v661_v33 = vpop.permute.xlu0 %660  ;;  %v1004_v32 = vld [vmem:[#allocation4 + $0x48] sm:$0xff] }
  0xa6   : > { %v667_v34 = vsel %vm664_vm3, %v659_v29, %v661_v33  ;;  %v663_v35 = vpop.permute.xlu1 %662 }
  0xa7   : > { %v668_v36 = vsel %vm664_vm3, %v661_v33, %v663_v35  ;;  %678 = vst.msk [vmem:[#allocation4 + $0x70] sm:$0xff] %vm573_vm0, %v663_v35  ;;  %v7392_v33 = vld [vmem:[%s10249_s1 + $0x10] ss:$8 sps:$4 sm:$0xff]   ;;  %s7849_s1 = smov 69  }
  0xa8   : > { %1146 = vmatprep.subr.bf16.mxu1 %v668_v36 }
  0xa9   : > { %v709_v37 = vpop.permute.xlu0 %708  ;;  %1147 = vmatpush1.bf16.msra.mxu1 %v667_v34 }
  0xaa   : > { %v711_v38 = vpop.permute.xlu1 %710 }
  0xab   : > { %v718_v39 = vsel %vm716_vm4, %v709_v37, %v711_v38 }
  0xac   : > { %1095 = vmatprep.subr.bf16.mxu0 %v718_v39 }
  0xad   : > { %v707_v40 = vpop.permute.xlu0 %706 }
  0xae   : > { %v717_v41 = vsel %vm716_vm4, %v707_v40, %v709_v37  ;;  %v713_v42 = vpop.permute.xlu1 %712  ;;  %v1009_v34 = vld [vmem:[#allocation4 + $0x70] sm:$0xff]  ;;  %v1264_v40 = vlaneseq }
  0xaf   : > { %1096 = vmatpush1.bf16.msra.mxu0 %v717_v41  ;;  %v719_v46 = vsel %vm716_vm4, %v711_v38, %v713_v42 }
  0xb0   : > { %v8192_v41 = vand.u32 127, %v1264_v40 }
  0xb1   : > { %v715_v43 = vpop.permute.xlu0 %714 }
  0xb2   : > { %v720_v44 = vsel %vm716_vm4, %v713_v42, %v715_v43  ;;  %730 = vst.msk [vmem:[#allocation4 + $0x98] sm:$0xff] %vm573_vm0, %v715_v43  ;;  %v761_v45 = vpop.permute.xlu1 %760  ;;  %v8195_v42 = vadd.s32 128, %v8192_v41  ;;  %v8198_v43 = vadd.s32 256, %v8192_v41 }
  0xb3   : > { %1148 = vmatprep.subr.bf16.mxu1 %v720_v44 }
  0xb4   : > { %1149 = vmatpush1.bf16.msra.mxu1 %v719_v46 }
  0xb5   : > { %v763_v47 = vpop.permute.xlu0 %762 }
  0xb6   : > { %v770_v48 = vsel %vm768_vm5, %v761_v45, %v763_v47  ;;  %v759_v49 = vpop.permute.xlu1 %758 }
  0xb7   : > { %v769_v50 = vsel %vm768_vm5, %v759_v49, %v761_v45  ;;  %1097 = vmatprep.subr.bf16.mxu0 %v770_v48  ;;  %v8201_v44 = vmul.u32.u64.low 2643056798, %v8192_v41  ;;  %v8202_v45 = vmul.u32.u64.high 2643056798, %v8192_v41, %v8201_v44 }
  0xb8   : > { %1098 = vmatpush1.bf16.msra.mxu0 %v769_v50  ;;  %v8209_v48 = vmul.u32.u64.low 2643056798, %v8198_v43  ;;  %v8210_v49 = vmul.u32.u64.high 2643056798, %v8198_v43, %v8209_v48  ;;  %v1268_v50 = vadd.s32 384, %v8192_v41 }
  0xb9   : > { %v765_v51 = vpop.permute.xlu0 %764  ;;  %v1014_v35 = vld [vmem:[#allocation4 + $0x98] sm:$0xff] }
  0xba   : > { %v771_v52 = vsel %vm768_vm5, %v763_v47, %v765_v51  ;;  %v767_v53 = vpop.permute.xlu1 %766  ;;  %v8205_v46 = vmul.u32.u64.low 2643056798, %v8195_v42  ;;  %v8206_v47 = vmul.u32.u64.high 2643056798, %v8195_v42, %v8205_v46 }
  0xbb   : > { %v772_v54 = vsel %vm768_vm5, %v765_v51, %v767_v53  ;;  %782 = vst.msk [vmem:[#allocation4 + $0xc0] sm:$0xff] %vm573_vm0, %v767_v53  ;;  %v1276_v53 = vshrl.u32 %v8202_v45, 4 }
  0xbc   : > { %1150 = vmatprep.subr.bf16.mxu1 %v772_v54  ;;  %v1287_v54 = vshrl.u32 %v8206_v47, 4 }
  0xbd   : > { %v813_v55 = vpop.permute.xlu0 %812  ;;  %1151 = vmatpush1.bf16.msra.mxu1 %v771_v52  ;;  %v8213_v51 = vmul.u32.u64.low 2643056798, %v1268_v50  ;;  %v8214_v52 = vmul.u32.u64.high 2643056798, %v1268_v50, %v8213_v51 }
  0xbe   : > { %v815_v56 = vpop.permute.xlu1 %814 }
  0xbf   : > { %v822_v57 = vsel %vm820_vm6, %v813_v55, %v815_v56 }
  0xc0   : > { %1099 = vmatprep.subr.bf16.mxu0 %v822_v57  ;;  %v1288_v57 = vmul.u32 26, %v1287_v54 }
  0xc1   : > { %v811_v58 = vpop.permute.xlu0 %810 }
  0xc2   : > { %v821_v59 = vsel %vm820_vm6, %v811_v58, %v813_v55  ;;  %v817_v60 = vpop.permute.xlu1 %816  ;;  %v1019_v36 = vld [vmem:[#allocation4 + $0xc0] sm:$0xff]  ;;  %v1298_v55 = vshrl.u32 %v8210_v49, 4 }
  0xc3   : > { %1100 = vmatpush1.bf16.msra.mxu0 %v821_v59  ;;  %v823_v0 = vsel %vm820_vm6, %v815_v56, %v817_v60  ;;  %v1277_v56 = vmul.u32 26, %v1276_v53  ;;  %v1309_v59 = vshrl.u32 %v8214_v52, 4 }
  0xc4   : > { %v1299_v58 = vmul.u32 26, %v1298_v55 }
  0xc5   : > { %v819_v61 = vpop.permute.xlu0 %818 }
  0xc6   : > { %v824_v62 = vsel %vm820_vm6, %v817_v60, %v819_v61  ;;  %834 = vst.msk [vmem:[#allocation4 + $0xe8] sm:$0xff] %vm573_vm0, %v819_v61  ;;  %v865_v63 = vpop.permute.xlu1 %864  ;;  %v1278_v60 = vsub.s32 %v8192_v41, %v1277_v56  ;;  %v1289_v61 = vsub.s32 %v8195_v42, %v1288_v57 }
  0xc7   : > { %1152 = vmatprep.subr.bf16.mxu1 %v824_v62  ;;  %v1300_v62 = vsub.s32 %v8198_v43, %v1299_v58 }
  0xc8   : > { %1153 = vmatpush1.bf16.msra.mxu1 %v823_v0  ;;  %vm1325_vm10 = vcmp.ne.s32.totalorder %v1278_v60, 0  ;;  %vm1330_vm11 = vcmp.lt.s32.totalorder %v1278_v60, 0  ;;  %vm1326_vm12 = vcmp.ne.s32.totalorder %v1289_v61, 0  ;;  %vm1331_vm13 = vcmp.lt.s32.totalorder %v1289_v61, 0 }
  0xc9   : > { %v867_v1 = vpop.permute.xlu0 %866  ;;  %vm1327_vm14 = vcmp.ne.s32.totalorder %v1300_v62, 0  ;;  %vm1332_vm15 = vcmp.lt.s32.totalorder %v1300_v62, 0 }
  0xca   : > { %v874_v2 = vsel %vm872_vm7, %v865_v63, %v867_v1  ;;  %v863_v3 = vpop.permute.xlu1 %862 }
  0xcb   : > { %v873_v4 = vsel %vm872_vm7, %v863_v3, %v865_v63  ;;  %1101 = vmatprep.subr.bf16.mxu0 %v874_v2  ;;  %v1310_v63 = vmul.u32 26, %v1309_v59 }
  0xcc   : > { %1102 = vmatpush1.bf16.msra.mxu0 %v873_v4  ;;  %v1341_v4 = vadd.s32 26, %v1289_v61 }
  0xcd   : > { %v869_v5 = vpop.permute.xlu0 %868  ;;  %v1024_v37 = vld [vmem:[#allocation4 + $0xe8] sm:$0xff]  ;;  %v1311_v2 = vsub.s32 %v1268_v50, %v1310_v63 }
  0xce   : > { %v875_v6 = vsel %vm872_vm7, %v867_v1, %v869_v5  ;;  %v871_v7 = vpop.permute.xlu1 %870  ;;  %v1340_v1 = vadd.s32 26, %v1278_v60 }
  0xcf   : > { %v876_v8 = vsel %vm872_vm7, %v869_v5, %v871_v7  ;;  %886 = vst.msk [vmem:[#allocation4 + $0x110] sm:$0xff] %vm573_vm0, %v871_v7  ;;  %v1342_v5 = vadd.s32 26, %v1300_v62 }
  0xd0   : > { %1154 = vmatprep.subr.bf16.mxu1 %v876_v8 }
  0xd1   : > { %v917_v9 = vpop.permute.xlu0 %916  ;;  %1155 = vmatpush1.bf16.msra.mxu1 %v875_v6 }
  0xd2   : > { %v919_v10 = vpop.permute.xlu1 %918 }
  0xd3   : > { %v926_v12 = vsel %vm10230_vm8, %v917_v9, %v919_v10 }
  0xd4   : > { %1103 = vmatprep.subr.bf16.mxu0 %v926_v12 }
  0xd5   : > { %v915_v14 = vpop.permute.xlu0 %914 }
  0xd6   : > { %v925_v15 = vsel %vm10230_vm8, %v915_v14, %v917_v9  ;;  %v921_v16 = vpop.permute.xlu1 %920  ;;  %v1029_v38 = vld [vmem:[#allocation4 + $0x110] sm:$0xff]  ;;  %v1343_v14 = vadd.s32 26, %v1311_v2 }
  0xd7   : > { %1104 = vmatpush1.bf16.msra.mxu0 %v925_v15  ;;  %v927_v20 = vsel %vm10230_vm8, %v919_v10, %v921_v16 }
  0xd9   : > { %v923_v17 = vpop.permute.xlu0 %922 }
  0xda   : > { %v928_v18 = vsel %vm10230_vm8, %v921_v16, %v923_v17  ;;  %938 = vst.msk [vmem:[#allocation4 + $0x138] sm:$0xff] %vm573_vm0, %v923_v17  ;;  %v969_v19 = vpop.permute.xlu1 %968  ;;  %vm1328_vm8 = vcmp.ne.s32.totalorder %v1311_v2, 0 }
  0xdb   : > { %1156 = vmatprep.subr.bf16.mxu1 %v928_v18 }
  0xdc   : > { %1157 = vmatpush1.bf16.msra.mxu1 %v927_v20 }
  0xdd   : > { %v971_v21 = vpop.permute.xlu0 %970 }
  0xde   : > { %v978_v22 = vsel %vm10229_vm9, %v969_v19, %v971_v21  ;;  %v967_v23 = vpop.permute.xlu1 %966 }
  0xdf   : > { %v977_v24 = vsel %vm10229_vm9, %v967_v23, %v969_v19  ;;  %1105 = vmatprep.subr.bf16.mxu0 %v978_v22 }
  0xe0   : > { %1106 = vmatpush1.bf16.msra.mxu0 %v977_v24 }
  0xe1   : > { %v973_v26 = vpop.permute.xlu0 %972  ;;  %1195 = vmatprep.subr.bf16.mxu0 %v7838_v13 }
  0xe2   : > { %v979_v28 = vsel %vm10229_vm9, %v971_v21, %v973_v26  ;;  %v975_v29 = vpop.permute.xlu1 %974  ;;  %v8252_v21 = vadd.s32 512, %v8192_v41 }
  0xe3   : > { %v980_v31 = vsel %vm10229_vm9, %v973_v26, %v975_v29  ;;  %990 = vst.msk [vmem:[#allocation4 + $0x160] sm:$0xff] %vm573_vm0, %v975_v29  ;;  %1122 = vmatmul.mubr.bf16.vlgmr.msra.gmra.mrb[0].mxu0 %v7388_v25  ;;  %vm8223_vm0 = vmand %vm1330_vm11, %vm1325_vm10  ;;  %vm1333_vm10 = vcmp.lt.s32.totalorder %v1311_v2, 0 }
  0xe4   : > { %1158 = vmatprep.subr.bf16.mxu1 %v980_v31  ;;  %1196 = vmatpush1.bf16.msra.mxu0 %v999_v27  ;;  %vm8231_vm9 = vmand %vm1332_vm15, %vm1327_vm14  ;;  %v1345_v7 = vsel %vm8223_vm0, %v1340_v1, %v1278_v60 }
  0xe5   : > { %1159 = vmatpush1.bf16.msra.mxu1 %v979_v28  ;;  %1197 = vmatprep.subr.bf16.mxu0 %v7838_v13  ;;  %v1347_v9 = vsel %vm8231_vm9, %v1342_v5, %v1300_v62  ;;  %vm1350_vm11 = vcmp.lt.s32.totalorder %v1345_v7, 20 }
  0xe6   : > { %6794 = vmatprep.mubr.msk.bf16.mxu0 %vm10228_vm1, %v7390_v30 }
  0xe8   : > { %1175 = vmatmul.mubr.bf16.vlgmr.msra.gmra.mrb[0].mxu1 %v7388_v25  ;;  %1198 = vmatpush1.bf16.msra.mxu0 %v1004_v32 }
  0xe9   : > { %1199 = vmatprep.subr.bf16.mxu0 %v7838_v13  ;;  %6796 = vmatprep.mubr.msk.bf16.mxu1 %vm10228_vm1, %v7390_v30 }
  0xea   : > { %v1039_v39 = vld [vmem:[#allocation4 + $0x160] sm:$0xff] }
  0xeb   : > { %1132 = vmatmul.mubr.bf16.gmra.mrb[4].mxu0 %v7392_v33 }
  0xec   : > { %1200 = vmatpush1.bf16.msra.mxu0 %v1009_v34  ;;  %6797 = vmatprep.mubr.msk.bf16.mxu0 %vm10228_vm1, %v8086_v11  ;;  %v1034_v11 = vld [vmem:[#allocation4 + $0x138] sm:$0xff] }
  0xed   : > { %1201 = vmatprep.subr.bf16.mxu0 %v7838_v13 }
  0xf0   : > { %1185 = vmatmul.mubr.bf16.gmra.mrb[4].mxu1 %v7392_v33  ;;  %1202 = vmatpush1.bf16.msra.mxu0 %v1014_v35 }
  0xf1   : > { %1203 = vmatprep.subr.bf16.mxu0 %v7838_v13 }
  0xf2   : > { %v8241_v10 = vpop.permute.xlu0 %1046 }
  0xf3   : > { %v8243_v15 = vpop.permute.xlu1 %1051 }
  0xf4   : > { %1204 = vmatpush1.bf16.msra.mxu0 %v1019_v36 }
  0xf5   : > { %1205 = vmatprep.subr.bf16.mxu0 %v7838_v13 }
  0xf6   : > { %v8274_v57 = vpop.permute.xlu0 %1061 }
  0xf8   : > { %1206 = vmatpush1.bf16.msra.mxu0 %v1024_v37 }
  0xf9   : > { %1207 = vmatprep.subr.bf16.mxu0 %v7838_v13 }
  0xfc   : > { %1208 = vmatpush1.bf16.msra.mxu0 %v1029_v38  ;;  %v8265_v37 = vmul.u32.u64.low 2643056798, %v8252_v21  ;;  %v8266_v38 = vmul.u32.u64.high 2643056798, %v8252_v21, %v8265_v37 }
  0xfd   : > { %1209 = vmatprep.subr.bf16.mxu0 %v7838_v13 }
 0x100   : > { %1210 = vmatpush1.bf16.msra.mxu0 %v1034_v11 }
 0x101   : > { %1211 = vmatprep.subr.bf16.mxu0 %v7838_v13 }
 0x104   : > { %1212 = vmatpush1.bf16.msra.mxu0 %v1039_v39  ;;  %v8268_v39 = vpop.permute.xlu1 %1056 }
 0x107   : > { %1228 = vmatmul.mubr.bf16.vlgmr.msra.gmra.mrb[8].mxu0 %v7388_v25  ;;  %v7840_v25 = vmov 0.0  }
 0x108   : > { %6798 = vmatprep.mubr.msk.bf16.mxu0 %vm10228_vm1, %v7390_v30  ;;  %vm8227_vm1 = vmand %vm1331_vm13, %vm1326_vm12  ;;  %vm1352_vm13 = vcmp.lt.s32.totalorder %v1347_v9, 20  ;;  %v6799_v26 = vsel %vm1350_vm11, 1.0, %v7840_v25  ;;  %vm1438_vm11 = vcmask 662528  }
 0x109   : > { %v1346_v8 = vsel %vm8227_vm1, %v1341_v4, %v1289_v61  ;;  %vm8246_vm12 = vmand %vm1333_vm10, %vm1328_vm8  ;;  %vm1457_vm10 = vcmask 1048200  }
 0x10a   : > { %vm1351_vm1 = vcmp.lt.s32.totalorder %v1346_v8, 20  ;;  %v1348_v29 = vsel %vm8246_vm12, %v1343_v14, %v1311_v2  ;;  %vm1390_vm12 = vcmask 310272  }
 0x10b   : > { %v6800_v30 = vsel %vm1351_vm1, 1.0, %v7840_v25  ;;  %vm1353_vm8 = vcmp.lt.s32.totalorder %v1348_v29, 20  ;;  %1391 = vst.msk [vmem:[#allocation2 + $0x28] sm:$0xff] %vm1390_vm12, %v7838_v13  ;;  %1397 = vst.msk [vmem:[#allocation2 + $0x58] sm:$0xff] %vm1390_vm12, %v7838_v13  ;;  %vm1462_vm1 = vcmask 728064  }
 0x10c   : > { %v6802_v58 = vsel %vm1353_vm8, 1.0, %v7840_v25  ;;  %vm10267_vm8 = vcmask 613376  }
 0x10f   : > { %1236 = vmatmul.mubr.bf16.gmra.mrb[12].mxu0 %v7392_v33  ;;  %v8261_v33 = vsel %vm1352_vm13, 1.0, %v7840_v25  ;;  %vm1483_vm13 = vcmask 916480  }
 0x1b6   : > { %v1123_v12 = vpop.f32.mrb[0].mxu0 }
 0x1b7   : > { %v1124_v16 = vadd.f32 %v1123_v12, %v8241_v10  ;;  %v1125_v17 = vpop.f32.mrb[1].mxu0 }
 0x1b8   : > { %v1126_v19 = vadd.f32 %v1125_v17, %v8241_v10  ;;  %v1127_v20 = vpop.f32.mrb[2].mxu0 }
 0x1b9   : > { %v1244_v22 = vmax.f32 %v1124_v16, 0.0  ;;  %v1128_v23 = vadd.f32 %v1127_v20, %v8243_v15  ;;  %v1129_v24 = vpop.f32.mrb[3].mxu0 }
 0x1ba   : > { %v1245_v27 = vmax.f32 %v1126_v19, 0.0  ;;  %v1130_v28 = vadd.f32 %v1129_v24, %v8243_v15  ;;  %v1320_v19 = vshrl.u32 %v8266_v38, 4 }
 0x1bb   : > { %v1249_v31 = vmax.f32 %v1128_v23, 0.0  ;;  %v1176_v32 = vpop.f32.mrb[0].mxu1  ;;  %v1365_v11 = vmul.f32 %v6799_v26, %v1244_v22 }
 0x1bc   : > { %v1250_v34 = vmax.f32 %v1130_v28, 0.0  ;;  %v1177_v35 = vadd.f32 %v1176_v32, %v8241_v10  ;;  %v1178_v36 = vpop.f32.mrb[1].mxu1  ;;  %v1366_v46 = vmul.f32 %v6800_v30, %v1245_v27 }
 0x1bd   : > { %v1370_v40 = vmul.f32 %v6799_v26, %v1249_v31  ;;  %v1179_v44 = vadd.f32 %v1178_v36, %v8241_v10  ;;  %v1180_v45 = vpop.f32.mrb[2].mxu1 }
 0x1be   : > { %v1371_v47 = vmul.f32 %v6800_v30, %v1250_v34  ;;  %v1246_v48 = vmax.f32 %v1177_v35, 0.0  ;;  %v1181_v49 = vadd.f32 %v1180_v45, %v8243_v15  ;;  %v1182_v50 = vpop.f32.mrb[3].mxu1  ;;  %v1133_v51 = vpop.f32.mrb[4].mxu0 }
 0x1bf   : > { %v1247_v52 = vmax.f32 %v1179_v44, 0.0  ;;  %v1183_v53 = vadd.f32 %v1182_v50, %v8243_v15  ;;  %v1134_v54 = vadd.f32 %v1133_v51, %v8268_v39  ;;  %v1135_v55 = vpop.f32.mrb[5].mxu0  ;;  %v1398_v56 = vpack.c.bf16 %v1370_v40, %v1365_v11 }
 0x1c0   : > { %v1251_v59 = vmax.f32 %v1181_v49, 0.0  ;;  %v1136_v60 = vadd.f32 %v1135_v55, %v8268_v39  ;;  %v1137_v61 = vpop.f32.mrb[6].mxu0  ;;  %v1399_v62 = vpack.c.bf16 %v1371_v47, %v1366_v46  ;;  %v1367_v3 = vmul.f32 %v8261_v33, %v1246_v48 }
 0x1c1   : > { %v1252_v63 = vmax.f32 %v1183_v53, 0.0  ;;  %v1254_v0 = vmax.f32 %v1134_v54, 0.0  ;;  %v1138_v1 = vadd.f32 %v1137_v61, %v8274_v57  ;;  %v1139_v2 = vpop.f32.mrb[7].mxu0  ;;  %1418 = vrot.lane.b32.xlu1 %v1398_v56, %s7841_s26  ;;  %v1368_v7 = vmul.f32 %v6802_v58, %v1247_v52 }
 0x1c2   : > { %v1372_v4 = vmul.f32 %v8261_v33, %v1251_v59  ;;  %v1255_v5 = vmax.f32 %v1136_v60, 0.0  ;;  %v1140_v6 = vadd.f32 %v1139_v2, %v8274_v57  ;;  %1420 = vrot.lane.b32.xlu0 %v1399_v62, %s7841_s26 }
 0x1c3   : > { %v1373_v8 = vmul.f32 %v6802_v58, %v1252_v63  ;;  %v1259_v9 = vmax.f32 %v1138_v1, 0.0  ;;  %v1186_v12 = vpop.f32.mrb[4].mxu1  ;;  %v1375_v20 = vmul.f32 %v6799_v26, %v1254_v0 }
 0x1c4   : > { %v1260_v14 = vmax.f32 %v1140_v6, 0.0  ;;  %v1187_v16 = vadd.f32 %v1186_v12, %v8268_v39  ;;  %v1188_v17 = vpop.f32.mrb[5].mxu1  ;;  %v1400_v18 = vpack.c.bf16 %v1372_v4, %v1367_v3  ;;  %v1376_v28 = vmul.f32 %v6800_v30, %v1255_v5 }
 0x1c5   : > { %v1380_v22 = vmul.f32 %v6799_v26, %v1259_v9  ;;  %v1189_v23 = vadd.f32 %v1188_v17, %v8268_v39  ;;  %v1190_v24 = vpop.f32.mrb[6].mxu1  ;;  %v1401_v27 = vpack.c.bf16 %v1373_v8, %v1368_v7 }
 0x1c6   : > { %v1381_v29 = vmul.f32 %v6800_v30, %v1260_v14  ;;  %v1256_v31 = vmax.f32 %v1187_v16, 0.0  ;;  %v1191_v32 = vadd.f32 %v1190_v24, %v8274_v57  ;;  %v1192_v34 = vpop.f32.mrb[7].mxu1  ;;  %1422 = vrot.lane.b32.xlu1 %v1400_v18, %s7841_s26  ;;  %v1321_v30 = vmul.u32 26, %v1320_v19 }
 0x1c7   : > { %v1257_v35 = vmax.f32 %v1189_v23, 0.0  ;;  %v1193_v36 = vadd.f32 %v1192_v34, %v8274_v57  ;;  %v1403_v37 = vpack.c.bf16 %v1380_v22, %v1375_v20 }
 0x1c8   : > { %v1261_v11 = vmax.f32 %v1191_v32, 0.0  ;;  %v1404_v38 = vpack.c.bf16 %v1381_v29, %v1376_v28  ;;  %v1377_v26 = vmul.f32 %v8261_v33, %v1256_v31  ;;  %v1322_v49 = vsub.s32 %v8252_v21, %v1321_v30  ;;  %v8367_v29 = vld [vmem:[#allocation2 + $0x28] sm:$0xff]  ;;  %v8369_v31 = vld [vmem:[#allocation2 + $0x58] sm:$0xff]  ;;  %v8371_v32 = vld [vmem:[#allocation2 + $0x20] sm:$0xff] }
 0x1c9   : > { %v1262_v40 = vmax.f32 %v1193_v36, 0.0  ;;  %1428 = vrot.lane.b32.xlu0 %v1403_v37, %s7841_s26  ;;  %v1378_v45 = vmul.f32 %v6802_v58, %v1257_v35  ;;  %4569 = vst.msk [vmem:[#allocation2 + $0x28] sm:$0xff] %vm1390_vm12, %v8371_v32  ;;  %4575 = vst.msk [vmem:[#allocation2 + $0x58] sm:$0xff] %vm1390_vm12, %v8371_v32 }
 0x1ca   : > { %v1382_v44 = vmul.f32 %v8261_v33, %v1261_v11  ;;  %1430 = vrot.lane.b32.xlu1 %v1404_v38, %s7841_s26  ;;  %vm1329_vm9 = vcmp.ne.s32.totalorder %v1322_v49, 0  ;;  %vm1334_vm14 = vcmp.lt.s32.totalorder %v1322_v49, 0  ;;  %v1344_v50 = vadd.s32 26, %v1322_v49  ;;  %6107 = vst.msk [vmem:[#allocation2 + $0x28] sm:$0xff] %vm1390_vm12, %v8371_v32  ;;  %6113 = vst.msk [vmem:[#allocation2 + $0x58] sm:$0xff] %vm1390_vm12, %v8371_v32 }
 0x1cb   : > { %v1383_v46 = vmul.f32 %v6802_v58, %v1262_v40  ;;  %vm1339_vm15 = vmand %vm1334_vm14, %vm1329_vm9  ;;  %v8450_v38 = vld [vmem:[%s10266_s2 + $0x4] ss:$12 sps:$4 sm:$0xff]  }
 0x1cc   : > { %v1405_v47 = vpack.c.bf16 %v1382_v44, %v1377_v26  ;;  %v1349_v33 = vsel %vm1339_vm15, %v1344_v50, %v1322_v49  ;;  %2285 = vmatprep.mubr.bf16.mxu1 %v8450_v38  ;;  %2391 = vmatprep.mubr.bf16.mxu0 %v8450_v38  ;;  %vm10268_vm9 = vmmov %vm10267_vm8 }
 0x1cd   : > { %v1406_v48 = vpack.c.bf16 %v1383_v46, %v1378_v45  ;;  %vm1354_vm0 = vcmp.lt.s32.totalorder %v1349_v33, 20  ;;  %vm10269_vm14 = vmmov %vm10267_vm8 }
 0x1ce   : > { %1432 = vrot.lane.b32.xlu0 %v1405_v47, %s7841_s26  ;;  %1424 = vrot.lane.b32.xlu1 %v1401_v27, %s7841_s26  ;;  %v6803_v59 = vsel %vm1354_vm0, 1.0, %v7840_v25  ;;  %vm10270_vm15 = vmmov %vm10267_vm8  ;;  %vm10271_vm0 = vcmask 605184  }
 0x1cf   : > { %vm10274_vm12 = vmmov %vm10271_vm0 }
 0x1d2   : > { %1434 = vrot.lane.b32.xlu1 %v1406_v48, %s7841_s26 }
 0x1da   : > { %v1229_v51 = vpop.f32.mrb[8].mxu0 }
 0x1db   : > { %v1230_v52 = vadd.f32 %v1229_v51, %v8241_v10  ;;  %v1231_v53 = vpop.f32.mrb[9].mxu0 }
 0x1dc   : > { %v1232_v54 = vpop.f32.mrb[10].mxu0 }
 0x1dd   : > { %v1248_v55 = vmax.f32 %v1230_v52, 0.0  ;;  %v1233_v56 = vadd.f32 %v1232_v54, %v8243_v15  ;;  %v1234_v58 = vpop.f32.mrb[11].mxu0 }
 0x1df   : > { %v1253_v21 = vmax.f32 %v1233_v56, 0.0  ;;  %v1369_v60 = vmul.f32 %v6803_v59, %v1248_v55 }
 0x1e1   : > { %v1374_v61 = vmul.f32 %v6803_v59, %v1253_v21 }
 0x1e2   : > { %v1237_v62 = vpop.f32.mrb[12].mxu0 }
 0x1e3   : > { %v1238_v63 = vadd.f32 %v1237_v62, %v8268_v39  ;;  %v1239_v0 = vpop.f32.mrb[13].mxu0  ;;  %v1402_v1 = vpack.c.bf16 %v1374_v61, %v1369_v60 }
 0x1e4   : > { %v1240_v2 = vpop.f32.mrb[14].mxu0 }
 0x1e5   : > { %v1258_v3 = vmax.f32 %v1238_v63, 0.0  ;;  %v1241_v10 = vadd.f32 %v1240_v2, %v8274_v57  ;;  %1426 = vrot.lane.b32.xlu0 %v1402_v1, %s7841_s26  ;;  %v1242_v4 = vpop.f32.mrb[15].mxu0 }
 0x1e7   : > { %v1263_v5 = vmax.f32 %v1241_v10, 0.0  ;;  %v1379_v15 = vmul.f32 %v6803_v59, %v1258_v3 }
 0x1e9   : > { %v1384_v6 = vmul.f32 %v6803_v59, %v1263_v5 }
 0x1eb   : > { %v1407_v7 = vpack.c.bf16 %v1384_v6, %v1379_v15 }
 0x1ed   : > { %1436 = vrot.lane.b32.xlu0 %v1407_v7, %s7841_s26  ;;  %s7847_s26 = smov 82  }
 0x233   : > { %v1419_v8 = vpop.permute.xlu1 %1418 }
 0x234   : > { %1458 = vst.msk [vmem:[#allocation2] sm:$0xff] %vm1457_vm10, %v1419_v8  ;;  %v1421_v39 = vpop.permute.xlu0 %1420 }
 0x235   : > { %v8306_v9 = vsel %vm1438_vm11, %v1419_v8, %v1421_v39 }
 0x236   : > { %2253 = vmatprep.subr.bf16.mxu1 %v8306_v9 }
 0x238   : > { %v1423_v57 = vpop.permute.xlu1 %1422 }
 0x239   : > { %v8310_v12 = vsel %vm1438_vm11, %v1421_v39, %v1423_v57 }
 0x23a   : > { %1481 = vst [vmem:[#allocation4 + $0x10] sm:$0xff] %v8310_v12  ;;  %1514 = vrot.lane.b32.xlu0 %v8310_v12, %s10259_s29 }
 0x23b   : > { %v8315_v14 = vld [vmem:[#allocation2] sm:$0xff]  ;;  %v1429_v16 = vpop.permute.xlu0 %1428 }
 0x23c   : > { %1464 = vst.msk [vmem:[#allocation2 + $0x30] sm:$0xff] %vm1457_vm10, %v1429_v16  ;;  %1510 = vrot.lane.b32.xlu1 %v8315_v14, %s10259_s29  ;;  %v1431_v17 = vpop.permute.xlu1 %1430  ;;  %2254 = vmatpush1.bf16.msra.mxu1 %v8315_v14  ;;  %4564 = vst [vmem:[#allocation2] sm:$0xff] %v7838_v13 }
 0x23d   : > { %v8322_v18 = vsel %vm1438_vm11, %v1429_v16, %v1431_v17  ;;  %vm10272_vm10 = vmmov %vm10271_vm0 }
 0x23e   : > { %1582 = vrot.lane.b32.xlu0 %v8310_v12, %s10260_s23  ;;  %2255 = vmatprep.subr.bf16.mxu1 %v8322_v18 }
 0x240   : > { %v1433_v19 = vpop.permute.xlu0 %1432  ;;  %1578 = vrot.lane.b32.xlu1 %v8315_v14, %s10260_s23  ;;  %v1425_v20 = vpop.permute.xlu1 %1424 }
 0x241   : > { %v8330_v22 = vsel %vm1438_vm11, %v1431_v17, %v1433_v19  ;;  %v8333_v23 = vsel %vm1438_vm11, %v1423_v57, %v1425_v20 }
 0x242   : > { %1487 = vst [vmem:[#allocation4 + $0x38] sm:$0xff] %v8330_v22  ;;  %1654 = vrot.lane.b32.xlu0 %v8310_v12, %s10261_s27  ;;  %1482 = vst [vmem:[#allocation4 + $0x18] sm:$0xff] %v8333_v23  ;;  %2359 = vmatprep.subr.bf16.mxu0 %v8333_v23 }
 0x243   : > { %v8340_v24 = vld [vmem:[#allocation2 + $0x30] sm:$0xff]  ;;  %2360 = vmatpush1.bf16.msra.mxu0 %v8310_v12 }
 0x244   : > { %1650 = vrot.lane.b32.xlu1 %v8315_v14, %s10261_s27  ;;  %v1435_v27 = vpop.permute.xlu1 %1434  ;;  %2256 = vmatpush1.bf16.msra.mxu1 %v8340_v24  ;;  %6108 = vst [vmem:[#allocation2 + $0x30] sm:$0xff] %v7838_v13 }
 0x245   : > { %v8348_v28 = vsel %vm1438_vm11, %v1433_v19, %v1435_v27 }
 0x246   : > { %1732 = vrot.lane.b32.xlu0 %v8310_v12, %s10262_s30  ;;  %1488 = vst [vmem:[#allocation4 + $0x40] sm:$0xff] %v8348_v28  ;;  %2361 = vmatprep.subr.bf16.mxu0 %v8348_v28 }
 0x247   : > { %2362 = vmatpush1.bf16.msra.mxu0 %v8330_v22 }
 0x248   : > { %1728 = vrot.lane.b32.xlu1 %v8315_v14, %s10262_s30 }
 0x24a   : > { %1810 = vrot.lane.b32.xlu0 %v8310_v12, %s10263_s17 }
 0x24c   : > { %1806 = vrot.lane.b32.xlu1 %v8315_v14, %s10263_s17 }
 0x24e   : > { %1520 = vrot.lane.b32.xlu0 %v8340_v24, %s10259_s29 }
 0x250   : > { %1512 = vrot.lane.b32.xlu1 %v8306_v9, %s10259_s29 }
 0x252   : > { %1588 = vrot.lane.b32.xlu0 %v8340_v24, %s10260_s23 }
 0x254   : > { %1580 = vrot.lane.b32.xlu1 %v8306_v9, %s10260_s23 }
 0x256   : > { %1662 = vrot.lane.b32.xlu0 %v8340_v24, %s10261_s27 }
 0x257   : > { %v1427_v13 = vpop.permute.xlu0 %1426 }
 0x258   : > { %v1442_v34 = vsel %vm1438_vm11, %v1425_v20, %v1427_v13  ;;  %1652 = vrot.lane.b32.xlu1 %v8306_v9, %s10261_s27 }
 0x259   : > { %1463 = vst.msk [vmem:[#allocation2 + $0x20] sm:$0xff] %vm1462_vm1, %v1442_v34 }
 0x25a   : > { %1740 = vrot.lane.b32.xlu0 %v8340_v24, %s10262_s30 }
 0x25c   : > { %1730 = vrot.lane.b32.xlu1 %v8306_v9, %s10262_s30 }
 0x25e   : > { %1522 = vrot.lane.b32.xlu0 %v8322_v18, %s10259_s29 }
 0x25f   : > { %v1437_v35 = vpop.permute.xlu0 %1436 }
 0x260   : > { %v8392_v36 = vld [vmem:[#allocation2 + $0x20] sm:$0xff]  ;;  %v1446_v37 = vsel %vm1438_vm11, %v1435_v27, %v1437_v35  ;;  %1808 = vrot.lane.b32.xlu1 %v8306_v9, %s10263_s17  ;;  %vm10273_vm11 = vmmov %vm10271_vm0 }
 0x261   : > { %1468 = vst.msk [vmem:[#allocation2 + $0x50] sm:$0xff] %vm1462_vm1, %v1446_v37  ;;  %6106 = vst [vmem:[#allocation2 + $0x20] sm:$0xff] %v8371_v32  ;;  %v2195_v37 = vld [vmem:[%s10201_s8 + $0x18] sm:$0xff]  ;;  %vm2246_vm1 = vcmask 261120  }
 0x262   : > { %1484 = vst.msk [vmem:[#allocation4 + $0x20] sm:$0xff] %vm1483_vm13, %v8392_v36  ;;  %1818 = vrot.lane.b32.xlu0 %v8340_v24, %s10263_s17 }
 0x264   : > { %1524 = vrot.lane.b32.xlu1 %v8330_v22, %s10259_s29 }
 0x266   : > { %1590 = vrot.lane.b32.xlu0 %v8322_v18, %s10260_s23 }
 0x268   : > { %v8406_v11 = vld [vmem:[#allocation2 + $0x50] sm:$0xff]  ;;  %1886 = vrot.lane.b32.xlu1 %v8306_v9, %s10264_s20 }
 0x269   : > { %6112 = vst [vmem:[#allocation2 + $0x50] sm:$0xff] %v8371_v32  ;;  %1489 = vst.msk [vmem:[#allocation4 + $0x48] sm:$0xff] %vm1483_vm13, %v8406_v11 }
 0x26a   : > { %1888 = vrot.lane.b32.xlu0 %v8310_v12, %s10264_s20 }
 0x26c   : > { %1592 = vrot.lane.b32.xlu1 %v8330_v22, %s10260_s23 }
 0x26e   : > { %1664 = vrot.lane.b32.xlu0 %v8322_v18, %s10261_s27 }
 0x270   : > { %1884 = vrot.lane.b32.xlu1 %v8315_v14, %s10264_s20 }
 0x272   : > { %1896 = vrot.lane.b32.xlu0 %v8340_v24, %s10264_s20 }
 0x274   : > { %1666 = vrot.lane.b32.xlu1 %v8330_v22, %s10261_s27 }
 0x276   : > { %1742 = vrot.lane.b32.xlu0 %v8322_v18, %s10262_s30 }
 0x278   : > { %1964 = vrot.lane.b32.xlu1 %v8306_v9, %s10265_s28 }
 0x27a   : > { %1966 = vrot.lane.b32.xlu0 %v8310_v12, %s10265_s28 }
 0x27c   : > { %1744 = vrot.lane.b32.xlu1 %v8330_v22, %s10262_s30 }
 0x27e   : > { %1820 = vrot.lane.b32.xlu0 %v8322_v18, %s10263_s17 }
 0x280   : > { %1962 = vrot.lane.b32.xlu1 %v8315_v14, %s10265_s28 }
 0x282   : > { %1974 = vrot.lane.b32.xlu0 %v8340_v24, %s10265_s28 }
 0x284   : > { %1822 = vrot.lane.b32.xlu1 %v8330_v22, %s10263_s17 }
 0x286   : > { %1898 = vrot.lane.b32.xlu0 %v8322_v18, %s10264_s20 }
 0x288   : > { %1516 = vrot.lane.b32.xlu1 %v8333_v23, %s10259_s29 }
 0x28a   : > { %2044 = vrot.lane.b32.xlu0 %v8310_v12, %s7839_s19 }
 0x28c   : > { %1900 = vrot.lane.b32.xlu1 %v8330_v22, %s10264_s20 }
 0x28e   : > { %1976 = vrot.lane.b32.xlu0 %v8322_v18, %s10265_s28 }
 0x290   : > { %2042 = vrot.lane.b32.xlu1 %v8306_v9, %s7839_s19 }
 0x292   : > { %1526 = vrot.lane.b32.xlu0 %v8348_v28, %s10259_s29 }
 0x294   : > { %1978 = vrot.lane.b32.xlu1 %v8330_v22, %s10265_s28 }
 0x296   : > { %2054 = vrot.lane.b32.xlu0 %v8322_v18, %s7839_s19 }
 0x298   : > { %2040 = vrot.lane.b32.xlu1 %v8315_v14, %s7839_s19 }
 0x29a   : > { %1518 = vrot.lane.b32.xlu0 %v8392_v36, %s10259_s29 }
 0x29c   : > { %2056 = vrot.lane.b32.xlu1 %v8330_v22, %s7839_s19 }
 0x29e   : > { %2052 = vrot.lane.b32.xlu0 %v8340_v24, %s7839_s19 }
 0x2a0   : > { %1584 = vrot.lane.b32.xlu1 %v8333_v23, %s10260_s23 }
 0x2a2   : > { %1586 = vrot.lane.b32.xlu0 %v8392_v36, %s10260_s23 }
 0x2a4   : > { %1528 = vrot.lane.b32.xlu1 %v8406_v11, %s10259_s29 }
 0x2a6   : > { %1596 = vrot.lane.b32.xlu0 %v8406_v11, %s10260_s23 }
 0x2a8   : > { %1594 = vrot.lane.b32.xlu1 %v8348_v28, %s10260_s23 }
 0x2aa   : > { %1658 = vrot.lane.b32.xlu0 %v8392_v36, %s10261_s27 }
 0x2ac   : > { %1656 = vrot.lane.b32.xlu1 %v8333_v23, %s10261_s27  ;;  %v8488_v40 = vpop.permute.xlu0 %1514 }
 0x2ae   : > { %v1511_v26 = vpop.permute.xlu1 %1510  ;;  %1670 = vrot.lane.b32.xlu0 %v8406_v11, %s10261_s27 }
 0x2b0   : > { %1668 = vrot.lane.b32.xlu1 %v8348_v28, %s10261_s27  ;;  %v8494_v44 = vpop.permute.xlu0 %1582 }
 0x2b2   : > { %v1579_v30 = vpop.permute.xlu1 %1578  ;;  %1736 = vrot.lane.b32.xlu0 %v8392_v36, %s10262_s30 }
 0x2b4   : > { %1734 = vrot.lane.b32.xlu1 %v8333_v23, %s10262_s30  ;;  %v8500_v45 = vpop.permute.xlu0 %1654 }
 0x2b6   : > { %v8502_v46 = vpop.permute.xlu1 %1650  ;;  %1748 = vrot.lane.b32.xlu0 %v8406_v11, %s10262_s30 }
 0x2b8   : > { %1746 = vrot.lane.b32.xlu1 %v8348_v28, %s10262_s30  ;;  %v8508_v47 = vpop.permute.xlu0 %1732 }
 0x2ba   : > { %v8510_v48 = vpop.permute.xlu1 %1728  ;;  %1814 = vrot.lane.b32.xlu0 %v8392_v36, %s10263_s17 }
 0x2bc   : > { %1812 = vrot.lane.b32.xlu1 %v8333_v23, %s10263_s17  ;;  %v8516_v49 = vpop.permute.xlu0 %1810 }
 0x2be   : > { %v8518_v50 = vpop.permute.xlu1 %1806  ;;  %1826 = vrot.lane.b32.xlu0 %v8406_v11, %s10263_s17 }
 0x2c0   : > { %1824 = vrot.lane.b32.xlu1 %v8348_v28, %s10263_s17  ;;  %v1521_v33 = vpop.permute.xlu0 %1520 }
 0x2c2   : > { %v1513_v51 = vpop.permute.xlu1 %1512  ;;  %1892 = vrot.lane.b32.xlu0 %v8392_v36, %s10264_s20 }
 0x2c3   : > { %v1530_v52 = vsel %vm612_vm2, %v1511_v26, %v1513_v51  ;;  %v1531_v53 = vsel %vm612_vm2, %v1513_v51, %v8488_v40  ;;  %v2194_v26 = vld [vmem:[%s10201_s8 + $0x10] sm:$0xff] }
 0x2c4   : > { %1890 = vrot.lane.b32.xlu1 %v8333_v23, %s10264_s20  ;;  %v1589_v54 = vpop.permute.xlu0 %1588  ;;  %2257 = vmatprep.subr.bf16.mxu1 %v1531_v53 }
 0x2c5   : > { %2258 = vmatpush1.bf16.msra.mxu1 %v1530_v52 }
 0x2c6   : > { %v1581_v55 = vpop.permute.xlu1 %1580  ;;  %1904 = vrot.lane.b32.xlu0 %v8406_v11, %s10264_s20 }
 0x2c7   : > { %v1599_v3 = vsel %vm664_vm3, %v1581_v55, %v8494_v44  ;;  %v1598_v4 = vsel %vm664_vm3, %v1579_v30, %v1581_v55 }
 0x2c8   : > { %1902 = vrot.lane.b32.xlu1 %v8348_v28, %s10264_s20  ;;  %v1663_v56 = vpop.permute.xlu0 %1662 }
 0x2ca   : > { %v1653_v58 = vpop.permute.xlu1 %1652  ;;  %1970 = vrot.lane.b32.xlu0 %v8392_v36, %s10265_s28 }
 0x2cb   : > { %v1675_v39 = vsel %vm716_vm4, %v1653_v58, %v8500_v45  ;;  %v1674_v57 = vsel %vm716_vm4, %v8502_v46, %v1653_v58 }
 0x2cc   : > { %1968 = vrot.lane.b32.xlu1 %v8333_v23, %s10265_s28  ;;  %v1741_v59 = vpop.permute.xlu0 %1740 }
 0x2ce   : > { %v1731_v21 = vpop.permute.xlu1 %1730  ;;  %1980 = vrot.lane.b32.xlu0 %v8348_v28, %s10265_s28 }
 0x2cf   : > { %v1753_v19 = vsel %vm768_vm5, %v1731_v21, %v8508_v47  ;;  %v1752_v22 = vsel %vm768_vm5, %v8510_v48, %v1731_v21 }
 0x2d0   : > { %1738 = vrot.lane.b32.xlu1 %v8367_v29, %s10262_s30  ;;  %v1523_v60 = vpop.permute.xlu0 %1522 }
 0x2d1   : > { %v1534_v1 = vsel %vm612_vm2, %v1521_v33, %v1523_v60 }
 0x2d2   : > { %v8543_v61 = vpop.permute.xlu1 %1808  ;;  %1750 = vrot.lane.b32.xlu0 %v8369_v31, %s10262_s30  ;;  %s10231_s30 = smov 106  }
 0x2d3   : > { %v1831_v35 = vsel %vm820_vm6, %v8543_v61, %v8516_v49 }
 0x2d4   : > { %1982 = vrot.lane.b32.xlu1 %v8406_v11, %s10265_s28  ;;  %v8549_v62 = vpop.permute.xlu0 %1818 }
 0x2d6   : > { %v8551_v63 = vpop.permute.xlu1 %1524  ;;  %1828 = vrot.lane.b32.xlu0 %v8369_v31, %s10263_s17 }
 0x2d7   : > { %v1535_v0 = vsel %vm612_vm2, %v1523_v60, %v8551_v63 }
 0x2d8   : > { %1816 = vrot.lane.b32.xlu1 %v8367_v29, %s10263_s17  ;;  %v1591_v2 = vpop.permute.xlu0 %1590  ;;  %2259 = vmatprep.subr.bf16.mxu1 %v1535_v0  ;;  %s7843_s17 = smov 105  }
 0x2d9   : > { %2260 = vmatpush1.bf16.msra.mxu1 %v1534_v1  ;;  %v1602_v7 = vsel %vm664_vm3, %v1589_v54, %v1591_v2 }
 0x2da   : > { %v8562_v10 = vpop.permute.xlu1 %1886  ;;  %2048 = vrot.lane.b32.xlu0 %v8392_v36, %s7839_s19  ;;  %2261 = vmatprep.subr.bf16.mxu1 %v1599_v3 }
 0x2dc   : > { %2046 = vrot.lane.b32.xlu1 %v8333_v23, %s7839_s19  ;;  %v8569_v5 = vpop.permute.xlu0 %1888 }
 0x2dd   : > { %2262 = vmatpush1.bf16.msra.mxu1 %v1598_v4 }
 0x2de   : > { %v8571_v15 = vpop.permute.xlu1 %1592  ;;  %2058 = vrot.lane.b32.xlu0 %v8348_v28, %s7839_s19  ;;  %v2193_v28 = vld [vmem:[%s10201_s8 + $0x8] sm:$0xff] }
 0x2df   : > { %v1603_v6 = vsel %vm664_vm3, %v1591_v2, %v8571_v15 }
 0x2e0   : > { %1894 = vrot.lane.b32.xlu1 %v8367_v29, %s10264_s20  ;;  %v1665_v8 = vpop.permute.xlu0 %1664  ;;  %2263 = vmatprep.subr.bf16.mxu1 %v1603_v6 }
 0x2e1   : > { %2264 = vmatpush1.bf16.msra.mxu1 %v1602_v7  ;;  %v1679_v17 = vsel %vm716_vm4, %v1663_v56, %v1665_v8 }
 0x2e2   : > { %v1885_v9 = vpop.permute.xlu1 %1884  ;;  %1906 = vrot.lane.b32.xlu0 %v8369_v31, %s10264_s20  ;;  %2265 = vmatprep.subr.bf16.mxu1 %v1675_v39  ;;  %s7844_s20 = smov 104  }
 0x2e3   : > { %v1908_v53 = vsel %vm872_vm7, %v1885_v9, %v8562_v10 }
 0x2e4   : > { %2060 = vrot.lane.b32.xlu1 %v8406_v11, %s7839_s19  ;;  %v1897_v12 = vpop.permute.xlu0 %1896 }
 0x2e5   : > { %2266 = vmatpush1.bf16.msra.mxu1 %v1674_v57 }
 0x2e6   : > { %v8588_v14 = vpop.permute.xlu1 %1666  ;;  %1660 = vrot.lane.b32.xlu0 %v8367_v29, %s10261_s27 }
 0x2e7   : > { %v1680_v16 = vsel %vm716_vm4, %v1665_v8, %v8588_v14 }
 0x2e8   : > { %1972 = vrot.lane.b32.xlu1 %v8367_v29, %s10265_s28  ;;  %v1743_v18 = vpop.permute.xlu0 %1742  ;;  %2267 = vmatprep.subr.bf16.mxu1 %v1680_v16  ;;  %v8688_v16 = vld [vmem:[%s10266_s2 + $0x18] ss:$12 sps:$4 sm:$0xff]  }
 0x2e9   : > { %2268 = vmatpush1.bf16.msra.mxu1 %v1679_v17  ;;  %v1757_v13 = vsel %vm768_vm5, %v1741_v59, %v1743_v18 }
 0x2ea   : > { %v1965_v20 = vpop.permute.xlu1 %1964  ;;  %1672 = vrot.lane.b32.xlu0 %v8369_v31, %s10261_s27  ;;  %2269 = vmatprep.subr.bf16.mxu1 %v1753_v19  ;;  %s7855_s27 = smov 63  }
 0x2ec   : > { %1984 = vrot.lane.b32.xlu1 %v8369_v31, %s10265_s28  ;;  %v8605_v23 = vpop.permute.xlu0 %1966  ;;  %s7845_s28 = smov 84  }
 0x2ed   : > { %2270 = vmatpush1.bf16.msra.mxu1 %v1752_v22  ;;  %v1987_v21 = vsel %vm10267_vm8, %v1965_v20, %v8605_v23 }
 0x2ee   : > { %v8607_v24 = vpop.permute.xlu1 %1744  ;;  %2062 = vrot.lane.b32.xlu0 %v8369_v31, %s7839_s19  ;;  %v2192_v31 = vld [vmem:[%s10201_s8] sm:$0xff] }
 0x2ef   : > { %v1758_v27 = vsel %vm768_vm5, %v1743_v18, %v8607_v24 }
 0x2f0   : > { %2050 = vrot.lane.b32.xlu1 %v8367_v29, %s7839_s19  ;;  %v1821_v34 = vpop.permute.xlu0 %1820  ;;  %2271 = vmatprep.subr.bf16.mxu1 %v1758_v27  ;;  %v1830_v29 = vsel %vm820_vm6, %v8518_v50, %v8543_v61  ;;  %v1909_v50 = vsel %vm872_vm7, %v8562_v10, %v8569_v5  ;;  %v8667_v10 = vld [vmem:[%s10266_s2] ss:$12 sps:$4 sm:$0xff]   ;;  %s7846_s19 = smov 83  }
 0x2f1   : > { %2272 = vmatpush1.bf16.msra.mxu1 %v1757_v13  ;;  %v1835_v48 = vsel %vm820_vm6, %v8549_v62, %v1821_v34 }
 0x2f2   : > { %v1963_v36 = vpop.permute.xlu1 %1962  ;;  %2203 = vperm.xlu0 %7370, %v2193_v28   ;;  %2273 = vmatprep.subr.bf16.mxu1 %v1831_v35 }
 0x2f3   : > { %v1986_v60 = vsel %vm10268_vm9, %v1963_v36, %v1965_v20  ;;  %vm10275_vm9 = vmmov %vm10267_vm8 }
 0x2f4   : > { %2198 = vperm.xlu1 %7371, %v2192_v31   ;;  %v1975_v11 = vpop.permute.xlu0 %1974 }
 0x2f5   : > { %2274 = vmatpush1.bf16.msra.mxu1 %v1830_v29 }
 0x2f6   : > { %v8634_v30 = vpop.permute.xlu1 %1822  ;;  %2213 = vperm.xlu0 %7370, %v2195_v37  }
 0x2f7   : > { %v1836_v46 = vsel %vm820_vm6, %v1821_v34, %v8634_v30 }
 0x2f8   : > { %2208 = vperm.xlu1 %7371, %v2194_v26   ;;  %v1899_v33 = vpop.permute.xlu0 %1898  ;;  %2275 = vmatprep.subr.bf16.mxu1 %v1836_v46  ;;  %v8722_v26 = vld [vmem:[%s10266_s2 + $0x20] ss:$12 sps:$4 sm:$0xff]  }
 0x2f9   : > { %2276 = vmatpush1.bf16.msra.mxu1 %v1835_v48  ;;  %v1913_v58 = vsel %vm872_vm7, %v1897_v12, %v1899_v33 }
 0x2fa   : > { %v1517_v51 = vpop.permute.xlu1 %1516  ;;  %2277 = vmatprep.subr.bf16.mxu1 %v1909_v50 }
 0x2fb   : > { %v1532_v52 = vsel %vm612_vm2, %v8488_v40, %v1517_v51 }
 0x2fc   : > { %1550 = vst [vmem:[#allocation4 + $0x60] sm:$0xff] %v1532_v52  ;;  %v8647_v54 = vpop.permute.xlu0 %2044 }
 0x2fd   : > { %2278 = vmatpush1.bf16.msra.mxu1 %v1908_v53 }
 0x2fe   : > { %v8649_v55 = vpop.permute.xlu1 %1900 }
 0x2ff   : > { %v1914_v56 = vsel %vm872_vm7, %v1899_v33, %v8649_v55 }
 0x300   : > { %v1977_v59 = vpop.permute.xlu0 %1976  ;;  %2279 = vmatprep.subr.bf16.mxu1 %v1914_v56 }
 0x301   : > { %2280 = vmatpush1.bf16.msra.mxu1 %v1913_v58  ;;  %v1991_v2 = vsel %vm10270_vm15, %v1975_v11, %v1977_v59  ;;  %vm10277_vm15 = vmmov %vm10267_vm8 }
 0x302   : > { %v2043_v40 = vpop.permute.xlu1 %2042  ;;  %2281 = vmatprep.subr.bf16.mxu1 %v1987_v21 }
 0x303   : > { %v2065_v4 = vsel %vm10271_vm0, %v2043_v40, %v8647_v54 }
 0x304   : > { %v1527_v61 = vpop.permute.xlu0 %1526 }
 0x305   : > { %v1536_v62 = vsel %vm612_vm2, %v8551_v63, %v1527_v61  ;;  %2282 = vmatpush1.bf16.msra.mxu1 %v1986_v60  ;;  %v8674_v63 = vld [vmem:[%s10266_s2 + $0x1c] ss:$12 sps:$4 sm:$0xff]  }
 0x306   : > { %v8659_v0 = vpop.permute.xlu1 %1978  ;;  %1555 = vst [vmem:[#allocation4 + $0x88] sm:$0xff] %v1536_v62 }
 0x307   : > { %v1992_v1 = vsel %vm10269_vm14, %v1977_v59, %v8659_v0  ;;  %vm10276_vm14 = vmmov %vm10267_vm8 }
 0x308   : > { %v2055_v3 = vpop.permute.xlu0 %2054  ;;  %2283 = vmatprep.subr.bf16.mxu1 %v1992_v1 }
 0x309   : > { %2284 = vmatpush1.bf16.msra.mxu1 %v1991_v2 }
 0x30a   : > { %v2041_v6 = vpop.permute.xlu1 %2040  ;;  %2306 = vmatprep.subr.bf16.mxu1 %v2065_v4 }
 0x30b   : > { %v2064_v7 = vsel %vm10272_vm10, %v2041_v6, %v2043_v40  ;;  %vm10280_vm10 = vmmov %vm10271_vm0 }
 0x30c   : > { %v1519_v8 = vpop.permute.xlu0 %1518  ;;  %2286 = vmatmul.mubr.bf16.vlgmr.msra.gmra.mrb[8].mxu1 %v8667_v10 }
 0x30d   : > { %v1533_v39 = vsel %vm612_vm2, %v1517_v51, %v1519_v8  ;;  %1552 = vst.msk [vmem:[#allocation4 + $0x70] sm:$0xff] %vm1483_vm13, %v1519_v8  ;;  %2307 = vmatpush1.bf16.msra.mxu1 %v2064_v7  ;;  %2295 = vmatprep.mubr.bf16.mxu1 %v8674_v63 }
 0x30e   : > { %v8681_v9 = vpop.permute.xlu1 %2056  ;;  %1551 = vst [vmem:[#allocation4 + $0x68] sm:$0xff] %v1533_v39  ;;  %2363 = vmatprep.subr.bf16.mxu0 %v1533_v39 }
 0x30f   : > { %v2070_v57 = vsel %vm10273_vm11, %v2055_v3, %v8681_v9  ;;  %2364 = vmatpush1.bf16.msra.mxu0 %v1532_v52 }
 0x310   : > { %v2053_v12 = vpop.permute.xlu0 %2052  ;;  %2308 = vmatprep.subr.bf16.mxu1 %v2070_v57 }
 0x311   : > { %v2069_v17 = vsel %vm10274_vm12, %v2053_v12, %v2055_v3  ;;  %vm10284_vm12 = vmmov %vm10271_vm0 }
 0x312   : > { %v1585_v18 = vpop.permute.xlu1 %1584  ;;  %2309 = vmatpush1.bf16.msra.mxu1 %v2069_v17 }
 0x313   : > { %v1600_v19 = vsel %vm664_vm3, %v8494_v44, %v1585_v18  ;;  %v8702_v44 = vld [vmem:[%s10266_s2 + $0x8] ss:$12 sps:$4 sm:$0xff]   ;;  %s6743_s2 = sshll.u32 %s7993_s18, 2  ;;  %s525_s18 = sand.u32 1, %s7821_s22  }
 0x314   : > { %1618 = vst [vmem:[#allocation4 + $0xb0] sm:$0xff] %v1600_v19  ;;  %v1587_v20 = vpop.permute.xlu0 %1586  ;;  %2296 = vmatmul.mubr.bf16.gmra.mrb[12].mxu1 %v8688_v16 }
 0x315   : > { %v1601_v22 = vsel %vm664_vm3, %v1585_v18, %v1587_v20  ;;  %1620 = vst.msk [vmem:[#allocation4 + $0xc0] sm:$0xff] %vm1483_vm13, %v1587_v20  ;;  %2338 = vmatprep.mubr.bf16.mxu1 %v8371_v32 }
 0x316   : > { %v1529_v27 = vpop.permute.xlu1 %1528  ;;  %1619 = vst [vmem:[#allocation4 + $0xb8] sm:$0xff] %v1601_v22 }
 0x317   : > { %v1537_v28 = vsel %vm612_vm2, %v1527_v61, %v1529_v27  ;;  %1557 = vst.msk [vmem:[#allocation4 + $0x98] sm:$0xff] %vm1483_vm13, %v1529_v27 }
 0x318   : > { %1556 = vst [vmem:[#allocation4 + $0x90] sm:$0xff] %v1537_v28  ;;  %v1597_v13 = vpop.permute.xlu0 %1596  ;;  %2365 = vmatprep.subr.bf16.mxu0 %v1537_v28 }
 0x319   : > { %1625 = vst.msk [vmem:[#allocation4 + $0xe8] sm:$0xff] %vm1483_vm13, %v1597_v13  ;;  %2366 = vmatpush1.bf16.msra.mxu0 %v1536_v62 }
 0x31a   : > { %v1595_v34 = vpop.permute.xlu1 %1594  ;;  %2367 = vmatprep.subr.bf16.mxu0 %v1601_v22 }
 0x31b   : > { %v1604_v35 = vsel %vm664_vm3, %v8571_v15, %v1595_v34  ;;  %v1605_v31 = vsel %vm664_vm3, %v1595_v34, %v1597_v13  ;;  %v2106_v34 = vld [vmem:[#allocation4 + $0x20] sm:$0xff] }
 0x31c   : > { %1623 = vst [vmem:[#allocation4 + $0xd8] sm:$0xff] %v1604_v35  ;;  %1624 = vst [vmem:[#allocation4 + $0xe0] sm:$0xff] %v1605_v31  ;;  %v8708_v36 = vpop.permute.xlu0 %1658  ;;  %6810 = vmatmul.mubr.msk.bf16.vlgmr.msra.gmra.mrb[8].mxu1 %vm2246_vm1, %v8702_v44 }
 0x31d   : > { %2368 = vmatpush1.bf16.msra.mxu0 %v1600_v19  ;;  %2348 = vmatprep.mubr.bf16.mxu1 %v8371_v32 }
 0x31e   : > { %v1657_v37 = vpop.permute.xlu1 %1656  ;;  %2369 = vmatprep.subr.bf16.mxu0 %v1605_v31 }
 0x31f   : > { %v1676_v29 = vsel %vm716_vm4, %v8500_v45, %v1657_v37  ;;  %v1677_v15 = vsel %vm716_vm4, %v1657_v37, %v8708_v36 }
 0x320   : > { %1696 = vst [vmem:[#allocation4 + $0x100] sm:$0xff] %v1676_v29  ;;  %1697 = vst [vmem:[#allocation4 + $0x108] sm:$0xff] %v1677_v15  ;;  %v8717_v11 = vpop.permute.xlu0 %1670 }
 0x321   : > { %2370 = vmatpush1.bf16.msra.mxu0 %v1604_v35 }
 0x322   : > { %v1669_v46 = vpop.permute.xlu1 %1668  ;;  %2371 = vmatprep.subr.bf16.mxu0 %v1677_v15 }
 0x323   : > { %v1681_v48 = vsel %vm716_vm4, %v8588_v14, %v1669_v46  ;;  %v1682_v45 = vsel %vm716_vm4, %v1669_v46, %v8717_v11  ;;  %v2111_v46 = vld [vmem:[#allocation4 + $0x48] sm:$0xff] }
 0x324   : > { %1701 = vst [vmem:[#allocation4 + $0x128] sm:$0xff] %v1681_v48  ;;  %1702 = vst [vmem:[#allocation4 + $0x130] sm:$0xff] %v1682_v45  ;;  %v1737_v33 = vpop.permute.xlu0 %1736  ;;  %6811 = vmatmul.mubr.msk.bf16.gmra.mrb[12].mxu1 %vm2246_vm1, %v8722_v26 }
 0x325   : > { %2372 = vmatpush1.bf16.msra.mxu0 %v1676_v29  ;;  %2497 = vmatprep.mubr.bf16.mxu1 %v8450_v38 }
 0x326   : > { %v1735_v50 = vpop.permute.xlu1 %1734  ;;  %2373 = vmatprep.subr.bf16.mxu0 %v1682_v45 }
 0x327   : > { %v1754_v51 = vsel %vm768_vm5, %v8508_v47, %v1735_v50  ;;  %v1755_v52 = vsel %vm768_vm5, %v1735_v50, %v1737_v33 }
 0x328   : > { %1774 = vst [vmem:[#allocation4 + $0x150] sm:$0xff] %v1754_v51  ;;  %1775 = vst [vmem:[#allocation4 + $0x158] sm:$0xff] %v1755_v52  ;;  %v1749_v14 = vpop.permute.xlu0 %1748 }
 0x329   : > { %2374 = vmatpush1.bf16.msra.mxu0 %v1681_v48 }
 0x32a   : > { %v1747_v53 = vpop.permute.xlu1 %1746  ;;  %2375 = vmatprep.subr.bf16.mxu0 %v1755_v52 }
 0x32b   : > { %v1759_v56 = vsel %vm768_vm5, %v8607_v24, %v1747_v53  ;;  %v1760_v58 = vsel %vm768_vm5, %v1747_v53, %v1749_v14 }
 0x32c   : > { %1779 = vst [vmem:[#allocation4 + $0x178] sm:$0xff] %v1759_v56  ;;  %v1815_v38 = vpop.permute.xlu0 %1814 }
 0x32d   : > { %2376 = vmatpush1.bf16.msra.mxu0 %v1754_v51 }
 0x32e   : > { %v1813_v59 = vpop.permute.xlu1 %1812  ;;  %2377 = vmatprep.subr.bf16.mxu0 %v1760_v58 }
 0x32f   : > { %v1832_v47 = vsel %vm820_vm6, %v8516_v49, %v1813_v59  ;;  %v1833_v21 = vsel %vm820_vm6, %v1813_v59, %v1815_v38 }
 0x330   : > { %1852 = vst [vmem:[#allocation4 + $0x1a0] sm:$0xff] %v1832_v47  ;;  %v1827_v40 = vpop.permute.xlu0 %1826 }
 0x331   : > { %2378 = vmatpush1.bf16.msra.mxu0 %v1759_v56  ;;  %v7403_v56 = vld [vmem:[%s10206_s13 + $0x4] ss:$16 sps:$4 sm:$0xff]  }
 0x332   : > { %v1825_v60 = vpop.permute.xlu1 %1824  ;;  %2379 = vmatprep.subr.bf16.mxu0 %v1833_v21 }
 0x333   : > { %v1837_v24 = vsel %vm820_vm6, %v8634_v30, %v1825_v60  ;;  %v1838_v61 = vsel %vm820_vm6, %v1825_v60, %v1827_v40 }
 0x334   : > { %1857 = vst [vmem:[#allocation4 + $0x1c8] sm:$0xff] %v1837_v24  ;;  %v8743_v62 = vpop.permute.xlu0 %1892 }
 0x335   : > { %2380 = vmatpush1.bf16.msra.mxu0 %v1832_v47 }
 0x336   : > { %v1891_v1 = vpop.permute.xlu1 %1890  ;;  %2381 = vmatprep.subr.bf16.mxu0 %v1838_v61  ;;  %v7409_v61 = vld [vmem:[%s10206_s13 + $0x24] ss:$16 sps:$4 sm:$0xff]  }
 0x337   : > { %v1910_v49 = vsel %vm872_vm7, %v8569_v5, %v1891_v1  ;;  %v1911_v2 = vsel %vm872_vm7, %v1891_v1, %v8743_v62 }
 0x338   : > { %1930 = vst [vmem:[#allocation4 + $0x1f0] sm:$0xff] %v1910_v49  ;;  %v8749_v3 = vpop.permute.xlu0 %1904 }
 0x339   : > { %2382 = vmatpush1.bf16.msra.mxu0 %v1837_v24 }
 0x33a   : > { %v1903_v4 = vpop.permute.xlu1 %1902  ;;  %2383 = vmatprep.subr.bf16.mxu0 %v1911_v2 }
 0x33b   : > { %v1915_v30 = vsel %vm872_vm7, %v8649_v55, %v1903_v4  ;;  %v1916_v6 = vsel %vm872_vm7, %v1903_v4, %v8749_v3 }
 0x33c   : > { %1935 = vst [vmem:[#allocation4 + $0x218] sm:$0xff] %v1915_v30  ;;  %v8755_v7 = vpop.permute.xlu0 %1970 }
 0x33d   : > { %2384 = vmatpush1.bf16.msra.mxu0 %v1910_v49 }
 0x33e   : > { %v1969_v5 = vpop.permute.xlu1 %1968  ;;  %2385 = vmatprep.subr.bf16.mxu0 %v1916_v6 }
 0x33f   : > { %v1988_v8 = vsel %vm10267_vm8, %v8605_v23, %v1969_v5  ;;  %v1989_v39 = vsel %vm10275_vm9, %v1969_v5, %v8755_v7  ;;  %v7413_v5 = vld [vmem:[%s10206_s13 + $0x40] ss:$16 sps:$4 sm:$0xff]   ;;  %vm3864_vm9 = vcmask 277504  }
 0x340   : > { %2008 = vst [vmem:[#allocation4 + $0x240] sm:$0xff] %v1988_v8  ;;  %v1981_v57 = vpop.permute.xlu0 %1980 }
 0x341   : > { %v1993_v55 = vsel %vm10276_vm14, %v8659_v0, %v1981_v57  ;;  %2386 = vmatpush1.bf16.msra.mxu0 %v1915_v30  ;;  %vm4118_vm14 = vcmask 687104  }
 0x342   : > { %v1739_v12 = vpop.permute.xlu1 %1738  ;;  %2013 = vst [vmem:[#allocation4 + $0x268] sm:$0xff] %v1993_v55  ;;  %2387 = vmatprep.subr.bf16.mxu0 %v1989_v39 }
 0x343   : > { %v1756_v17 = vsel %vm768_vm5, %v1737_v33, %v1739_v12  ;;  %v7419_v12 = vld [vmem:[%s10206_s13 + $0x60] ss:$16 sps:$4 sm:$0xff]  }
 0x344   : > { %1776 = vst.msk [vmem:[#allocation4 + $0x160] sm:$0xff] %vm1483_vm13, %v1756_v17  ;;  %v1751_v18 = vpop.permute.xlu0 %1750 }
 0x345   : > { %v1761_v19 = vsel %vm768_vm5, %v1749_v14, %v1751_v18  ;;  %2388 = vmatpush1.bf16.msra.mxu0 %v1988_v8  ;;  %vm10278_vm5 = vmmov %vm10271_vm0  ;;  %v7427_v18 = vld [vmem:[%s10206_s13 + $0x84] ss:$16 sps:$4 sm:$0xff]  }
 0x346   : > { %v8766_v23 = vpop.permute.xlu1 %1982  ;;  %1781 = vst.msk [vmem:[#allocation4 + $0x188] sm:$0xff] %vm1483_vm13, %v1761_v19 }
 0x347   : > { %v1994_v20 = vsel %vm10277_vm15, %v1981_v57, %v8766_v23  ;;  %v7421_v57 = vld [vmem:[%s10206_s13 + $0x64] ss:$16 sps:$4 sm:$0xff]   ;;  %vm10237_vm15 = vcmask 867328  }
 0x348   : > { %v1829_v0 = vpop.permute.xlu0 %1828  ;;  %2389 = vmatprep.subr.bf16.mxu0 %v1994_v20 }
 0x349   : > { %v1839_v22 = vsel %vm820_vm6, %v1827_v40, %v1829_v0  ;;  %2390 = vmatpush1.bf16.msra.mxu0 %v1993_v55  ;;  %v7401_v40 = vld [vmem:[%s10206_s13] ss:$16 sps:$4 sm:$0xff]   ;;  %v7433_v0 = vld [vmem:[%s10206_s13 + $0xa4] ss:$16 sps:$4 sm:$0xff]  }
 0x34a   : > { %v1817_v27 = vpop.permute.xlu1 %1816  ;;  %1859 = vst.msk [vmem:[#allocation4 + $0x1d8] sm:$0xff] %vm1483_vm13, %v1839_v22 }
 0x34b   : > { %v1834_v28 = vsel %vm820_vm6, %v1815_v38, %v1817_v27  ;;  %v2146_v13 = vld [vmem:[#allocation4 + $0x160] sm:$0xff]  ;;  %vm10279_vm6 = vmmov %vm10271_vm0  ;;  %v2121_v38 = vld [vmem:[#allocation4 + $0x98] sm:$0xff] }
 0x34c   : > { %1854 = vst.msk [vmem:[#allocation4 + $0x1b0] sm:$0xff] %vm1483_vm13, %v1834_v28  ;;  %7094 = vmatprep.subr.bf16.mxu1 %v2146_v13  ;;  %v8775_v35 = vpop.permute.xlu0 %2048  ;;  %2392 = vmatmul.mubr.bf16.vlgmr.msra.gmra.mrb[16].mxu0 %v8667_v10  ;;  %v7406_v27 = vld [vmem:[%s10206_s13 + $0xc] ss:$16 sps:$4 sm:$0xff]   ;;  %v7431_v28 = vld [vmem:[%s10206_s13 + $0xa0] ss:$16 sps:$4 sm:$0xff]  }
 0x34d   : > { %7095 = vmatpush3.bf16.msra.mxu1 %v2106_v34  ;;  %v2151_v31 = vld [vmem:[#allocation4 + $0x188] sm:$0xff]  ;;  %2401 = vmatprep.mubr.bf16.mxu0 %v8674_v63  ;;  %v7439_v13 = vld [vmem:[%s10206_s13 + $0xc4] ss:$16 sps:$4 sm:$0xff]   ;;  %v7443_v34 = vld [vmem:[%s10206_s13 + $0xe0] ss:$16 sps:$4 sm:$0xff]  }
 0x34e   : > { %v2047_v37 = vpop.permute.xlu1 %2046  ;;  %7096 = vmatprep.subr.bf16.mxu1 %v2151_v31  ;;  %v7404_v31 = vld [vmem:[%s10206_s13 + $0x8] ss:$16 sps:$4 sm:$0xff]  }
 0x34f   : > { %v2066_v29 = vsel %vm10278_vm5, %v8647_v54, %v2047_v37  ;;  %v2067_v15 = vsel %vm10279_vm6, %v2047_v37, %v8775_v35  ;;  %v2116_v54 = vld [vmem:[#allocation4 + $0x70] sm:$0xff]  ;;  %vm4028_vm5 = vcmask 859136   ;;  %vm4169_vm6 = vcmask 678912  }
 0x350   : > { %2086 = vst [vmem:[#allocation4 + $0x290] sm:$0xff] %v2066_v29  ;;  %v2059_v48 = vpop.permute.xlu0 %2058  ;;  %2412 = vmatprep.subr.bf16.mxu0 %v2067_v15  ;;  %v7457_v37 = vld [vmem:[%s10206_s13 + $0x124] ss:$16 sps:$4 sm:$0xff]   ;;  %v7418_v15 = vld [vmem:[%s10206_s13 + $0x4c] ss:$16 sps:$4 sm:$0xff]  }
 0x351   : > { %7097 = vmatpush3.bf16.msra.mxu1 %v2111_v46  ;;  %v2071_v45 = vsel %vm10271_vm0, %v8681_v9, %v2059_v48  ;;  %2413 = vmatpush1.bf16.msra.mxu0 %v2066_v29  ;;  %v2161_v53 = vld [vmem:[#allocation4 + $0x1d8] sm:$0xff]  ;;  %v7455_v46 = vld [vmem:[%s10206_s13 + $0x120] ss:$16 sps:$4 sm:$0xff]  }
 0x352   : > { %v1895_v33 = vpop.permute.xlu1 %1894  ;;  %2091 = vst [vmem:[#allocation4 + $0x2b8] sm:$0xff] %v2071_v45  ;;  %v7410_v29 = vld [vmem:[%s10206_s13 + $0x28] ss:$16 sps:$4 sm:$0xff]  }
 0x353   : > { %v1912_v50 = vsel %vm872_vm7, %v8743_v62, %v1895_v33  ;;  %v2156_v51 = vld [vmem:[#allocation4 + $0x1b0] sm:$0xff] }
 0x354   : > { %1932 = vst.msk [vmem:[#allocation4 + $0x200] sm:$0xff] %vm1483_vm13, %v1912_v50  ;;  %7098 = vmatprep.subr.bf16.mxu1 %v2156_v51  ;;  %v1907_v52 = vpop.permute.xlu0 %1906  ;;  %2402 = vmatmul.mubr.bf16.gmra.mrb[20].mxu0 %v8688_v16  ;;  %v7461_v33 = vld [vmem:[%s10206_s13 + $0x140] ss:$16 sps:$4 sm:$0xff]   ;;  %v7469_v50 = vld [vmem:[%s10206_s13 + $0x164] ss:$16 sps:$4 sm:$0xff]  }
 0x355   : > { %7099 = vmatpush3.bf16.msra.mxu1 %v2116_v54  ;;  %v1917_v14 = vsel %vm872_vm7, %v8749_v3, %v1907_v52  ;;  %2444 = vmatprep.mubr.bf16.mxu0 %v8371_v32  ;;  %vm10281_vm7 = vmmov %vm10267_vm8  ;;  %v7407_v3 = vld [vmem:[%s10206_s13 + $0x20] ss:$16 sps:$4 sm:$0xff]   ;;  %v7422_v51 = vld [vmem:[%s10206_s13 + $0x68] ss:$16 sps:$4 sm:$0xff]   ;;  %vm3878_vm8 = vcmask 785408  }
 0x356   : > { %v2061_v9 = vpop.permute.xlu1 %2060  ;;  %1937 = vst.msk [vmem:[#allocation4 + $0x228] sm:$0xff] %vm1483_vm13, %v1917_v14  ;;  %7100 = vmatprep.subr.bf16.mxu1 %v2161_v53  ;;  %vm10282_vm11 = vmmov %vm10281_vm7  ;;  %v7430_v54 = vld [vmem:[%s10206_s13 + $0x8c] ss:$16 sps:$4 sm:$0xff]   ;;  %v7467_v52 = vld [vmem:[%s10206_s13 + $0x160] ss:$16 sps:$4 sm:$0xff]  }
 0x357   : > { %v2072_v58 = vsel %vm10280_vm10, %v2059_v48, %v2061_v9  ;;  %v7416_v48 = vld [vmem:[%s10206_s13 + $0x48] ss:$16 sps:$4 sm:$0xff]   ;;  %v7475_v14 = vld [vmem:[%s10206_s13 + $0x184] ss:$16 sps:$4 sm:$0xff]   ;;  %vm10234_vm10 = vmmov 0  }
 0x358   : > { %v1661_v59 = vpop.permute.xlu0 %1660  ;;  %2414 = vmatprep.subr.bf16.mxu0 %v2072_v58  ;;  %v7428_v53 = vld [vmem:[%s10206_s13 + $0x88] ss:$16 sps:$4 sm:$0xff]   ;;  %v7481_v58 = vld [vmem:[%s10206_s13 + $0x1a4] ss:$16 sps:$4 sm:$0xff]  }
 0x359   : > { %7101 = vmatpush3.bf16.msra.mxu1 %v2121_v38  ;;  %v1678_v47 = vsel %vm716_vm4, %v8708_v36, %v1661_v59  ;;  %2415 = vmatpush1.bf16.msra.mxu0 %v2071_v45  ;;  %v2126_v36 = vld [vmem:[#allocation4 + $0xc0] sm:$0xff]  ;;  %v7424_v45 = vld [vmem:[%s10206_s13 + $0x6c] ss:$16 sps:$4 sm:$0xff]   ;;  %v7434_v38 = vld [vmem:[%s10206_s13 + $0xa8] ss:$16 sps:$4 sm:$0xff]  }
 0x35a   : > { %v1973_v21 = vpop.permute.xlu1 %1972  ;;  %1698 = vst.msk [vmem:[#allocation4 + $0x110] sm:$0xff] %vm1483_vm13, %v1678_v47  ;;  %3535 = vmatprep.subr.bf16.mxu0 %v7403_v56  ;;  %v7473_v56 = vld [vmem:[%s10206_s13 + $0x180] ss:$16 sps:$4 sm:$0xff]   ;;  %v7442_v59 = vld [vmem:[%s10206_s13 + $0xcc] ss:$16 sps:$4 sm:$0xff]  }
 0x35b   : > { %v1990_v60 = vsel %vm10281_vm7, %v8755_v7, %v1973_v21  ;;  %v2166_v24 = vld [vmem:[#allocation4 + $0x200] sm:$0xff] }
 0x35c   : > { %2010 = vst.msk [vmem:[#allocation4 + $0x250] sm:$0xff] %vm1483_vm13, %v1990_v60  ;;  %7102 = vmatprep.subr.bf16.mxu1 %v2166_v24  ;;  %v1673_v62 = vpop.permute.xlu0 %1672  ;;  %6812 = vmatmul.mubr.msk.bf16.vlgmr.msra.gmra.mrb[16].mxu0 %vm2246_vm1, %v8702_v44  ;;  %v7479_v47 = vld [vmem:[%s10206_s13 + $0x1a0] ss:$16 sps:$4 sm:$0xff]   ;;  %v7487_v21 = vld [vmem:[%s10206_s13 + $0x1c4] ss:$16 sps:$4 sm:$0xff]  }
 0x35d   : > { %7103 = vmatpush3.bf16.msra.mxu1 %v2126_v36  ;;  %v1683_v1 = vsel %vm716_vm4, %v8717_v11, %v1673_v62  ;;  %v2171_v49 = vld [vmem:[#allocation4 + $0x228] sm:$0xff]  ;;  %2454 = vmatprep.mubr.bf16.mxu0 %v8371_v32  ;;  %v7415_v11 = vld [vmem:[%s10206_s13 + $0x44] ss:$16 sps:$4 sm:$0xff]   ;;  %vm10283_vm4 = vmmov %vm10271_vm0  ;;  %vm4220_vm0 = vcmask 670720  }
 0x35e   : > { %v1985_v2 = vpop.permute.xlu1 %1984  ;;  %1703 = vst.msk [vmem:[#allocation4 + $0x138] sm:$0xff] %vm1483_vm13, %v1683_v1  ;;  %7104 = vmatprep.subr.bf16.mxu1 %v2171_v49  ;;  %3536 = vmatpush1.bf16.msra.mxu0 %v7401_v40  ;;  %v2131_v32 = vld [vmem:[#allocation4 + $0xe8] sm:$0xff]  ;;  %v7485_v24 = vld [vmem:[%s10206_s13 + $0x1c0] ss:$16 sps:$4 sm:$0xff]   ;;  %v7499_v49 = vld [vmem:[%s10206_s13 + $0x204] ss:$16 sps:$4 sm:$0xff]  }
 0x35f   : > { %v1995_v4 = vsel %vm10282_vm11, %v8766_v23, %v1985_v2  ;;  %3537 = vmatprep.subr.bf16.mxu0 %v7409_v61  ;;  %v7425_v23 = vld [vmem:[%s10206_s13 + $0x80] ss:$16 sps:$4 sm:$0xff]   ;;  %v7440_v40 = vld [vmem:[%s10206_s13 + $0xc8] ss:$16 sps:$4 sm:$0xff]   ;;  %v7448_v60 = vld [vmem:[%s10206_s13 + $0xec] ss:$16 sps:$4 sm:$0xff]  }
 0x360   : > { %2015 = vst.msk [vmem:[#allocation4 + $0x278] sm:$0xff] %vm1483_vm13, %v1995_v4  ;;  %v2063_v30 = vpop.permute.xlu0 %2062  ;;  %v7493_v61 = vld [vmem:[%s10206_s13 + $0x1e4] ss:$16 sps:$4 sm:$0xff]   ;;  %v7446_v36 = vld [vmem:[%s10206_s13 + $0xe8] ss:$16 sps:$4 sm:$0xff]  }
 0x361   : > { %7105 = vmatpush3.bf16.msra.mxu1 %v2131_v32  ;;  %v2073_v6 = vsel %vm10283_vm4, %v2061_v9, %v2063_v30  ;;  %v2136_v55 = vld [vmem:[#allocation4 + $0x110] sm:$0xff]  ;;  %v7436_v9 = vld [vmem:[%s10206_s13 + $0xac] ss:$16 sps:$4 sm:$0xff]   ;;  %v7452_v2 = vld [vmem:[%s10206_s13 + $0x108] ss:$16 sps:$4 sm:$0xff]  }
 0x362   : > { %v2051_v7 = vpop.permute.xlu1 %2050  ;;  %2093 = vst.msk [vmem:[#allocation4 + $0x2c8] sm:$0xff] %vm1483_vm13, %v2073_v6  ;;  %3538 = vmatpush1.bf16.msra.mxu0 %v7407_v3  ;;  %v7454_v62 = vld [vmem:[%s10206_s13 + $0x10c] ss:$16 sps:$4 sm:$0xff]   ;;  %v7491_v1 = vld [vmem:[%s10206_s13 + $0x1e0] ss:$16 sps:$4 sm:$0xff]  }
 0x363   : > { %v2068_v8 = vsel %vm10284_vm12, %v8775_v35, %v2051_v7  ;;  %v2176_v39 = vld [vmem:[#allocation4 + $0x250] sm:$0xff]  ;;  %3539 = vmatprep.subr.bf16.mxu0 %v7415_v11  ;;  %v7460_v3 = vld [vmem:[%s10206_s13 + $0x12c] ss:$16 sps:$4 sm:$0xff]   ;;  %v7458_v4 = vld [vmem:[%s10206_s13 + $0x128] ss:$16 sps:$4 sm:$0xff]  }
 0x364   : > { %2088 = vst.msk [vmem:[#allocation4 + $0x2a0] sm:$0xff] %vm1483_vm13, %v2068_v8  ;;  %7106 = vmatprep.subr.bf16.mxu1 %v2176_v39  ;;  %6813 = vmatmul.mubr.msk.bf16.gmra.mrb[20].mxu0 %vm2246_vm1, %v8722_v26  ;;  %v7451_v35 = vld [vmem:[%s10206_s13 + $0x104] ss:$16 sps:$4 sm:$0xff]   ;;  %v7466_v11 = vld [vmem:[%s10206_s13 + $0x14c] ss:$16 sps:$4 sm:$0xff]  }
 0x365   : > { %7107 = vmatpush3.bf16.msra.mxu1 %v2136_v55  ;;  %v2141_v19 = vld [vmem:[#allocation4 + $0x138] sm:$0xff] }
 0x366   : > { %3540 = vmatpush1.bf16.msra.mxu0 %v7413_v5  ;;  %v7464_v32 = vld [vmem:[%s10206_s13 + $0x148] ss:$16 sps:$4 sm:$0xff]   ;;  %v7472_v30 = vld [vmem:[%s10206_s13 + $0x16c] ss:$16 sps:$4 sm:$0xff]  }
 0x367   : > { %v2181_v17 = vld [vmem:[#allocation4 + $0x278] sm:$0xff]  ;;  %3541 = vmatprep.subr.bf16.mxu0 %v7421_v57 }
 0x368   : > { %7108 = vmatprep.subr.bf16.mxu1 %v2181_v17  ;;  %v7470_v6 = vld [vmem:[%s10206_s13 + $0x168] ss:$16 sps:$4 sm:$0xff]   ;;  %v7478_v7 = vld [vmem:[%s10206_s13 + $0x18c] ss:$16 sps:$4 sm:$0xff]  }
 0x369   : > { %7109 = vmatpush3.bf16.msra.mxu1 %v2141_v19  ;;  %v2191_v22 = vld [vmem:[#allocation4 + $0x2c8] sm:$0xff] }
 0x36a   : > { %3542 = vmatpush1.bf16.msra.mxu0 %v7419_v12  ;;  %v7476_v5 = vld [vmem:[%s10206_s13 + $0x188] ss:$16 sps:$4 sm:$0xff]   ;;  %v7484_v8 = vld [vmem:[%s10206_s13 + $0x1ac] ss:$16 sps:$4 sm:$0xff]  }
 0x36b   : > { %v2186_v20 = vld [vmem:[#allocation4 + $0x2a0] sm:$0xff]  ;;  %3543 = vmatprep.subr.bf16.mxu0 %v7427_v18  ;;  %v7482_v39 = vld [vmem:[%s10206_s13 + $0x1a8] ss:$16 sps:$4 sm:$0xff]   ;;  %v7490_v57 = vld [vmem:[%s10206_s13 + $0x1cc] ss:$16 sps:$4 sm:$0xff]  }
 0x36c   : > { %7176 = vmatprep.subr.bf16.mxu1 %v2186_v20  ;;  %2498 = vmatmul.mubr.bf16.vlgmr.msra.gmra.mrb[16].mxu1 %v8667_v10  ;;  %v7437_v10 = vld [vmem:[%s10206_s13 + $0xc0] ss:$16 sps:$4 sm:$0xff]   ;;  %v7488_v55 = vld [vmem:[%s10206_s13 + $0x1c8] ss:$16 sps:$4 sm:$0xff]   ;;  %v7496_v12 = vld [vmem:[%s10206_s13 + $0x1ec] ss:$16 sps:$4 sm:$0xff]  }
 0x36d   : > { %7177 = vmatpush3.bf16.msra.mxu1 %v2186_v20  ;;  %2505 = vmatprep.mubr.bf16.mxu1 %v8674_v63  ;;  %v7445_v63 = vld [vmem:[%s10206_s13 + $0xe4] ss:$16 sps:$4 sm:$0xff]   ;;  %v7494_v17 = vld [vmem:[%s10206_s13 + $0x1e8] ss:$16 sps:$4 sm:$0xff]   ;;  %v7502_v18 = vld [vmem:[%s10206_s13 + $0x20c] ss:$16 sps:$4 sm:$0xff]  }
 0x36e   : > { %7178 = vmatprep.subr.bf16.mxu1 %v2191_v22  ;;  %3544 = vmatpush1.bf16.msra.mxu0 %v7425_v23 }
 0x36f   : > { %3545 = vmatprep.subr.bf16.mxu0 %v7433_v0 }
 0x371   : > { %7179 = vmatpush3.bf16.msra.mxu1 %v2191_v22  ;;  %v9024_v22 = vpop.permute.xlu0 %2203 }
 0x372   : > { %3694 = vmatprep.subr.bf16.mxu1 %v7406_v27  ;;  %3546 = vmatpush1.bf16.msra.mxu0 %v7431_v28 }
 0x373   : > { %3547 = vmatprep.subr.bf16.mxu0 %v7439_v13  ;;  %v9021_v19 = vpop.permute.xlu1 %2198 }
 0x374   : > { %2506 = vmatmul.mubr.bf16.gmra.mrb[20].mxu1 %v8688_v16  ;;  %v7412_v16 = vld [vmem:[%s10206_s13 + $0x2c] ss:$16 sps:$4 sm:$0xff]  }
 0x375   : > { %7180 = vmatprep.mubr.msk.bf16.mxu1 %vm2246_vm1, %v8702_v44  ;;  %v7449_v44 = vld [vmem:[%s10206_s13 + $0x100] ss:$16 sps:$4 sm:$0xff]  }
 0x376   : > { %3548 = vmatpush1.bf16.msra.mxu0 %v7437_v10 }
 0x377   : > { %3549 = vmatprep.subr.bf16.mxu0 %v7445_v63 }
 0x37a   : > { %3550 = vmatpush1.bf16.msra.mxu0 %v7443_v34 }
 0x37b   : > { %3551 = vmatprep.subr.bf16.mxu0 %v7451_v35 }
 0x37c   : > { %7181 = vmatmul.mubr.msk.bf16.vlgmr.msra.gmra.mrb[24].mxu1 %vm2246_vm1, %v8722_v26  ;;  %v7463_v26 = vld [vmem:[%s10206_s13 + $0x144] ss:$16 sps:$4 sm:$0xff]  }
 0x37d   : > { %3695 = vmatpush1.bf16.msra.mxu1 %v7404_v31 }
 0x37e   : > { %3696 = vmatprep.subr.bf16.mxu1 %v7412_v16  ;;  %3552 = vmatpush1.bf16.msra.mxu0 %v7449_v44 }
 0x37f   : > { %3553 = vmatprep.subr.bf16.mxu0 %v7457_v37  ;;  %v9029_v37 = vpop.permute.xlu1 %2208 }
 0x381   : > { %3697 = vmatpush1.bf16.msra.mxu1 %v7410_v29 }
 0x382   : > { %3698 = vmatprep.subr.bf16.mxu1 %v7418_v15  ;;  %3554 = vmatpush1.bf16.msra.mxu0 %v7455_v46  ;;  %v7497_v46 = vld [vmem:[%s10206_s13 + $0x200] ss:$16 sps:$4 sm:$0xff]  }
 0x383   : > { %3555 = vmatprep.subr.bf16.mxu0 %v7463_v26  ;;  %v7500_v26 = vld [vmem:[%s10206_s13 + $0x208] ss:$16 sps:$4 sm:$0xff]  }
 0x385   : > { %3699 = vmatpush1.bf16.msra.mxu1 %v7416_v48 }
 0x386   : > { %3700 = vmatprep.subr.bf16.mxu1 %v7424_v45  ;;  %3556 = vmatpush1.bf16.msra.mxu0 %v7461_v33  ;;  %v7505_v33 = vld [vmem:[%s10206_s13 + $0x224] ss:$16 sps:$4 sm:$0xff]  }
 0x387   : > { %3557 = vmatprep.subr.bf16.mxu0 %v7469_v50  ;;  %v7508_v50 = vld [vmem:[%s10206_s13 + $0x22c] ss:$16 sps:$4 sm:$0xff]  }
 0x389   : > { %3701 = vmatpush1.bf16.msra.mxu1 %v7422_v51  ;;  %v9044_v51 = vpop.permute.xlu0 %2213 }
 0x38a   : > { %3702 = vmatprep.subr.bf16.mxu1 %v7430_v54  ;;  %3558 = vmatpush1.bf16.msra.mxu0 %v7467_v52 }
 0x38b   : > { %3559 = vmatprep.subr.bf16.mxu0 %v7475_v14 }
 0x38d   : > { %3703 = vmatpush1.bf16.msra.mxu1 %v7428_v53 }
 0x38e   : > { %3704 = vmatprep.subr.bf16.mxu1 %v7436_v9  ;;  %3560 = vmatpush1.bf16.msra.mxu0 %v7473_v56  ;;  %v7503_v56 = vld [vmem:[%s10206_s13 + $0x220] ss:$16 sps:$4 sm:$0xff]  }
 0x38f   : > { %3561 = vmatprep.subr.bf16.mxu0 %v7481_v58  ;;  %v7506_v58 = vld [vmem:[%s10206_s13 + $0x228] ss:$16 sps:$4 sm:$0xff]  }
 0x391   : > { %3705 = vmatpush1.bf16.msra.mxu1 %v7434_v38 }
 0x392   : > { %3706 = vmatprep.subr.bf16.mxu1 %v7442_v59  ;;  %3562 = vmatpush1.bf16.msra.mxu0 %v7479_v47  ;;  %v7511_v47 = vld [vmem:[%s10206_s13 + $0x244] ss:$16 sps:$4 sm:$0xff]  }
 0x393   : > { %3563 = vmatprep.subr.bf16.mxu0 %v7487_v21  ;;  %v7514_v21 = vld [vmem:[%s10206_s13 + $0x24c] ss:$16 sps:$4 sm:$0xff]  }
 0x395   : > { %3707 = vmatpush1.bf16.msra.mxu1 %v7440_v40 }
 0x396   : > { %3708 = vmatprep.subr.bf16.mxu1 %v7448_v60  ;;  %3564 = vmatpush1.bf16.msra.mxu0 %v7485_v24 }
 0x397   : > { %3565 = vmatprep.subr.bf16.mxu0 %v7493_v61 }
 0x399   : > { %3709 = vmatpush1.bf16.msra.mxu1 %v7446_v36  ;;  %v7509_v36 = vld [vmem:[%s10206_s13 + $0x240] ss:$16 sps:$4 sm:$0xff]  }
 0x39a   : > { %3710 = vmatprep.subr.bf16.mxu1 %v7454_v62  ;;  %3566 = vmatpush1.bf16.msra.mxu0 %v7491_v1  ;;  %v7512_v62 = vld [vmem:[%s10206_s13 + $0x248] ss:$16 sps:$4 sm:$0xff]   ;;  %v7517_v1 = vld [vmem:[%s10206_s13 + $0x264] ss:$16 sps:$4 sm:$0xff]  }
 0x39b   : > { %3588 = vmatprep.subr.bf16.mxu0 %v7499_v49  ;;  %v7520_v49 = vld [vmem:[%s10206_s13 + $0x26c] ss:$16 sps:$4 sm:$0xff]  }
 0x39d   : > { %3711 = vmatpush1.bf16.msra.mxu1 %v7452_v2  ;;  %v7515_v2 = vld [vmem:[%s10206_s13 + $0x260] ss:$16 sps:$4 sm:$0xff]  }
 0x39e   : > { %3712 = vmatprep.subr.bf16.mxu1 %v7460_v3  ;;  %v7518_v3 = vld [vmem:[%s10206_s13 + $0x268] ss:$16 sps:$4 sm:$0xff]  }
 0x3a1   : > { %3713 = vmatpush1.bf16.msra.mxu1 %v7458_v4  ;;  %v7523_v4 = vld [vmem:[%s10206_s13 + $0x284] ss:$16 sps:$4 sm:$0xff]  }
 0x3a2   : > { %3714 = vmatprep.subr.bf16.mxu1 %v7466_v11  ;;  %v7526_v11 = vld [vmem:[%s10206_s13 + $0x28c] ss:$16 sps:$4 sm:$0xff]  }
 0x3a5   : > { %3715 = vmatpush1.bf16.msra.mxu1 %v7464_v32  ;;  %v7521_v32 = vld [vmem:[%s10206_s13 + $0x280] ss:$16 sps:$4 sm:$0xff]  }
 0x3a6   : > { %3716 = vmatprep.subr.bf16.mxu1 %v7472_v30  ;;  %v7524_v30 = vld [vmem:[%s10206_s13 + $0x288] ss:$16 sps:$4 sm:$0xff]  }
 0x3a9   : > { %3717 = vmatpush1.bf16.msra.mxu1 %v7470_v6  ;;  %v7529_v6 = vld [vmem:[%s10206_s13 + $0x2a4] ss:$16 sps:$4 sm:$0xff]  }
 0x3aa   : > { %3718 = vmatprep.subr.bf16.mxu1 %v7478_v7  ;;  %v7532_v7 = vld [vmem:[%s10206_s13 + $0x2ac] ss:$16 sps:$4 sm:$0xff]  }
 0x3ad   : > { %3719 = vmatpush1.bf16.msra.mxu1 %v7476_v5  ;;  %v7527_v5 = vld [vmem:[%s10206_s13 + $0x2a0] ss:$16 sps:$4 sm:$0xff]  }
 0x3ae   : > { %3720 = vmatprep.subr.bf16.mxu1 %v7484_v8  ;;  %v7530_v8 = vld [vmem:[%s10206_s13 + $0x2a8] ss:$16 sps:$4 sm:$0xff]  }
 0x3b1   : > { %3721 = vmatpush1.bf16.msra.mxu1 %v7482_v39  ;;  %v7535_v39 = vld [vmem:[%s10206_s13 + $0x2c4] ss:$16 sps:$4 sm:$0xff]  }
 0x3b2   : > { %3722 = vmatprep.subr.bf16.mxu1 %v7490_v57  ;;  %v7538_v57 = vld [vmem:[%s10206_s13 + $0x2cc] ss:$16 sps:$4 sm:$0xff]  }
 0x3b5   : > { %3723 = vmatpush1.bf16.msra.mxu1 %v7488_v55  ;;  %v7533_v55 = vld [vmem:[%s10206_s13 + $0x2c0] ss:$16 sps:$4 sm:$0xff]  }
 0x3b6   : > { %3724 = vmatprep.subr.bf16.mxu1 %v7496_v12  ;;  %v7536_v12 = vld [vmem:[%s10206_s13 + $0x2c8] ss:$16 sps:$4 sm:$0xff]  }
 0x3b9   : > { %3725 = vmatpush1.bf16.msra.mxu1 %v7494_v17  ;;  %v7541_v17 = vld [vmem:[%s10206_s13 + $0x2e4] ss:$16 sps:$4 sm:$0xff]  }
 0x3ba   : > { %3747 = vmatprep.subr.bf16.mxu1 %v7502_v18  ;;  %v7544_v18 = vld [vmem:[%s10206_s13 + $0x2ec] ss:$16 sps:$4 sm:$0xff]  }
 0x3ef   : > { %v2340_v23 = vpop.f32.mrb[8].mxu1 }
 0x3f0   : > { %v7206_v20 = vadd.f32 %v2340_v23, %v9021_v19  ;;  %v2342_v0 = vpop.f32.mrb[9].mxu1  ;;  %v7539_v23 = vld [vmem:[%s10206_s13 + $0x2e0] ss:$16 sps:$4 sm:$0xff]  }
 0x3f1   : > { %v7207_v27 = vadd.f32 %v2342_v0, %v9021_v19  ;;  %v2344_v28 = vpop.f32.mrb[10].mxu1  ;;  %v7547_v0 = vld [vmem:[%s10206_s13 + $0x304] ss:$16 sps:$4 sm:$0xff]  }
 0x3f2   : > { %v7208_v13 = vadd.f32 %v2344_v28, %v9024_v22  ;;  %v2346_v10 = vpop.f32.mrb[11].mxu1  ;;  %v2563_v34 = vmax.f32 %v7206_v20, 0.0  ;;  %v7542_v20 = vld [vmem:[%s10206_s13 + $0x2e8] ss:$16 sps:$4 sm:$0xff]   ;;  %v7545_v28 = vld [vmem:[%s10206_s13 + $0x300] ss:$16 sps:$4 sm:$0xff]  }
 0x3f3   : > { %v7209_v63 = vadd.f32 %v2346_v10, %v9024_v22  ;;  %v2564_v31 = vmax.f32 %v7207_v27, 0.0  ;;  %v7550_v27 = vld [vmem:[%s10206_s13 + $0x30c] ss:$16 sps:$4 sm:$0xff]   ;;  %v7553_v10 = vld [vmem:[%s10206_s13 + $0x324] ss:$16 sps:$4 sm:$0xff]  }
 0x3f4   : > { %v2568_v35 = vmax.f32 %v7208_v13, 0.0  ;;  %v7548_v13 = vld [vmem:[%s10206_s13 + $0x308] ss:$16 sps:$4 sm:$0xff]  }
 0x3f5   : > { %v2569_v16 = vmax.f32 %v7209_v63, 0.0  ;;  %v7556_v63 = vld [vmem:[%s10206_s13 + $0x32c] ss:$16 sps:$4 sm:$0xff]  }
 0x3f6   : > { %v2583_v44 = vpack.c.bf16 %v2568_v35, %v2563_v34  ;;  %v7551_v34 = vld [vmem:[%s10206_s13 + $0x320] ss:$16 sps:$4 sm:$0xff]   ;;  %v7554_v35 = vld [vmem:[%s10206_s13 + $0x328] ss:$16 sps:$4 sm:$0xff]  }
 0x3f7   : > { %v2584_v29 = vpack.c.bf16 %v2569_v16, %v2564_v31  ;;  %v2350_v15 = vpop.f32.mrb[12].mxu1  ;;  %v7559_v31 = vld [vmem:[%s10206_s13 + $0x344] ss:$16 sps:$4 sm:$0xff]   ;;  %v7562_v16 = vld [vmem:[%s10206_s13 + $0x34c] ss:$16 sps:$4 sm:$0xff]  }
 0x3f8   : > { %v7210_v48 = vadd.f32 %v2350_v15, %v9029_v37  ;;  %v2352_v45 = vpop.f32.mrb[13].mxu1  ;;  %v7565_v15 = vld [vmem:[%s10206_s13 + $0x364] ss:$16 sps:$4 sm:$0xff]  }
 0x3f9   : > { %v7211_v54 = vadd.f32 %v2352_v45, %v9029_v37  ;;  %v2354_v52 = vpop.f32.mrb[14].mxu1  ;;  %3567 = vmatprep.mubr.bf16.mxu0 %v2584_v29  ;;  %3726 = vmatprep.mubr.bf16.mxu1 %v2584_v29  ;;  %v7560_v29 = vld [vmem:[%s10206_s13 + $0x348] ss:$16 sps:$4 sm:$0xff]   ;;  %v7571_v45 = vld [vmem:[%s10206_s13 + $0x384] ss:$16 sps:$4 sm:$0xff]  }
 0x3fa   : > { %v7212_v14 = vadd.f32 %v2354_v52, %v9044_v51  ;;  %v2356_v53 = vpop.f32.mrb[15].mxu1  ;;  %3568 = vmatmul.mubr.bf16.vlgmr.msra.gmra.mrb[24].mxu0 %v2583_v44  ;;  %3727 = vmatmul.mubr.bf16.vlgmr.msra.gmra.mrb[28].mxu1 %v2583_v44  ;;  %v2573_v38 = vmax.f32 %v7210_v48, 0.0  ;;  %v7557_v44 = vld [vmem:[%s10206_s13 + $0x340] ss:$16 sps:$4 sm:$0xff]   ;;  %v7566_v48 = vld [vmem:[%s10206_s13 + $0x368] ss:$16 sps:$4 sm:$0xff]  }
 0x3fb   : > { %v7213_v9 = vadd.f32 %v2356_v53, %v9044_v51  ;;  %3589 = vmatpush1.bf16.msra.mxu0 %v7497_v46  ;;  %3748 = vmatpush1.bf16.msra.mxu1 %v7500_v26  ;;  %v2574_v40 = vmax.f32 %v7211_v54, 0.0  ;;  %v7568_v46 = vld [vmem:[%s10206_s13 + $0x36c] ss:$16 sps:$4 sm:$0xff]   ;;  %v7563_v26 = vld [vmem:[%s10206_s13 + $0x360] ss:$16 sps:$4 sm:$0xff]  }
 0x3fc   : > { %v2578_v59 = vmax.f32 %v7212_v14, 0.0  ;;  %3590 = vmatprep.subr.bf16.mxu0 %v7505_v33  ;;  %3749 = vmatprep.subr.bf16.mxu1 %v7508_v50  ;;  %v7574_v33 = vld [vmem:[%s10206_s13 + $0x38c] ss:$16 sps:$4 sm:$0xff]   ;;  %v7569_v50 = vld [vmem:[%s10206_s13 + $0x380] ss:$16 sps:$4 sm:$0xff]  }
 0x3fd   : > { %v2579_v60 = vmax.f32 %v7213_v9, 0.0  ;;  %v7572_v54 = vld [vmem:[%s10206_s13 + $0x388] ss:$16 sps:$4 sm:$0xff]   ;;  %v7577_v52 = vld [vmem:[%s10206_s13 + $0x3a4] ss:$16 sps:$4 sm:$0xff]  }
 0x3fe   : > { %v2588_v24 = vpack.c.bf16 %v2578_v59, %v2573_v38  ;;  %v7580_v14 = vld [vmem:[%s10206_s13 + $0x3ac] ss:$16 sps:$4 sm:$0xff]   ;;  %v7575_v53 = vld [vmem:[%s10206_s13 + $0x3a0] ss:$16 sps:$4 sm:$0xff]   ;;  %v7578_v9 = vld [vmem:[%s10206_s13 + $0x3a8] ss:$16 sps:$4 sm:$0xff]  }
 0x3ff   : > { %v2589_v61 = vpack.c.bf16 %v2579_v60, %v2574_v40  ;;  %3591 = vmatpush1.bf16.msra.mxu0 %v7503_v56  ;;  %3750 = vmatpush1.bf16.msra.mxu1 %v7506_v58  ;;  %v7583_v56 = vld [vmem:[%s10206_s13 + $0x3c4] ss:$16 sps:$4 sm:$0xff]   ;;  %v7586_v58 = vld [vmem:[%s10206_s13 + $0x3cc] ss:$16 sps:$4 sm:$0xff]   ;;  %v7581_v59 = vld [vmem:[%s10206_s13 + $0x3c0] ss:$16 sps:$4 sm:$0xff]  }
 0x400   : > { %3592 = vmatprep.subr.bf16.mxu0 %v7511_v47  ;;  %3751 = vmatprep.subr.bf16.mxu1 %v7514_v21  ;;  %v7584_v47 = vld [vmem:[%s10206_s13 + $0x3c8] ss:$16 sps:$4 sm:$0xff]   ;;  %v7589_v60 = vld [vmem:[%s10206_s13 + $0x3e4] ss:$16 sps:$4 sm:$0xff]  }
 0x401   : > { %3577 = vmatprep.mubr.bf16.mxu0 %v2589_v61  ;;  %3736 = vmatprep.mubr.bf16.mxu1 %v2589_v61 }
 0x402   : > { %3578 = vmatmul.mubr.bf16.gmra.mrb[28].mxu0 %v2588_v24  ;;  %3737 = vmatmul.mubr.bf16.gmra.mrb[32].mxu1 %v2588_v24  ;;  %v7592_v24 = vld [vmem:[%s10206_s13 + $0x3ec] ss:$16 sps:$4 sm:$0xff]  }
 0x403   : > { %3593 = vmatpush1.bf16.msra.mxu0 %v7509_v36  ;;  %3752 = vmatpush1.bf16.msra.mxu1 %v7512_v62 }
 0x404   : > { %3594 = vmatprep.subr.bf16.mxu0 %v7517_v1  ;;  %3753 = vmatprep.subr.bf16.mxu1 %v7520_v49 }
 0x407   : > { %3595 = vmatpush1.bf16.msra.mxu0 %v7515_v2  ;;  %3754 = vmatpush1.bf16.msra.mxu1 %v7518_v3  ;;  %v7587_v2 = vld [vmem:[%s10206_s13 + $0x3e0] ss:$16 sps:$4 sm:$0xff]   ;;  %v7590_v3 = vld [vmem:[%s10206_s13 + $0x3e8] ss:$16 sps:$4 sm:$0xff]  }
 0x408   : > { %3596 = vmatprep.subr.bf16.mxu0 %v7523_v4  ;;  %3755 = vmatprep.subr.bf16.mxu1 %v7526_v11 }
 0x40b   : > { %3597 = vmatpush1.bf16.msra.mxu0 %v7521_v32  ;;  %3756 = vmatpush1.bf16.msra.mxu1 %v7524_v30  ;;  %v7595_v32 = vld [vmem:[%s10206_s13 + $0x404] ss:$16 sps:$4 sm:$0xff]   ;;  %v7598_v30 = vld [vmem:[%s10206_s13 + $0x40c] ss:$16 sps:$4 sm:$0xff]  }
 0x40c   : > { %3598 = vmatprep.subr.bf16.mxu0 %v7529_v6  ;;  %3757 = vmatprep.subr.bf16.mxu1 %v7532_v7 }
 0x40f   : > { %3599 = vmatpush1.bf16.msra.mxu0 %v7527_v5  ;;  %3758 = vmatpush1.bf16.msra.mxu1 %v7530_v8 }
 0x410   : > { %3600 = vmatprep.subr.bf16.mxu0 %v7535_v39  ;;  %3759 = vmatprep.subr.bf16.mxu1 %v7538_v57  ;;  %v7593_v57 = vld [vmem:[%s10206_s13 + $0x400] ss:$16 sps:$4 sm:$0xff]  }
 0x413   : > { %3601 = vmatpush1.bf16.msra.mxu0 %v7533_v55  ;;  %3760 = vmatpush1.bf16.msra.mxu1 %v7536_v12  ;;  %v7596_v55 = vld [vmem:[%s10206_s13 + $0x408] ss:$16 sps:$4 sm:$0xff]  }
 0x414   : > { %3602 = vmatprep.subr.bf16.mxu0 %v7541_v17  ;;  %3761 = vmatprep.subr.bf16.mxu1 %v7544_v18  ;;  %v7601_v18 = vld [vmem:[%s10206_s13 + $0x424] ss:$16 sps:$4 sm:$0xff]  }
 0x417   : > { %3603 = vmatpush1.bf16.msra.mxu0 %v7539_v23  ;;  %3762 = vmatpush1.bf16.msra.mxu1 %v7542_v20  ;;  %v7604_v23 = vld [vmem:[%s10206_s13 + $0x42c] ss:$16 sps:$4 sm:$0xff]  }
 0x418   : > { %3604 = vmatprep.subr.bf16.mxu0 %v7547_v0  ;;  %3763 = vmatprep.subr.bf16.mxu1 %v7550_v27 }
 0x41b   : > { %3605 = vmatpush1.bf16.msra.mxu0 %v7545_v28  ;;  %3764 = vmatpush1.bf16.msra.mxu1 %v7548_v13 }
 0x41c   : > { %3606 = vmatprep.subr.bf16.mxu0 %v7553_v10  ;;  %3765 = vmatprep.subr.bf16.mxu1 %v7556_v63  ;;  %v7599_v10 = vld [vmem:[%s10206_s13 + $0x420] ss:$16 sps:$4 sm:$0xff]   ;;  %v7602_v63 = vld [vmem:[%s10206_s13 + $0x428] ss:$16 sps:$4 sm:$0xff]  }
 0x41f   : > { %3607 = vmatpush1.bf16.msra.mxu0 %v7551_v34  ;;  %3766 = vmatpush1.bf16.msra.mxu1 %v7554_v35 }
 0x420   : > { %3608 = vmatprep.subr.bf16.mxu0 %v7559_v31  ;;  %3767 = vmatprep.subr.bf16.mxu1 %v7562_v16  ;;  %v7607_v31 = vld [vmem:[%s10206_s13 + $0x444] ss:$16 sps:$4 sm:$0xff]   ;;  %v7610_v16 = vld [vmem:[%s10206_s13 + $0x44c] ss:$16 sps:$4 sm:$0xff]  }
 0x423   : > { %3609 = vmatpush1.bf16.msra.mxu0 %v7557_v44  ;;  %3768 = vmatpush1.bf16.msra.mxu1 %v7560_v29 }
 0x424   : > { %3610 = vmatprep.subr.bf16.mxu0 %v7565_v15  ;;  %3769 = vmatprep.subr.bf16.mxu1 %v7568_v46 }
 0x427   : > { %3611 = vmatpush1.bf16.msra.mxu0 %v7563_v26  ;;  %3770 = vmatpush1.bf16.msra.mxu1 %v7566_v48  ;;  %v7605_v48 = vld [vmem:[%s10206_s13 + $0x440] ss:$16 sps:$4 sm:$0xff]  }
 0x428   : > { %3612 = vmatprep.subr.bf16.mxu0 %v7571_v45  ;;  %3771 = vmatprep.subr.bf16.mxu1 %v7574_v33  ;;  %v7608_v45 = vld [vmem:[%s10206_s13 + $0x448] ss:$16 sps:$4 sm:$0xff]  }
 0x42b   : > { %3613 = vmatpush1.bf16.msra.mxu0 %v7569_v50  ;;  %3772 = vmatpush1.bf16.msra.mxu1 %v7572_v54  ;;  %v7613_v50 = vld [vmem:[%s10206_s13 + $0x464] ss:$16 sps:$4 sm:$0xff]   ;;  %v7616_v54 = vld [vmem:[%s10206_s13 + $0x46c] ss:$16 sps:$4 sm:$0xff]  }
 0x42c   : > { %3614 = vmatprep.subr.bf16.mxu0 %v7577_v52  ;;  %3773 = vmatprep.subr.bf16.mxu1 %v7580_v14 }
 0x42f   : > { %3615 = vmatpush1.bf16.msra.mxu0 %v7575_v53  ;;  %3774 = vmatpush1.bf16.msra.mxu1 %v7578_v9  ;;  %v2446_v38 = vpop.f32.mrb[16].mxu0 }
 0x430   : > { %v7214_v21 = vadd.f32 %v2446_v38, %v9021_v19  ;;  %v2448_v40 = vpop.f32.mrb[17].mxu0  ;;  %3616 = vmatprep.subr.bf16.mxu0 %v7583_v56  ;;  %3775 = vmatprep.subr.bf16.mxu1 %v7586_v58  ;;  %v7611_v56 = vld [vmem:[%s10206_s13 + $0x460] ss:$16 sps:$4 sm:$0xff]   ;;  %v7614_v58 = vld [vmem:[%s10206_s13 + $0x468] ss:$16 sps:$4 sm:$0xff]  }
 0x431   : > { %v7215_v61 = vadd.f32 %v2448_v40, %v9021_v19  ;;  %v2450_v36 = vpop.f32.mrb[18].mxu0  ;;  %v7619_v38 = vld [vmem:[%s10206_s13 + $0x484] ss:$16 sps:$4 sm:$0xff]   ;;  %v7617_v40 = vld [vmem:[%s10206_s13 + $0x480] ss:$16 sps:$4 sm:$0xff]  }
 0x432   : > { %v7216_v62 = vadd.f32 %v2450_v36, %v9024_v22  ;;  %v2452_v1 = vpop.f32.mrb[19].mxu0  ;;  %v2565_v4 = vmax.f32 %v7214_v21, 0.0  ;;  %v7628_v36 = vld [vmem:[%s10206_s13 + $0x4ac] ss:$16 sps:$4 sm:$0xff]  }
 0x433   : > { %v7217_v49 = vadd.f32 %v2452_v1, %v9024_v22  ;;  %3617 = vmatpush1.bf16.msra.mxu0 %v7581_v59  ;;  %3776 = vmatpush1.bf16.msra.mxu1 %v7584_v47  ;;  %v2566_v6 = vmax.f32 %v7215_v61, 0.0  ;;  %v7622_v59 = vld [vmem:[%s10206_s13 + $0x48c] ss:$16 sps:$4 sm:$0xff]   ;;  %v9285_v47 = vld [vmem:[#allocation2 + $0x40] sm:$0xff] }
 0x434   : > { %v2570_v11 = vmax.f32 %v7216_v62, 0.0  ;;  %3618 = vmatprep.subr.bf16.mxu0 %v7589_v60  ;;  %3777 = vmatprep.subr.bf16.mxu1 %v7592_v24  ;;  %v7620_v60 = vld [vmem:[%s10206_s13 + $0x488] ss:$16 sps:$4 sm:$0xff]   ;;  %v7625_v61 = vld [vmem:[%s10206_s13 + $0x4a4] ss:$16 sps:$4 sm:$0xff]  }
 0x435   : > { %v2571_v7 = vmax.f32 %v7217_v49, 0.0 }
 0x436   : > { %v2585_v5 = vpack.c.bf16 %v2570_v11, %v2565_v4  ;;  %v7626_v4 = vld [vmem:[%s10206_s13 + $0x4a8] ss:$16 sps:$4 sm:$0xff]   ;;  %v7631_v11 = vld [vmem:[%s10206_s13 + $0x4c4] ss:$16 sps:$4 sm:$0xff]  }
 0x437   : > { %v2586_v8 = vpack.c.bf16 %v2571_v7, %v2566_v6  ;;  %3619 = vmatpush1.bf16.msra.mxu0 %v7587_v2  ;;  %3778 = vmatpush1.bf16.msra.mxu1 %v7590_v3  ;;  %v2456_v39 = vpop.f32.mrb[20].mxu0  ;;  %v7623_v3 = vld [vmem:[%s10206_s13 + $0x4a0] ss:$16 sps:$4 sm:$0xff]  }
 0x438   : > { %v7218_v12 = vadd.f32 %v2456_v39, %v9029_v37  ;;  %v2458_v17 = vpop.f32.mrb[21].mxu0  ;;  %3641 = vmatprep.subr.bf16.mxu0 %v7595_v32  ;;  %3800 = vmatprep.subr.bf16.mxu1 %v7598_v30  ;;  %v7634_v32 = vld [vmem:[%s10206_s13 + $0x4cc] ss:$16 sps:$4 sm:$0xff]  }
 0x439   : > { %v7219_v20 = vadd.f32 %v2458_v17, %v9029_v37  ;;  %v2460_v0 = vpop.f32.mrb[22].mxu0  ;;  %3620 = vmatprep.mubr.bf16.mxu0 %v2586_v8  ;;  %3779 = vmatprep.mubr.bf16.mxu1 %v2586_v8  ;;  %v7632_v8 = vld [vmem:[%s10206_s13 + $0x4c8] ss:$16 sps:$4 sm:$0xff]  }
 0x43a   : > { %v7220_v27 = vadd.f32 %v2460_v0, %v9044_v51  ;;  %v2462_v28 = vpop.f32.mrb[23].mxu0  ;;  %3621 = vmatmul.mubr.bf16.vlgmr.msra.gmra.mrb[24].mxu0 %v2585_v5  ;;  %3780 = vmatmul.mubr.bf16.vlgmr.msra.gmra.mrb[28].mxu1 %v2585_v5  ;;  %v2575_v34 = vmax.f32 %v7218_v12, 0.0  ;;  %v7629_v5 = vld [vmem:[%s10206_s13 + $0x4c0] ss:$16 sps:$4 sm:$0xff]  }
 0x43b   : > { %v7221_v13 = vadd.f32 %v2462_v28, %v9044_v51  ;;  %3642 = vmatpush1.bf16.msra.mxu0 %v7593_v57  ;;  %3801 = vmatpush1.bf16.msra.mxu1 %v7596_v55  ;;  %v2576_v44 = vmax.f32 %v7219_v20, 0.0 }
 0x43c   : > { %v2580_v35 = vmax.f32 %v7220_v27, 0.0  ;;  %3643 = vmatprep.subr.bf16.mxu0 %v7601_v18  ;;  %3802 = vmatprep.subr.bf16.mxu1 %v7604_v23 }
 0x43d   : > { %v2581_v29 = vmax.f32 %v7221_v13, 0.0 }
 0x43e   : > { %v2590_v15 = vpack.c.bf16 %v2580_v35, %v2575_v34 }
 0x43f   : > { %v2591_v46 = vpack.c.bf16 %v2581_v29, %v2576_v44  ;;  %v7110_v26 = vpop.f32.mrb[16].mxu1  ;;  %3644 = vmatpush1.bf16.msra.mxu0 %v7599_v10  ;;  %3803 = vmatpush1.bf16.msra.mxu1 %v7602_v63 }
 0x440   : > { %v7111_v33 = vpop.f32.mrb[17].mxu1  ;;  %3645 = vmatprep.subr.bf16.mxu0 %v7607_v31  ;;  %3804 = vmatprep.subr.bf16.mxu1 %v7610_v16 }
 0x441   : > { %v7112_v52 = vadd.f32 %v7111_v33, %v7110_v26  ;;  %v7113_v14 = vpop.f32.mrb[18].mxu1  ;;  %3630 = vmatprep.mubr.bf16.mxu0 %v2591_v46  ;;  %3789 = vmatprep.mubr.bf16.mxu1 %v2591_v46 }
 0x442   : > { %v7114_v53 = vpop.f32.mrb[19].mxu1  ;;  %3631 = vmatmul.mubr.bf16.gmra.mrb[28].mxu0 %v2590_v15  ;;  %3790 = vmatmul.mubr.bf16.gmra.mrb[32].mxu1 %v2590_v15 }
 0x443   : > { %v7115_v9 = vadd.f32 %v7114_v53, %v7113_v14  ;;  %3646 = vmatpush1.bf16.msra.mxu0 %v7605_v48  ;;  %3805 = vmatpush1.bf16.msra.mxu1 %v7608_v45  ;;  %v2500_v7 = vadd.f32 %v7112_v52, %v9021_v19 }
 0x444   : > { %3647 = vmatprep.subr.bf16.mxu0 %v7613_v50  ;;  %3806 = vmatprep.subr.bf16.mxu1 %v7616_v54 }
 0x445   : > { %3673 = vmatprep.mubr.bf16.mxu0 %v9285_v47  ;;  %3832 = vmatprep.mubr.bf16.mxu1 %v9285_v47  ;;  %v2503_v19 = vadd.f32 %v7115_v9, %v9024_v22 }
 0x447   : > { %v7116_v21 = vpop.f32.mrb[20].mxu1  ;;  %3648 = vmatpush1.bf16.msra.mxu0 %v7611_v56  ;;  %3807 = vmatpush1.bf16.msra.mxu1 %v7614_v58 }
 0x448   : > { %v7117_v24 = vpop.f32.mrb[21].mxu1  ;;  %3649 = vmatprep.subr.bf16.mxu0 %v7619_v38  ;;  %3808 = vmatprep.subr.bf16.mxu1 %v7622_v59 }
 0x449   : > { %v7118_v62 = vadd.f32 %v7117_v24, %v7116_v21  ;;  %v7119_v1 = vpop.f32.mrb[22].mxu1  ;;  %v7637_v21 = vld [vmem:[%s10196_s3 + $0x4] ss:$12 sps:$4 sm:$0xff]   ;;  %v4298_v24 = vld [vmem:[%s10202_s9 + $0x8] sm:$0xff] }
 0x44a   : > { %v7120_v49 = vpop.f32.mrb[23].mxu1 }
 0x44b   : > { %v7121_v2 = vadd.f32 %v7120_v49, %v7119_v1  ;;  %3650 = vmatpush1.bf16.msra.mxu0 %v7617_v40  ;;  %3809 = vmatpush1.bf16.msra.mxu1 %v7620_v60  ;;  %v2508_v30 = vadd.f32 %v7118_v62, %v9029_v37  ;;  %v4297_v60 = vld [vmem:[%s10202_s9] sm:$0xff] }
 0x44c   : > { %3651 = vmatprep.subr.bf16.mxu0 %v7625_v61  ;;  %3810 = vmatprep.subr.bf16.mxu1 %v7628_v36 }
 0x44d   : > { %v2511_v55 = vadd.f32 %v7121_v2, %v9044_v51 }
 0x44f   : > { %v7182_v6 = vpop.f32.mrb[24].mxu1  ;;  %3652 = vmatpush1.bf16.msra.mxu0 %v7623_v3  ;;  %3811 = vmatpush1.bf16.msra.mxu1 %v7626_v4 }
 0x450   : > { %v2557_v39 = vadd.f32 %v7182_v6, %v2508_v30  ;;  %v2548_v57 = vpop.f32.mrb[25].mxu1  ;;  %3653 = vmatprep.subr.bf16.mxu0 %v7631_v11  ;;  %3812 = vmatprep.subr.bf16.mxu1 %v7634_v32 }
 0x451   : > { %v2549_v37 = vadd.f32 %v2548_v57, %v2500_v7  ;;  %v7183_v12 = vpop.f32.mrb[26].mxu1 }
 0x452   : > { %v2560_v17 = vadd.f32 %v7183_v12, %v2511_v55  ;;  %v2551_v18 = vpop.f32.mrb[27].mxu1  ;;  %v2577_v20 = vmax.f32 %v2557_v39, 0.0 }
 0x453   : > { %v2552_v23 = vadd.f32 %v2551_v18, %v2503_v19  ;;  %3654 = vmatpush1.bf16.msra.mxu0 %v7629_v5  ;;  %3813 = vmatpush1.bf16.msra.mxu1 %v7632_v8  ;;  %v2567_v27 = vmax.f32 %v2549_v37, 0.0 }
 0x454   : > { %v2582_v0 = vmax.f32 %v2560_v17, 0.0 }
 0x455   : > { %v2572_v28 = vmax.f32 %v2552_v23, 0.0 }
 0x456   : > { %v2592_v13 = vpack.c.bf16 %v2582_v0, %v2577_v20 }
 0x457   : > { %v2587_v10 = vpack.c.bf16 %v2572_v28, %v2567_v27 }
 0x459   : > { %6972 = vmatmul.mubr.msk.bf16.vlgmr.msra.gmra.mrb[24].mxu0 %vm1483_vm13, %v2587_v10  ;;  %6974 = vmatmul.mubr.msk.bf16.vlgmr.msra.gmra.mrb[28].mxu1 %vm1483_vm13, %v2587_v10 }
 0x45a   : > { %3683 = vmatprep.mubr.bf16.mxu0 %v9285_v47  ;;  %3842 = vmatprep.mubr.bf16.mxu1 %v9285_v47 }
 0x461   : > { %6973 = vmatmul.mubr.msk.bf16.gmra.mrb[28].mxu0 %vm1483_vm13, %v2592_v13  ;;  %6975 = vmatmul.mubr.msk.bf16.gmra.mrb[32].mxu1 %vm1483_vm13, %v2592_v13  ;;  %vm4069_vm13 = vcmask 850944  }
 0x462   : > { %4359 = vmatprep.mubr.bf16.mxu0 %v7637_v21  ;;  %4445 = vmatprep.mubr.bf16.mxu1 %v7637_v21 }
 0x52c   : > { %v3675_v22 = vpop.f32.mrb[24].mxu0  ;;  %v3834_v51 = vpop.f32.mrb[28].mxu1 }
 0x52d   : > { %v3677_v63 = vpop.f32.mrb[25].mxu0  ;;  %v3836_v34 = vpop.f32.mrb[29].mxu1 }
 0x52e   : > { %v3679_v35 = vpop.f32.mrb[26].mxu0  ;;  %v3838_v31 = vpop.f32.mrb[30].mxu1 }
 0x52f   : > { %v9329_v16 = vpack.c.bf16 %v3679_v35, %v3675_v22  ;;  %v9331_v44 = vpack.c.bf16 %v3838_v31, %v3834_v51  ;;  %v3681_v29 = vpop.f32.mrb[27].mxu0  ;;  %v3840_v15 = vpop.f32.mrb[31].mxu1 }
 0x530   : > { %v9333_v46 = vpack.c.bf16 %v3681_v29, %v3677_v63  ;;  %v3856_v26 = vpack.c.bf16 %v3840_v15, %v3836_v34 }
 0x531   : > { %3863 = vst [vmem:[#allocation3 + $0x10] sm:$0xff] %v9331_v44  ;;  %3899 = vrot.lane.b32.xlu0 %v9331_v44, %s10259_s29  ;;  %3895 = vrot.lane.b32.xlu1 %v9329_v16, %s10259_s29  ;;  %3879 = vst.msk [vmem:[#allocation4 + $0x10] sm:$0xff] %vm3878_vm8, %v9331_v44 }
 0x532   : > { %3865 = vst.msk [vmem:[#allocation3 + $0x18] sm:$0xff] %vm3864_vm9, %v3856_v26  ;;  %4327 = vmatprep.subr.bf16.mxu0 %v9333_v46 }
 0x533   : > { %4328 = vmatpush1.bf16.msra.mxu0 %v9329_v16 }
 0x534   : > { %v3685_v48 = vpop.f32.mrb[28].mxu0  ;;  %v3844_v45 = vpop.f32.mrb[32].mxu1 }
 0x535   : > { %v3687_v33 = vpop.f32.mrb[29].mxu0  ;;  %v3846_v50 = vpop.f32.mrb[33].mxu1  ;;  %3939 = vrot.lane.b32.xlu0 %v9331_v44, %s10260_s23  ;;  %3935 = vrot.lane.b32.xlu1 %v9329_v16, %s10260_s23 }
 0x536   : > { %v3689_v54 = vpop.f32.mrb[30].mxu0  ;;  %v3848_v52 = vpop.f32.mrb[34].mxu1 }
 0x537   : > { %v9349_v14 = vpack.c.bf16 %v3689_v54, %v3685_v48  ;;  %v9351_v53 = vpack.c.bf16 %v3848_v52, %v3844_v45  ;;  %v3691_v9 = vpop.f32.mrb[31].mxu0  ;;  %v3850_v56 = vpop.f32.mrb[35].mxu1 }
 0x538   : > { %v3858_v58 = vpack.c.bf16 %v3691_v9, %v3687_v33  ;;  %v3860_v38 = vpack.c.bf16 %v3850_v56, %v3846_v50  ;;  %v4245_v39 = vld [vmem:[#allocation4 + $0x10] sm:$0xff] }
 0x539   : > { %3979 = vrot.lane.b32.xlu0 %v9331_v44, %s10231_s30  ;;  %3975 = vrot.lane.b32.xlu1 %v9329_v16, %s10231_s30  ;;  %3882 = vst.msk [vmem:[#allocation4 + $0x38] sm:$0xff] %vm3878_vm8, %v9351_v53  ;;  %v4089_v59 = vld [vmem:[#allocation3 + $0x18] sm:$0xff] }
 0x53a   : > { %3869 = vst.msk [vmem:[#allocation3 + $0x38] sm:$0xff] %vm3864_vm9, %v3860_v38  ;;  %4329 = vmatprep.subr.bf16.mxu0 %v3858_v58 }
 0x53b   : > { %4330 = vmatpush1.bf16.msra.mxu0 %v9349_v14 }
 0x53d   : > { %4020 = vrot.lane.b32.xlu0 %v9331_v44, %s7843_s17  ;;  %4016 = vrot.lane.b32.xlu1 %v9329_v16, %s7843_s17 }
 0x541   : > { %4061 = vrot.lane.b32.xlu0 %v9331_v44, %s7844_s20  ;;  %4057 = vrot.lane.b32.xlu1 %v9329_v16, %s7844_s20  ;;  %v4093_v40 = vld [vmem:[#allocation3 + $0x38] sm:$0xff] }
 0x545   : > { %3897 = vrot.lane.b32.xlu1 %v9333_v46, %s10259_s29  ;;  %3901 = vrot.lane.b32.xlu0 %v9349_v14, %s10259_s29 }
 0x549   : > { %3937 = vrot.lane.b32.xlu1 %v9333_v46, %s10260_s23  ;;  %3941 = vrot.lane.b32.xlu0 %v9349_v14, %s10260_s23 }
 0x54d   : > { %3977 = vrot.lane.b32.xlu1 %v9333_v46, %s10231_s30  ;;  %3981 = vrot.lane.b32.xlu0 %v9349_v14, %s10231_s30 }
 0x551   : > { %4018 = vrot.lane.b32.xlu1 %v9333_v46, %s7843_s17  ;;  %4022 = vrot.lane.b32.xlu0 %v9349_v14, %s7843_s17 }
 0x555   : > { %4059 = vrot.lane.b32.xlu1 %v9333_v46, %s7844_s20  ;;  %4063 = vrot.lane.b32.xlu0 %v9349_v14, %s7844_s20 }
 0x559   : > { %3905 = vrot.lane.b32.xlu1 %v9351_v53, %s10259_s29  ;;  %3903 = vrot.lane.b32.xlu0 %v3858_v58, %s10259_s29 }
 0x55d   : > { %4104 = vrot.lane.b32.xlu1 %v9333_v46, %s7845_s28  ;;  %4106 = vrot.lane.b32.xlu0 %v9331_v44, %s7845_s28 }
 0x561   : > { %3945 = vrot.lane.b32.xlu1 %v9351_v53, %s10260_s23  ;;  %3943 = vrot.lane.b32.xlu0 %v3858_v58, %s10260_s23 }
 0x565   : > { %3985 = vrot.lane.b32.xlu1 %v9351_v53, %s10231_s30  ;;  %4108 = vrot.lane.b32.xlu0 %v4089_v59, %s7845_s28 }
 0x569   : > { %4026 = vrot.lane.b32.xlu1 %v9351_v53, %s7843_s17  ;;  %3983 = vrot.lane.b32.xlu0 %v3858_v58, %s10231_s30 }
 0x56d   : > { %4067 = vrot.lane.b32.xlu1 %v9351_v53, %s7844_s20  ;;  %4155 = vrot.lane.b32.xlu0 %v9333_v46, %s7846_s19 }
 0x571   : > { %4102 = vrot.lane.b32.xlu1 %v9329_v16, %s7845_s28  ;;  %4024 = vrot.lane.b32.xlu0 %v3858_v58, %s7843_s17 }
 0x575   : > { %4114 = vrot.lane.b32.xlu1 %v9351_v53, %s7845_s28  ;;  %4159 = vrot.lane.b32.xlu0 %v4089_v59, %s7846_s19 }
 0x579   : > { %4110 = vrot.lane.b32.xlu1 %v9349_v14, %s7845_s28  ;;  %4065 = vrot.lane.b32.xlu0 %v3858_v58, %s7844_s20 }
 0x57d   : > { %4157 = vrot.lane.b32.xlu1 %v9331_v44, %s7846_s19  ;;  %4208 = vrot.lane.b32.xlu0 %v9331_v44, %s7847_s26 }
 0x581   : > { %4153 = vrot.lane.b32.xlu1 %v9329_v16, %s7846_s19  ;;  %4112 = vrot.lane.b32.xlu0 %v3858_v58, %s7845_s28 }
 0x585   : > { %4165 = vrot.lane.b32.xlu1 %v9351_v53, %s7846_s19  ;;  %4116 = vrot.lane.b32.xlu0 %v4093_v40, %s7845_s28 }
 0x589   : > { %4161 = vrot.lane.b32.xlu1 %v9349_v14, %s7846_s19  ;;  %4163 = vrot.lane.b32.xlu0 %v3858_v58, %s7846_s19 }
 0x58d   : > { %4206 = vrot.lane.b32.xlu1 %v9333_v46, %s7847_s26  ;;  %4167 = vrot.lane.b32.xlu0 %v4093_v40, %s7846_s19 }
 0x591   : > { %4204 = vrot.lane.b32.xlu1 %v9329_v16, %s7847_s26  ;;  %4210 = vrot.lane.b32.xlu0 %v4089_v59, %s7847_s26 }
 0x595   : > { %4214 = vrot.lane.b32.xlu1 %v3858_v58, %s7847_s26  ;;  %4216 = vrot.lane.b32.xlu0 %v9351_v53, %s7847_s26 }
 0x599   : > { %4212 = vrot.lane.b32.xlu1 %v9349_v14, %s7847_s26  ;;  %4218 = vrot.lane.b32.xlu0 %v4093_v40, %s7847_s26 }
 0x59d   : > { %4301 = vperm.xlu1 %7371, %v4297_v60   ;;  %4306 = vperm.xlu0 %7370, %v4298_v24   ;;  %v4248_v24 = vld [vmem:[#allocation4 + $0x38] sm:$0xff] }
 0x5a3   : > { %v3900_v61 = vpop.permute.xlu0 %3899  ;;  %v3896_v36 = vpop.permute.xlu1 %3895 }
 0x5a4   : > { %3919 = vst.msk [vmem:[#allocation4 + $0x60] sm:$0xff] %vm3878_vm8, %v3900_v61 }
 0x5a7   : > { %v3940_v62 = vpop.permute.xlu0 %3939  ;;  %v3936_v1 = vpop.permute.xlu1 %3935 }
 0x5a8   : > { %3959 = vst.msk [vmem:[#allocation4 + $0xb0] sm:$0xff] %vm3878_vm8, %v3940_v62 }
 0x5ab   : > { %v3980_v49 = vpop.permute.xlu0 %3979  ;;  %v3976_v2 = vpop.permute.xlu1 %3975 }
 0x5ac   : > { %4000 = vst.msk [vmem:[#allocation4 + $0x100] sm:$0xff] %vm3878_vm8, %v3980_v49 }
 0x5af   : > { %v9455_v3 = vpop.permute.xlu0 %4020  ;;  %v9457_v4 = vpop.permute.xlu1 %4016 }
 0x5b0   : > { %4041 = vst.msk [vmem:[#allocation4 + $0x150] sm:$0xff] %vm3878_vm8, %v9455_v3 }
 0x5b3   : > { %v4062_v11 = vpop.permute.xlu0 %4061  ;;  %v4058_v32 = vpop.permute.xlu1 %4057 }
 0x5b4   : > { %4082 = vst.msk [vmem:[#allocation4 + $0x1a0] sm:$0xff] %vm3878_vm8, %v4062_v11 }
 0x5b7   : > { %v3898_v30 = vpop.permute.xlu1 %3897  ;;  %v3902_v6 = vpop.permute.xlu0 %3901  ;;  %v4269_v7 = vld [vmem:[#allocation4 + $0x150] sm:$0xff] }
 0x5b8   : > { %v3907_v5 = vsel %vm612_vm2, %v3896_v36, %v3898_v30  ;;  %v3908_v8 = vsel %vm612_vm2, %v3898_v30, %v3900_v61  ;;  %7126 = vmatprep.subr.bf16.mxu1 %v4269_v7 }
 0x5b9   : > { %7127 = vmatpush3.bf16.msra.mxu1 %v4245_v39  ;;  %4331 = vmatprep.subr.bf16.mxu0 %v3908_v8  ;;  %v4257_v39 = vld [vmem:[#allocation4 + $0xb0] sm:$0xff] }
 0x5ba   : > { %4332 = vmatpush1.bf16.msra.mxu0 %v3907_v5 }
 0x5bb   : > { %v3938_v57 = vpop.permute.xlu1 %3937  ;;  %v3942_v55 = vpop.permute.xlu0 %3941  ;;  %v4275_v61 = vld [vmem:[#allocation4 + $0x1a0] sm:$0xff] }
 0x5bc   : > { %v3948_v22 = vsel %vm664_vm3, %v3938_v57, %v3940_v62  ;;  %v3947_v35 = vsel %vm664_vm3, %v3936_v1, %v3938_v57  ;;  %v4251_v1 = vld [vmem:[#allocation4 + $0x60] sm:$0xff] }
 0x5bf   : > { %v3978_v37 = vpop.permute.xlu1 %3977  ;;  %v3982_v12 = vpop.permute.xlu0 %3981 }
 0x5c0   : > { %v3989_v15 = vsel %vm10237_vm15, %v3978_v37, %v3980_v49  ;;  %v3988_v45 = vsel %vm10237_vm15, %v3976_v2, %v3978_v37 }
 0x5c3   : > { %v4019_v19 = vpop.permute.xlu1 %4018  ;;  %v4023_v17 = vpop.permute.xlu0 %4022 }
 0x5c4   : > { %v4030_v14 = vsel %vm4028_vm5, %v4019_v19, %v9455_v3  ;;  %v4029_v56 = vsel %vm4028_vm5, %v9457_v4, %v4019_v19 }
 0x5c7   : > { %v4060_v18 = vpop.permute.xlu1 %4059  ;;  %v9464_v23 = vpop.permute.xlu0 %4063 }
 0x5c8   : > { %v9467_v20 = vsel %vm4069_vm13, %v4058_v32, %v4060_v18  ;;  %v4071_v0 = vsel %vm4069_vm13, %v4060_v18, %v4062_v11 }
 0x5cb   : > { %v3906_v27 = vpop.permute.xlu1 %3905  ;;  %v3904_v28 = vpop.permute.xlu0 %3903 }
 0x5cc   : > { %3922 = vst.msk [vmem:[#allocation4 + $0x88] sm:$0xff] %vm3878_vm8, %v3906_v27  ;;  %v3909_v13 = vsel %vm612_vm2, %v3902_v6, %v3904_v28  ;;  %v3910_v10 = vsel %vm612_vm2, %v3904_v28, %v3906_v27 }
 0x5cd   : > { %4333 = vmatprep.subr.bf16.mxu0 %v3910_v10 }
 0x5ce   : > { %4334 = vmatpush1.bf16.msra.mxu0 %v3909_v13  ;;  %v7635_v13 = vld [vmem:[%s10196_s3] ss:$12 sps:$4 sm:$0xff]  }
 0x5cf   : > { %v4105_v51 = vpop.permute.xlu1 %4104  ;;  %v4107_v63 = vpop.permute.xlu0 %4106  ;;  %4335 = vmatprep.subr.bf16.mxu0 %v3948_v22 }
 0x5d0   : > { %v9475_v34 = vsel %vm4118_vm14, %v4105_v51, %v4107_v63 }
 0x5d2   : > { %4336 = vmatpush1.bf16.msra.mxu0 %v3947_v35 }
 0x5d3   : > { %v3946_v31 = vpop.permute.xlu1 %3945  ;;  %v3944_v16 = vpop.permute.xlu0 %3943  ;;  %v4254_v32 = vld [vmem:[#allocation4 + $0x88] sm:$0xff] }
 0x5d4   : > { %3962 = vst.msk [vmem:[#allocation4 + $0xd8] sm:$0xff] %vm3878_vm8, %v3946_v31  ;;  %v3949_v44 = vsel %vm664_vm3, %v3942_v55, %v3944_v16  ;;  %v3950_v29 = vsel %vm664_vm3, %v3944_v16, %v3946_v31 }
 0x5d5   : > { %4337 = vmatprep.subr.bf16.mxu0 %v3950_v29 }
 0x5d6   : > { %4338 = vmatpush1.bf16.msra.mxu0 %v3949_v44 }
 0x5d7   : > { %v3986_v46 = vpop.permute.xlu1 %3985  ;;  %v4109_v26 = vpop.permute.xlu0 %4108  ;;  %4339 = vmatprep.subr.bf16.mxu0 %v3989_v15 }
 0x5d8   : > { %4003 = vst.msk [vmem:[#allocation4 + $0x128] sm:$0xff] %vm3878_vm8, %v3986_v46  ;;  %v4121_v48 = vsel %vm4118_vm14, %v4107_v63, %v4109_v26 }
 0x5d9   : > { %4133 = vst.msk [vmem:[#allocation4 + $0x1f0] sm:$0xff] %vm3878_vm8, %v4121_v48 }
 0x5da   : > { %4340 = vmatpush1.bf16.msra.mxu0 %v3988_v45 }
 0x5db   : > { %v4027_v33 = vpop.permute.xlu1 %4026  ;;  %v3984_v50 = vpop.permute.xlu0 %3983  ;;  %v4260_v35 = vld [vmem:[#allocation4 + $0xd8] sm:$0xff] }
 0x5dc   : > { %4044 = vst.msk [vmem:[#allocation4 + $0x178] sm:$0xff] %vm3878_vm8, %v4027_v33  ;;  %v3990_v54 = vsel %vm10237_vm15, %v3982_v12, %v3984_v50  ;;  %v3991_v52 = vsel %vm10237_vm15, %v3984_v50, %v3986_v46  ;;  %v4263_v46 = vld [vmem:[#allocation4 + $0x100] sm:$0xff] }
 0x5dd   : > { %4341 = vmatprep.subr.bf16.mxu0 %v3991_v52 }
 0x5de   : > { %4342 = vmatpush1.bf16.msra.mxu0 %v3990_v54 }
 0x5df   : > { %v4068_v53 = vpop.permute.xlu1 %4067  ;;  %v4156_v9 = vpop.permute.xlu0 %4155  ;;  %4343 = vmatprep.subr.bf16.mxu0 %v4030_v14  ;;  %v4266_v50 = vld [vmem:[#allocation4 + $0x128] sm:$0xff] }
 0x5e0   : > { %4085 = vst.msk [vmem:[#allocation4 + $0x1c8] sm:$0xff] %vm3878_vm8, %v4068_v53  ;;  %v4281_v30 = vld [vmem:[#allocation4 + $0x1f0] sm:$0xff] }
 0x5e2   : > { %4344 = vmatpush1.bf16.msra.mxu0 %v4029_v56  ;;  %v7638_v56 = vld [vmem:[%s10196_s3 + $0x8] ss:$12 sps:$4 sm:$0xff]  }
 0x5e3   : > { %v4103_v58 = vpop.permute.xlu1 %4102  ;;  %v4025_v38 = vpop.permute.xlu0 %4024  ;;  %v4272_v59 = vld [vmem:[#allocation4 + $0x178] sm:$0xff] }
 0x5e4   : > { %v4119_v21 = vsel %vm4118_vm14, %v4103_v58, %v4105_v51  ;;  %v4031_v40 = vsel %vm4028_vm5, %v4023_v17, %v4025_v38  ;;  %v4032_v60 = vsel %vm4028_vm5, %v4025_v38, %v4027_v33  ;;  %7128 = vmatprep.subr.bf16.mxu1 %v4272_v59 }
 0x5e5   : > { %7129 = vmatpush3.bf16.msra.mxu1 %v4248_v24  ;;  %4345 = vmatprep.subr.bf16.mxu0 %v4032_v60  ;;  %v9536_v38 = vmul.u32.u64.low 3123612579, %v8192_v41  ;;  %v9537_v59 = vmul.u32.u64.high 3123612579, %v8192_v41, %v9536_v38 }
 0x5e6   : > { %7130 = vmatprep.subr.bf16.mxu1 %v4275_v61  ;;  %4346 = vmatpush1.bf16.msra.mxu0 %v4031_v40  ;;  %v9545_v24 = vmul.u32.u64.low 3123612579, %v8198_v43  ;;  %v9546_v61 = vmul.u32.u64.high 3123612579, %v8198_v43, %v9545_v24 }
 0x5e7   : > { %v4115_v36 = vpop.permute.xlu1 %4114  ;;  %v4160_v62 = vpop.permute.xlu0 %4159  ;;  %4347 = vmatprep.subr.bf16.mxu0 %v4071_v0  ;;  %v4278_v49 = vld [vmem:[#allocation4 + $0x1c8] sm:$0xff]  ;;  %v4507_v60 = vshrl.u32 %v9537_v59, 4 }
 0x5e9   : > { %7131 = vmatpush3.bf16.msra.mxu1 %v4251_v1 }
 0x5ea   : > { %7132 = vmatprep.subr.bf16.mxu1 %v4278_v49  ;;  %4348 = vmatpush1.bf16.msra.mxu0 %v9467_v20 }
 0x5eb   : > { %v4111_v2 = vpop.permute.xlu1 %4110  ;;  %v4066_v3 = vpop.permute.xlu0 %4065 }
 0x5ec   : > { %v4072_v4 = vsel %vm4069_vm13, %v9464_v23, %v4066_v3  ;;  %v4073_v11 = vsel %vm4069_vm13, %v4066_v3, %v4068_v53 }
 0x5ed   : > { %7133 = vmatpush3.bf16.msra.mxu1 %v4254_v32  ;;  %4349 = vmatprep.subr.bf16.mxu0 %v4073_v11  ;;  %v4864_v32 = vld [vmem:[%s10203_s10] sm:$0xff] }
 0x5ee   : > { %7134 = vmatprep.subr.bf16.mxu1 %v4281_v30  ;;  %4350 = vmatpush1.bf16.msra.mxu0 %v4072_v4 }
 0x5ef   : > { %v4158_v6 = vpop.permute.xlu1 %4157  ;;  %v4209_v7 = vpop.permute.xlu0 %4208  ;;  %4351 = vmatprep.subr.bf16.mxu0 %v9475_v34 }
 0x5f0   : > { %v4171_v5 = vsel %vm4169_vm6, %v4156_v9, %v4158_v6  ;;  %v4172_v8 = vsel %vm4169_vm6, %v4158_v6, %v4160_v62  ;;  %v4508_v62 = vmul.u32 22, %v4507_v60 }
 0x5f1   : > { %4184 = vst.msk [vmem:[#allocation4 + $0x240] sm:$0xff] %vm3878_vm8, %v4172_v8  ;;  %7135 = vmatpush3.bf16.msra.mxu1 %v4257_v39 }
 0x5f2   : > { %4352 = vmatpush1.bf16.msra.mxu0 %v4119_v21  ;;  %v9540_v21 = vmul.u32.u64.low 3123612579, %v8195_v42  ;;  %v9541_v40 = vmul.u32.u64.high 3123612579, %v8195_v42, %v9540_v21  ;;  %v4509_v49 = vsub.s32 %v8192_v41, %v4508_v62 }
 0x5f3   : > { %v4154_v57 = vpop.permute.xlu1 %4153  ;;  %v4113_v55 = vpop.permute.xlu0 %4112 }
 0x5f4   : > { %v4170_v37 = vsel %vm4169_vm6, %v4154_v57, %v4156_v9  ;;  %v4122_v12 = vsel %vm4118_vm14, %v4111_v2, %v4113_v55  ;;  %v4123_v19 = vsel %vm4118_vm14, %v4113_v55, %v4115_v36  ;;  %v4529_v2 = vshrl.u32 %v9546_v61, 4 }
 0x5f5   : > { %4353 = vmatprep.subr.bf16.mxu0 %v4123_v19  ;;  %vm4537_vm7 = vcmp.lt.s32.totalorder %v4509_v49, 0  ;;  %v4543_v11 = vadd.s32 22, %v4509_v49 }
 0x5f6   : > { %4354 = vmatpush1.bf16.msra.mxu0 %v4122_v12  ;;  %v4530_v4 = vmul.u32 22, %v4529_v2 }
 0x5f7   : > { %v4166_v17 = vpop.permute.xlu1 %4165  ;;  %v4117_v18 = vpop.permute.xlu0 %4116  ;;  %4355 = vmatprep.subr.bf16.mxu0 %v4171_v5 }
 0x5f8   : > { %v4124_v23 = vsel %vm4118_vm14, %v4115_v36, %v4117_v18  ;;  %v4287_v31 = vld [vmem:[#allocation4 + $0x240] sm:$0xff]  ;;  %v4518_v36 = vshrl.u32 %v9541_v40, 4  ;;  %v4531_v6 = vsub.s32 %v8198_v43, %v4530_v4 }
 0x5f9   : > { %4136 = vst.msk [vmem:[#allocation4 + $0x218] sm:$0xff] %vm3878_vm8, %v4124_v23 }
 0x5fa   : > { %4356 = vmatpush1.bf16.msra.mxu0 %v4170_v37  ;;  %v4519_v1 = vmul.u32 22, %v4518_v36  ;;  %vm4536_vm9 = vcmp.ne.s32.totalorder %v4531_v6, 0 }
 0x5fb   : > { %v4162_v20 = vpop.permute.xlu1 %4161  ;;  %v4164_v0 = vpop.permute.xlu0 %4163 }
 0x5fc   : > { %v4173_v27 = vsel %vm4169_vm6, %v4162_v20, %v4164_v0  ;;  %v4174_v28 = vsel %vm4169_vm6, %v4164_v0, %v4166_v17  ;;  %v4520_v3 = vsub.s32 %v8195_v42, %v4519_v1 }
 0x5fd   : > { %4357 = vmatprep.subr.bf16.mxu0 %v4174_v28 }
 0x5fe   : > { %4358 = vmatpush1.bf16.msra.mxu0 %v4173_v27  ;;  %vm4535_vm11 = vcmp.ne.s32.totalorder %v4520_v3, 0  ;;  %vm4538_vm4 = vcmp.lt.s32.totalorder %v4520_v3, 0  ;;  %v4544_v30 = vadd.s32 22, %v4520_v3  ;;  %v4545_v27 = vadd.s32 22, %v4531_v6 }
 0x5ff   : > { %v4207_v10 = vpop.permute.xlu1 %4206  ;;  %v4168_v22 = vpop.permute.xlu0 %4167 }
 0x600   : > { %v4222_v51 = vsel %vm4220_vm0, %v4207_v10, %v4209_v7  ;;  %v4175_v63 = vsel %vm4169_vm6, %v4166_v17, %v4168_v22  ;;  %v4284_v34 = vld [vmem:[#allocation4 + $0x218] sm:$0xff] }
 0x601   : > { %4187 = vst.msk [vmem:[#allocation4 + $0x268] sm:$0xff] %vm3878_vm8, %v4175_v63  ;;  %7136 = vmatprep.subr.bf16.mxu1 %v4284_v34  ;;  %4370 = vmatprep.subr.bf16.mxu0 %v4222_v51 }
 0x602   : > { %7137 = vmatpush3.bf16.msra.mxu1 %v4260_v35  ;;  %4360 = vmatmul.mubr.bf16.vlgmr.msra.gmra.mrb[32].mxu0 %v7635_v13 }
 0x603   : > { %v4205_v16 = vpop.permute.xlu1 %4204  ;;  %7138 = vmatprep.subr.bf16.mxu1 %v4287_v31  ;;  %v4211_v44 = vpop.permute.xlu0 %4210  ;;  %4402 = vmatprep.mubr.bf16.mxu0 %v9285_v47 }
 0x604   : > { %v4221_v29 = vsel %vm4220_vm0, %v4205_v16, %v4207_v10  ;;  %v4223_v15 = vsel %vm4220_vm0, %v4209_v7, %v4211_v44 }
 0x605   : > { %4235 = vst.msk [vmem:[#allocation4 + $0x290] sm:$0xff] %vm3878_vm8, %v4223_v15  ;;  %4371 = vmatpush1.bf16.msra.mxu0 %v4221_v29 }
 0x606   : > { %7139 = vmatpush3.bf16.msra.mxu1 %v4263_v46 }
 0x607   : > { %v4215_v26 = vpop.permute.xlu1 %4214  ;;  %v4217_v48 = vpop.permute.xlu0 %4216 }
 0x608   : > { %v4225_v45 = vsel %vm4220_vm0, %v4215_v26, %v4217_v48  ;;  %v4290_v33 = vld [vmem:[#allocation4 + $0x268] sm:$0xff] }
 0x609   : > { %7140 = vmatprep.subr.bf16.mxu1 %v4290_v33  ;;  %4372 = vmatprep.subr.bf16.mxu0 %v4225_v45 }
 0x60a   : > { %7141 = vmatpush3.bf16.msra.mxu1 %v4266_v50 }
 0x60b   : > { %v4213_v54 = vpop.permute.xlu1 %4212  ;;  %v4219_v52 = vpop.permute.xlu0 %4218  ;;  %7184 = vmatprep.subr.bf16.mxu1 %v7840_v25 }
 0x60c   : > { %v4224_v14 = vsel %vm4220_vm0, %v4213_v54, %v4215_v26  ;;  %v4226_v53 = vsel %vm4220_vm0, %v4217_v48, %v4219_v52  ;;  %v4293_v9 = vld [vmem:[#allocation4 + $0x290] sm:$0xff] }
 0x60d   : > { %4238 = vst.msk [vmem:[#allocation4 + $0x2b8] sm:$0xff] %vm3878_vm8, %v4226_v53  ;;  %4446 = vmatmul.mubr.bf16.vlgmr.msra.gmra.mrb[36].mxu1 %v7635_v13  ;;  %4373 = vmatpush1.bf16.msra.mxu0 %v4224_v14  ;;  %vm9557_vm8 = vmand %vm4538_vm4, %vm4535_vm11 }
 0x60e   : > { %7185 = vmatpush3.bf16.msra.mxu1 %v4293_v9  ;;  %7188 = vmatprep.mubr.msk.bf16.mxu1 %vm10234_vm10, %v7840_v25  ;;  %v4547_v12 = vsel %vm9557_vm8, %v4544_v30, %v4520_v3  ;;  %vm4595_vm8 = vcmask 1048104   ;;  %v4865_v30 = vld [vmem:[%s10203_s10 + $0x8] sm:$0xff] }
 0x60f   : > { %7186 = vmatprep.subr.bf16.mxu1 %v7840_v25  ;;  %vm4550_vm11 = vcmp.lt.s32.totalorder %v4547_v12, 16 }
 0x610   : > { %6979 = vmatmul.mubr.msk.bf16.vlgmr.msra.gmra.mrb[32].mxu0 %vm2246_vm1, %v7638_v56  ;;  %v6982_v16 = vsel %vm4550_vm11, 1.0, %v7840_v25  ;;  %vm10291_vm11 = vcmask 130048  }
 0x614   : > { %v4296_v58 = vld [vmem:[#allocation4 + $0x2b8] sm:$0xff] }
 0x615   : > { %7187 = vmatpush3.bf16.msra.mxu1 %v4296_v58 }
 0x618   : > { %7189 = vmatmul.mubr.msk.bf16.vlgmr.msra.gmra.mrb[40].mxu1 %vm2246_vm1, %v7638_v56  ;;  %vm4534_vm1 = vcmp.ne.s32.totalorder %v4509_v49, 0 }
 0x619   : > { %vm9552_vm12 = vmand %vm4537_vm7, %vm4534_vm1  ;;  %vm4539_vm1 = vcmp.lt.s32.totalorder %v4531_v6, 0 }
 0x61a   : > { %v4546_v39 = vsel %vm9552_vm12, %v4543_v11, %v4509_v49  ;;  %vm9565_vm4 = vmand %vm4539_vm1, %vm4536_vm9  ;;  %vm4588_vm9 = vcmask 564224   ;;  %vm4599_vm1 = vcmask 302080  }
 0x61b   : > { %vm4549_vm7 = vcmp.lt.s32.totalorder %v4546_v39, 16  ;;  %v4548_v29 = vsel %vm9565_vm4, %v4545_v27, %v4531_v6  ;;  %vm10292_vm4 = vmmov %vm10291_vm11 }
 0x61c   : > { %v4302_v57 = vpop.permute.xlu1 %4301  ;;  %v4307_v0 = vpop.permute.xlu0 %4306  ;;  %v6981_v34 = vsel %vm4549_vm7, 1.0, %v7840_v25  ;;  %vm4551_vm12 = vcmp.lt.s32.totalorder %v4548_v29, 16  ;;  %vm4608_vm7 = vcmask 457728  }
 0x61d   : > { %v6983_v21 = vsel %vm4551_vm12, 1.0, %v7840_v25  ;;  %vm5783_vm12 = vcmask 883712  }
 0x6e0   : > { %v7142_v5 = vpop.f32.mrb[36].mxu1 }
 0x6e1   : > { %v7143_v8 = vpop.f32.mrb[37].mxu1 }
 0x6e2   : > { %v7144_v55 = vadd.f32 %v7143_v8, %v7142_v5  ;;  %v7145_v37 = vpop.f32.mrb[38].mxu1 }
 0x6e3   : > { %v7146_v19 = vpop.f32.mrb[39].mxu1  ;;  %v4404_v17 = vpop.f32.mrb[32].mxu0 }
 0x6e4   : > { %v7147_v18 = vadd.f32 %v7146_v19, %v7145_v37  ;;  %v7222_v23 = vadd.f32 %v4404_v17, %v4302_v57  ;;  %v4406_v20 = vpop.f32.mrb[33].mxu0  ;;  %v4448_v26 = vadd.f32 %v7144_v55, %v4302_v57 }
 0x6e5   : > { %v7223_v28 = vadd.f32 %v4406_v20, %v4302_v57  ;;  %v4408_v13 = vpop.f32.mrb[34].mxu0 }
 0x6e6   : > { %v4495_v10 = vmax.f32 %v7222_v23, 0.0  ;;  %v7224_v51 = vadd.f32 %v4408_v13, %v4307_v0  ;;  %v4410_v63 = vpop.f32.mrb[35].mxu0  ;;  %v4451_v53 = vadd.f32 %v7147_v18, %v4307_v0 }
 0x6e7   : > { %v4496_v35 = vmax.f32 %v7223_v28, 0.0  ;;  %v7225_v31 = vadd.f32 %v4410_v63, %v4307_v0 }
 0x6e8   : > { %v4498_v44 = vmax.f32 %v7224_v51, 0.0  ;;  %v4558_v46 = vmul.f32 %v6981_v34, %v4495_v10 }
 0x6e9   : > { %v4499_v15 = vmax.f32 %v7225_v31, 0.0  ;;  %v4559_v33 = vmul.f32 %v6982_v16, %v4496_v35 }
 0x6ea   : > { %v4561_v48 = vmul.f32 %v6981_v34, %v4498_v44 }
 0x6eb   : > { %v4488_v45 = vpop.f32.mrb[40].mxu1  ;;  %v4562_v50 = vmul.f32 %v6982_v16, %v4499_v15 }
 0x6ec   : > { %v4489_v54 = vadd.f32 %v4488_v45, %v4448_v26  ;;  %v7190_v52 = vpop.f32.mrb[41].mxu1  ;;  %v4576_v14 = vpack.c.bf16 %v4561_v48, %v4558_v46 }
 0x6ed   : > { %v4491_v9 = vpop.f32.mrb[42].mxu1  ;;  %v4577_v56 = vpack.c.bf16 %v4562_v50, %v4559_v33 }
 0x6ee   : > { %v4497_v58 = vmax.f32 %v4489_v54, 0.0  ;;  %v4492_v38 = vadd.f32 %v4491_v9, %v4451_v53  ;;  %4582 = vrot.lane.b32.xlu1 %v4576_v14, %s7849_s1  ;;  %v7191_v59 = vpop.f32.mrb[43].mxu1  ;;  %v7644_v14 = vld [vmem:[%s10207_s14 + $0x4] ss:$12 sps:$4 sm:$0xff]  }
 0x6ef   : > { %4584 = vrot.lane.b32.xlu0 %v4577_v56, %s7849_s1 }
 0x6f0   : > { %v4500_v40 = vmax.f32 %v4492_v38, 0.0  ;;  %v4560_v60 = vmul.f32 %v6983_v21, %v4497_v58  ;;  %v9645_v58 = vld [vmem:[%s10197_s4] ss:$8 sps:$4 sm:$0xff]  }
 0x6f1   : > { %v7642_v38 = vld [vmem:[%s10207_s14] ss:$12 sps:$4 sm:$0xff]  }
 0x6f2   : > { %v4563_v24 = vmul.f32 %v6983_v21, %v4500_v40  ;;  %v7647_v21 = vld [vmem:[%s10207_s14 + $0x1c] ss:$12 sps:$4 sm:$0xff]  }
 0x6f4   : > { %v4578_v61 = vpack.c.bf16 %v4563_v24, %v4560_v60 }
 0x6f6   : > { %4586 = vrot.lane.b32.xlu1 %v4578_v61, %s7849_s1  ;;  %v7645_v61 = vld [vmem:[%s10207_s14 + $0x18] ss:$12 sps:$4 sm:$0xff]   ;;  %s7853_s1 = smov 87  }
 0x760   : > { %v4583_v36 = vpop.permute.xlu1 %4582 }
 0x761   : > { %4596 = vst.msk [vmem:[#allocation2] sm:$0xff] %vm4595_vm8, %v4583_v36  ;;  %v4585_v62 = vpop.permute.xlu0 %4584  ;;  %vm5804_vm8 = vcmask 875520  }
 0x762   : > { %v4589_v1 = vsel %vm4588_vm9, %v4583_v36, %v4585_v62 }
 0x763   : > { %4888 = vmatprep.subr.bf16.mxu1 %v4589_v1 }
 0x768   : > { %v4601_v49 = vld [vmem:[#allocation2] sm:$0xff]  ;;  %v4587_v2 = vpop.permute.xlu1 %4586 }
 0x769   : > { %v4590_v3 = vsel %vm4588_vm9, %v4585_v62, %v4587_v2  ;;  %4600 = vst.msk [vmem:[#allocation2 + $0x18] sm:$0xff] %vm4599_vm1, %v4587_v2  ;;  %4645 = vrot.lane.b32.xlu1 %v4601_v49, %s10260_s23  ;;  %4618 = vrot.lane.b32.xlu0 %v4601_v49, %s10259_s29  ;;  %6102 = vst [vmem:[#allocation2] sm:$0xff] %v9285_v47  ;;  %v7650_v62 = vld [vmem:[%s10207_s14 + $0x34] ss:$12 sps:$4 sm:$0xff]   ;;  %vm10236_vm9 = vcmask 719872   ;;  %vm5866_vm1 = vcmask 711680  }
 0x76a   : > { %4607 = vst [vmem:[#allocation4 + $0x10] sm:$0xff] %v4590_v3  ;;  %4889 = vmatpush1.bf16.msra.mxu1 %v4601_v49 }
 0x76d   : > { %4699 = vrot.lane.b32.xlu1 %v4601_v49, %s7843_s17  ;;  %4672 = vrot.lane.b32.xlu0 %v4601_v49, %s10231_s30 }
 0x770   : > { %v4604_v4 = vld [vmem:[#allocation2 + $0x18] sm:$0xff] }
 0x771   : > { %4753 = vrot.lane.b32.xlu1 %v4601_v49, %s7845_s28  ;;  %4726 = vrot.lane.b32.xlu0 %v4601_v49, %s7844_s20  ;;  %4609 = vst.msk [vmem:[#allocation4 + $0x18] sm:$0xff] %vm4608_vm7, %v4604_v4  ;;  %6105 = vst [vmem:[#allocation2 + $0x18] sm:$0xff] %v9285_v47  ;;  %v7639_v47 = vld [vmem:[%s10197_s4 + $0x4] ss:$8 sps:$4 sm:$0xff]  }
 0x772   : > { %6986 = vmatprep.mubr.msk.bf16.mxu1 %vm10291_vm11, %v7639_v47  ;;  %6987 = vmatprep.mubr.msk.bf16.mxu0 %vm10292_vm4, %v7639_v47  ;;  %v7653_v47 = vld [vmem:[%s10207_s14 + $0x4c] ss:$12 sps:$4 sm:$0xff]  }
 0x775   : > { %4780 = vrot.lane.b32.xlu0 %v4601_v49, %s7846_s19  ;;  %4622 = vrot.lane.b32.xlu1 %v4590_v3, %s10259_s29 }
 0x778   : > { %v4831_v11 = vld [vmem:[#allocation4 + $0x18] sm:$0xff] }
 0x779   : > { %4931 = vmatprep.subr.bf16.mxu0 %v4831_v11  ;;  %4620 = vrot.lane.b32.xlu0 %v4589_v1, %s10259_s29 }
 0x77a   : > { %4932 = vmatpush1.bf16.msra.mxu0 %v4590_v3  ;;  %4647 = vrot.lane.b32.xlu1 %v4589_v1, %s10260_s23 }
 0x77d   : > { %4649 = vrot.lane.b32.xlu0 %v4590_v3, %s10260_s23 }
 0x77e   : > { %4676 = vrot.lane.b32.xlu1 %v4590_v3, %s10231_s30 }
 0x781   : > { %4674 = vrot.lane.b32.xlu0 %v4589_v1, %s10231_s30 }
 0x782   : > { %4701 = vrot.lane.b32.xlu1 %v4589_v1, %s7843_s17 }
 0x785   : > { %4703 = vrot.lane.b32.xlu0 %v4590_v3, %s7843_s17 }
 0x786   : > { %4730 = vrot.lane.b32.xlu1 %v4590_v3, %s7844_s20 }
 0x789   : > { %4728 = vrot.lane.b32.xlu0 %v4589_v1, %s7844_s20 }
 0x78a   : > { %4755 = vrot.lane.b32.xlu1 %v4589_v1, %s7845_s28 }
 0x78d   : > { %4757 = vrot.lane.b32.xlu0 %v4590_v3, %s7845_s28 }
 0x78e   : > { %4784 = vrot.lane.b32.xlu1 %v4590_v3, %s7846_s19 }
 0x791   : > { %4782 = vrot.lane.b32.xlu0 %v4589_v1, %s7846_s19 }
 0x792   : > { %4809 = vrot.lane.b32.xlu1 %v4589_v1, %s7847_s26 }
 0x795   : > { %4811 = vrot.lane.b32.xlu0 %v4590_v3, %s7847_s26  ;;  %v7648_v3 = vld [vmem:[%s10207_s14 + $0x30] ss:$12 sps:$4 sm:$0xff]  }
 0x796   : > { %4807 = vrot.lane.b32.xlu1 %v4601_v49, %s7847_s26 }
 0x799   : > { %4624 = vrot.lane.b32.xlu0 %v4604_v4, %s10259_s29 }
 0x79a   : > { %4651 = vrot.lane.b32.xlu1 %v4604_v4, %s10260_s23 }
 0x79d   : > { %4678 = vrot.lane.b32.xlu0 %v4604_v4, %s10231_s30 }
 0x79e   : > { %4705 = vrot.lane.b32.xlu1 %v4604_v4, %s7843_s17  ;;  %s7854_s17 = smov 86  }
 0x7a1   : > { %4732 = vrot.lane.b32.xlu0 %v4604_v4, %s7844_s20 }
 0x7a2   : > { %4759 = vrot.lane.b32.xlu1 %v4604_v4, %s7845_s28  ;;  %s7850_s28 = smov 108  }
 0x7a5   : > { %4786 = vrot.lane.b32.xlu0 %v4604_v4, %s7846_s19  ;;  %s7851_s19 = smov 107  }
 0x7a6   : > { %4813 = vrot.lane.b32.xlu1 %v4604_v4, %s7847_s26  ;;  %s10293_s26 = smov 106  }
 0x7a9   : > { %4868 = vperm.xlu0 %7370, %v4864_v32  }
 0x7aa   : > { %4873 = vperm.xlu1 %7371, %v4865_v30  }
 0x7db   : > { %v4619_v6 = vpop.permute.xlu0 %4618  ;;  %v4646_v7 = vpop.permute.xlu1 %4645 }
 0x7df   : > { %v4673_v5 = vpop.permute.xlu0 %4672  ;;  %v4700_v8 = vpop.permute.xlu1 %4699 }
 0x7e3   : > { %v4727_v39 = vpop.permute.xlu0 %4726  ;;  %v4754_v57 = vpop.permute.xlu1 %4753 }
 0x7e7   : > { %v4781_v55 = vpop.permute.xlu0 %4780  ;;  %v4623_v37 = vpop.permute.xlu1 %4622 }
 0x7eb   : > { %v4621_v12 = vpop.permute.xlu0 %4620 }
 0x7ec   : > { %v4626_v19 = vsel %vm612_vm2, %v4619_v6, %v4621_v12  ;;  %v4627_v17 = vsel %vm612_vm2, %v4621_v12, %v4623_v37  ;;  %v4648_v18 = vpop.permute.xlu1 %4647 }
 0x7ed   : > { %4890 = vmatprep.subr.bf16.mxu1 %v4627_v17  ;;  %v4653_v27 = vsel %vm664_vm3, %v4646_v7, %v4648_v18  ;;  %v7659_v17 = vld [vmem:[%s10207_s14 + $0x7c] ss:$12 sps:$4 sm:$0xff]  }
 0x7ee   : > { %4891 = vmatpush1.bf16.msra.mxu1 %v4626_v19  ;;  %v7654_v19 = vld [vmem:[%s10207_s14 + $0x60] ss:$12 sps:$4 sm:$0xff]  }
 0x7ef   : > { %v4650_v23 = vpop.permute.xlu0 %4649 }
 0x7f0   : > { %v4654_v20 = vsel %vm664_vm3, %v4648_v18, %v4650_v23  ;;  %v4677_v0 = vpop.permute.xlu1 %4676 }
 0x7f1   : > { %4892 = vmatprep.subr.bf16.mxu1 %v4654_v20  ;;  %v7662_v20 = vld [vmem:[%s10207_s14 + $0x94] ss:$12 sps:$4 sm:$0xff]  }
 0x7f2   : > { %4893 = vmatpush1.bf16.msra.mxu1 %v4653_v27  ;;  %v7660_v27 = vld [vmem:[%s10207_s14 + $0x90] ss:$12 sps:$4 sm:$0xff]  }
 0x7f3   : > { %v4675_v28 = vpop.permute.xlu0 %4674 }
 0x7f4   : > { %v4680_v13 = vsel %vm10237_vm15, %v4673_v5, %v4675_v28  ;;  %v4681_v10 = vsel %vm10237_vm15, %v4675_v28, %v4677_v0  ;;  %v4702_v22 = vpop.permute.xlu1 %4701  ;;  %v7651_v5 = vld [vmem:[%s10207_s14 + $0x48] ss:$12 sps:$4 sm:$0xff]   ;;  %v7665_v28 = vld [vmem:[%s10207_s14 + $0xac] ss:$12 sps:$4 sm:$0xff]  }
 0x7f5   : > { %4894 = vmatprep.subr.bf16.mxu1 %v4681_v10  ;;  %v4707_v35 = vsel %vm4028_vm5, %v4700_v8, %v4702_v22  ;;  %v7663_v10 = vld [vmem:[%s10207_s14 + $0xa8] ss:$12 sps:$4 sm:$0xff]  }
 0x7f6   : > { %4895 = vmatpush1.bf16.msra.mxu1 %v4680_v13 }
 0x7f7   : > { %v4704_v51 = vpop.permute.xlu0 %4703 }
 0x7f8   : > { %v4708_v63 = vsel %vm4028_vm5, %v4702_v22, %v4704_v51  ;;  %v4731_v34 = vpop.permute.xlu1 %4730  ;;  %v7668_v22 = vld [vmem:[%s10207_s14 + $0xc4] ss:$12 sps:$4 sm:$0xff]  }
 0x7f9   : > { %4896 = vmatprep.subr.bf16.mxu1 %v4708_v63  ;;  %v7666_v63 = vld [vmem:[%s10207_s14 + $0xc0] ss:$12 sps:$4 sm:$0xff]  }
 0x7fa   : > { %4897 = vmatpush1.bf16.msra.mxu1 %v4707_v35 }
 0x7fb   : > { %v4729_v31 = vpop.permute.xlu0 %4728 }
 0x7fc   : > { %v4734_v16 = vsel %vm4069_vm13, %v4727_v39, %v4729_v31  ;;  %v4735_v44 = vsel %vm4069_vm13, %v4729_v31, %v4731_v34  ;;  %v4756_v29 = vpop.permute.xlu1 %4755  ;;  %v7656_v39 = vld [vmem:[%s10207_s14 + $0x64] ss:$12 sps:$4 sm:$0xff]   ;;  %v7669_v31 = vld [vmem:[%s10207_s14 + $0xc8] ss:$12 sps:$4 sm:$0xff]  }
 0x7fd   : > { %4898 = vmatprep.subr.bf16.mxu1 %v4735_v44  ;;  %v4761_v48 = vsel %vm4118_vm14, %v4754_v57, %v4756_v29  ;;  %v7678_v44 = vld [vmem:[%s10207_s14 + $0xf4] ss:$12 sps:$4 sm:$0xff]  }
 0x7fe   : > { %4899 = vmatpush1.bf16.msra.mxu1 %v4734_v16  ;;  %v7671_v16 = vld [vmem:[%s10207_s14 + $0xd8] ss:$12 sps:$4 sm:$0xff]  }
 0x7ff   : > { %v4758_v15 = vpop.permute.xlu0 %4757 }
 0x800   : > { %v4762_v46 = vsel %vm4118_vm14, %v4756_v29, %v4758_v15  ;;  %v9631_v26 = vpop.permute.xlu1 %4784  ;;  %v7670_v29 = vld [vmem:[%s10207_s14 + $0x8] ss:$12 sps:$4 sm:$0xff]  }
 0x801   : > { %4900 = vmatprep.subr.bf16.mxu1 %v4762_v46  ;;  %v7676_v46 = vld [vmem:[%s10207_s14 + $0xf0] ss:$12 sps:$4 sm:$0xff]  }
 0x802   : > { %4901 = vmatpush1.bf16.msra.mxu1 %v4761_v48  ;;  %v7675_v48 = vld [vmem:[%s10207_s14 + $0x20] ss:$12 sps:$4 sm:$0xff]  }
 0x803   : > { %v4783_v45 = vpop.permute.xlu0 %4782 }
 0x804   : > { %v4788_v33 = vsel %vm4169_vm6, %v4781_v55, %v4783_v45  ;;  %v4789_v50 = vsel %vm4169_vm6, %v4783_v45, %v9631_v26  ;;  %v4810_v54 = vpop.permute.xlu1 %4809  ;;  %v7679_v45 = vld [vmem:[%s10207_s14 + $0xf8] ss:$12 sps:$4 sm:$0xff]  }
 0x805   : > { %4902 = vmatprep.subr.bf16.mxu1 %v4789_v50  ;;  %v7688_v50 = vld [vmem:[%s10207_s14 + $0x124] ss:$12 sps:$4 sm:$0xff]  }
 0x806   : > { %4903 = vmatpush1.bf16.msra.mxu1 %v4788_v33  ;;  %v7681_v33 = vld [vmem:[%s10207_s14 + $0x108] ss:$12 sps:$4 sm:$0xff]  }
 0x807   : > { %v4812_v52 = vpop.permute.xlu0 %4811 }
 0x808   : > { %v4816_v53 = vsel %vm4220_vm0, %v4810_v54, %v4812_v52  ;;  %v4808_v9 = vpop.permute.xlu1 %4807 }
 0x809   : > { %v4815_v56 = vsel %vm4220_vm0, %v4808_v9, %v4810_v54  ;;  %4904 = vmatprep.subr.bf16.mxu1 %v4816_v53  ;;  %v7680_v54 = vld [vmem:[%s10207_s14 + $0x38] ss:$12 sps:$4 sm:$0xff]   ;;  %v7693_v53 = vld [vmem:[%s10207_s14 + $0x13c] ss:$12 sps:$4 sm:$0xff]  }
 0x80a   : > { %4905 = vmatpush1.bf16.msra.mxu1 %v4815_v56  ;;  %v7685_v9 = vld [vmem:[%s10207_s14 + $0x50] ss:$12 sps:$4 sm:$0xff]   ;;  %v7689_v56 = vld [vmem:[%s10207_s14 + $0x128] ss:$12 sps:$4 sm:$0xff]  }
 0x80b   : > { %v4625_v59 = vpop.permute.xlu0 %4624  ;;  %5549 = vmatprep.subr.bf16.mxu1 %v7644_v14  ;;  %v7686_v14 = vld [vmem:[%s10207_s14 + $0x120] ss:$12 sps:$4 sm:$0xff]  }
 0x80c   : > { %v4628_v40 = vsel %vm612_vm2, %v4623_v37, %v4625_v59  ;;  %4636 = vst.msk [vmem:[#allocation4 + $0x40] sm:$0xff] %vm4608_vm7, %v4625_v59  ;;  %v4652_v60 = vpop.permute.xlu1 %4651  ;;  %v7694_v59 = vld [vmem:[%s10207_s14 + $0x140] ss:$12 sps:$4 sm:$0xff]  }
 0x80d   : > { %4635 = vst [vmem:[#allocation4 + $0x38] sm:$0xff] %v4628_v40  ;;  %v4655_v24 = vsel %vm664_vm3, %v4650_v23, %v4652_v60  ;;  %4663 = vst.msk [vmem:[#allocation4 + $0x68] sm:$0xff] %vm4608_vm7, %v4652_v60  ;;  %4921 = vmatmul.mubr.bf16.vlgmr.msra.gmra.mrb[44].mxu1 %v9645_v58  ;;  %v7657_v23 = vld [vmem:[%s10207_s14 + $0x78] ss:$12 sps:$4 sm:$0xff]  }
 0x80e   : > { %4662 = vst [vmem:[#allocation4 + $0x60] sm:$0xff] %v4655_v24  ;;  %5550 = vmatpush1.bf16.msra.mxu1 %v7642_v38  ;;  %v7690_v38 = vld [vmem:[%s10207_s14 + $0x68] ss:$12 sps:$4 sm:$0xff]   ;;  %v7699_v60 = vld [vmem:[%s10207_s14 + $0x158] ss:$12 sps:$4 sm:$0xff]  }
 0x80f   : > { %v4679_v36 = vpop.permute.xlu0 %4678  ;;  %5551 = vmatprep.subr.bf16.mxu1 %v7647_v21  ;;  %v7695_v21 = vld [vmem:[%s10207_s14 + $0x80] ss:$12 sps:$4 sm:$0xff]  }
 0x810   : > { %v4682_v1 = vsel %vm10237_vm15, %v4677_v0, %v4679_v36  ;;  %4690 = vst.msk [vmem:[#allocation4 + $0x90] sm:$0xff] %vm4608_vm7, %v4679_v36  ;;  %v4706_v49 = vpop.permute.xlu1 %4705  ;;  %v7703_v36 = vld [vmem:[%s10207_s14 + $0x16c] ss:$12 sps:$4 sm:$0xff]  }
 0x811   : > { %4689 = vst [vmem:[#allocation4 + $0x88] sm:$0xff] %v4682_v1  ;;  %v4709_v2 = vsel %vm4028_vm5, %v4704_v51, %v4706_v49  ;;  %4717 = vst.msk [vmem:[#allocation4 + $0xb8] sm:$0xff] %vm4608_vm7, %v4706_v49  ;;  %v7705_v49 = vld [vmem:[%s10207_s14 + $0xb0] ss:$12 sps:$4 sm:$0xff]   ;;  %vm10233_vm5 = vcmask 1043456  }
 0x812   : > { %4716 = vst [vmem:[#allocation4 + $0xb0] sm:$0xff] %v4709_v2  ;;  %5552 = vmatpush1.bf16.msra.mxu1 %v7645_v61  ;;  %v7700_v61 = vld [vmem:[%s10207_s14 + $0x98] ss:$12 sps:$4 sm:$0xff]  }
 0x813   : > { %v4733_v4 = vpop.permute.xlu0 %4732  ;;  %v4835_v11 = vld [vmem:[#allocation4 + $0x40] sm:$0xff]  ;;  %5553 = vmatprep.subr.bf16.mxu1 %v7650_v62  ;;  %v7704_v62 = vld [vmem:[%s10207_s14 + $0x170] ss:$12 sps:$4 sm:$0xff]  }
 0x814   : > { %v4736_v32 = vsel %vm4069_vm13, %v4731_v34, %v4733_v4  ;;  %4744 = vst.msk [vmem:[#allocation4 + $0xe0] sm:$0xff] %vm4608_vm7, %v4733_v4  ;;  %v4760_v30 = vpop.permute.xlu1 %4759  ;;  %4933 = vmatprep.subr.bf16.mxu0 %v4835_v11  ;;  %v4839_v7 = vld [vmem:[#allocation4 + $0x68] sm:$0xff] }
 0x815   : > { %4743 = vst [vmem:[#allocation4 + $0xd8] sm:$0xff] %v4736_v32  ;;  %v4763_v6 = vsel %vm4118_vm14, %v4758_v15, %v4760_v30  ;;  %4771 = vst.msk [vmem:[#allocation4 + $0x108] sm:$0xff] %vm4608_vm7, %v4760_v30  ;;  %4934 = vmatpush1.bf16.msra.mxu0 %v4628_v40  ;;  %v7673_v34 = vld [vmem:[%s10207_s14 + $0xdc] ss:$12 sps:$4 sm:$0xff]   ;;  %v7674_v15 = vld [vmem:[%s10207_s14 + $0xe0] ss:$12 sps:$4 sm:$0xff]  }
 0x816   : > { %4770 = vst [vmem:[#allocation4 + $0x100] sm:$0xff] %v4763_v6  ;;  %4935 = vmatprep.subr.bf16.mxu0 %v4839_v7  ;;  %5554 = vmatpush1.bf16.msra.mxu1 %v7648_v3  ;;  %v7698_v40 = vld [vmem:[%s10207_s14 + $0x154] ss:$12 sps:$4 sm:$0xff]  }
 0x817   : > { %v4787_v8 = vpop.permute.xlu0 %4786  ;;  %5555 = vmatprep.subr.bf16.mxu1 %v7653_v47  ;;  %v4843_v12 = vld [vmem:[#allocation4 + $0x90] sm:$0xff]  ;;  %v9810_v3 = vld [vmem:[#allocation2 + $0x40] sm:$0xff] }
 0x818   : > { %v4790_v57 = vsel %vm4169_vm6, %v9631_v26, %v4787_v8  ;;  %4798 = vst.msk [vmem:[#allocation4 + $0x130] sm:$0xff] %vm4608_vm7, %v4787_v8  ;;  %v4814_v55 = vpop.permute.xlu1 %4813  ;;  %v4847_v18 = vld [vmem:[#allocation4 + $0xb8] sm:$0xff]  ;;  %vm5729_vm6 = vcmask 195584  }
 0x819   : > { %4797 = vst [vmem:[#allocation4 + $0x128] sm:$0xff] %v4790_v57  ;;  %v4817_v37 = vsel %vm4220_vm0, %v4812_v52, %v4814_v55  ;;  %4825 = vst.msk [vmem:[#allocation4 + $0x158] sm:$0xff] %vm4608_vm7, %v4814_v55  ;;  %4936 = vmatpush1.bf16.msra.mxu0 %v4655_v24  ;;  %v7683_v26 = vld [vmem:[%s10207_s14 + $0x10c] ss:$12 sps:$4 sm:$0xff]   ;;  %v7684_v52 = vld [vmem:[%s10207_s14 + $0x110] ss:$12 sps:$4 sm:$0xff]  }
 0x81a   : > { %4824 = vst [vmem:[#allocation4 + $0x150] sm:$0xff] %v4817_v37  ;;  %4937 = vmatprep.subr.bf16.mxu0 %v4843_v12  ;;  %5556 = vmatpush1.bf16.msra.mxu1 %v7651_v5  ;;  %v7696_v24 = vld [vmem:[%s10207_s14 + $0x150] ss:$12 sps:$4 sm:$0xff]   ;;  %vm10295_vm0 = vmmov %vm10292_vm4 }
 0x81b   : > { %5557 = vmatprep.subr.bf16.mxu1 %v7656_v39  ;;  %v4851_v0 = vld [vmem:[#allocation4 + $0xe0] sm:$0xff] }
 0x81c   : > { %v4855_v13 = vld [vmem:[#allocation4 + $0x108] sm:$0xff] }
 0x81d   : > { %4938 = vmatpush1.bf16.msra.mxu0 %v4682_v1  ;;  %v7701_v1 = vld [vmem:[%s10207_s14 + $0x168] ss:$12 sps:$4 sm:$0xff]  }
 0x81e   : > { %4939 = vmatprep.subr.bf16.mxu0 %v4847_v18  ;;  %5558 = vmatpush1.bf16.msra.mxu1 %v7654_v19  ;;  %v7706_v18 = vld [vmem:[%s10207_s14 + $0x180] ss:$12 sps:$4 sm:$0xff]  }
 0x81f   : > { %5559 = vmatprep.subr.bf16.mxu1 %v7659_v17  ;;  %v4859_v51 = vld [vmem:[#allocation4 + $0x130] sm:$0xff] }
 0x820   : > { %v4863_v35 = vld [vmem:[#allocation4 + $0x158] sm:$0xff] }
 0x821   : > { %4940 = vmatpush1.bf16.msra.mxu0 %v4709_v2  ;;  %v7708_v2 = vld [vmem:[%s10207_s14 + $0x184] ss:$12 sps:$4 sm:$0xff]  }
 0x822   : > { %4941 = vmatprep.subr.bf16.mxu0 %v4851_v0  ;;  %5560 = vmatpush1.bf16.msra.mxu1 %v7657_v23  ;;  %v7709_v23 = vld [vmem:[%s10207_s14 + $0x188] ss:$12 sps:$4 sm:$0xff]   ;;  %v7710_v0 = vld [vmem:[%s10207_s14 + $0x198] ss:$12 sps:$4 sm:$0xff]  }
 0x823   : > { %5561 = vmatprep.subr.bf16.mxu1 %v7662_v20  ;;  %v7712_v20 = vld [vmem:[%s10207_s14 + $0x19c] ss:$12 sps:$4 sm:$0xff]  }
 0x825   : > { %4942 = vmatpush1.bf16.msra.mxu0 %v4736_v32 }
 0x826   : > { %4943 = vmatprep.subr.bf16.mxu0 %v4855_v13  ;;  %5562 = vmatpush1.bf16.msra.mxu1 %v7660_v27  ;;  %v7713_v27 = vld [vmem:[%s10207_s14 + $0x1a0] ss:$12 sps:$4 sm:$0xff]   ;;  %v7714_v13 = vld [vmem:[%s10207_s14 + $0x1b0] ss:$12 sps:$4 sm:$0xff]  }
 0x827   : > { %5563 = vmatprep.subr.bf16.mxu1 %v7665_v28  ;;  %v7716_v28 = vld [vmem:[%s10207_s14 + $0x1b4] ss:$12 sps:$4 sm:$0xff]  }
 0x828   : > { %v9813_v4 = vpop.permute.xlu0 %4868 }
 0x829   : > { %4944 = vmatpush1.bf16.msra.mxu0 %v4763_v6  ;;  %v9816_v30 = vpop.permute.xlu1 %4873 }
 0x82a   : > { %4945 = vmatprep.subr.bf16.mxu0 %v4859_v51  ;;  %5564 = vmatpush1.bf16.msra.mxu1 %v7663_v10  ;;  %v7717_v10 = vld [vmem:[%s10207_s14 + $0x1b8] ss:$12 sps:$4 sm:$0xff]   ;;  %v7718_v51 = vld [vmem:[%s10207_s14 + $0x1c8] ss:$12 sps:$4 sm:$0xff]  }
 0x82b   : > { %5565 = vmatprep.subr.bf16.mxu1 %v7668_v22  ;;  %v7720_v22 = vld [vmem:[%s10207_s14 + $0x1cc] ss:$12 sps:$4 sm:$0xff]  }
 0x82d   : > { %4946 = vmatpush1.bf16.msra.mxu0 %v4790_v57 }
 0x82e   : > { %4947 = vmatprep.subr.bf16.mxu0 %v4863_v35  ;;  %5566 = vmatpush1.bf16.msra.mxu1 %v7666_v63  ;;  %v7721_v63 = vld [vmem:[%s10207_s14 + $0x1d0] ss:$12 sps:$4 sm:$0xff]   ;;  %v7722_v35 = vld [vmem:[%s10207_s14 + $0x1e0] ss:$12 sps:$4 sm:$0xff]  }
 0x82f   : > { %5567 = vmatprep.subr.bf16.mxu1 %v7673_v34  ;;  %v7724_v34 = vld [vmem:[%s10207_s14 + $0x1e4] ss:$12 sps:$4 sm:$0xff]  }
 0x831   : > { %4948 = vmatpush1.bf16.msra.mxu0 %v4817_v37 }
 0x832   : > { %7151 = vmatprep.subr.bf16.mxu0 %v7669_v31  ;;  %5568 = vmatpush1.bf16.msra.mxu1 %v7671_v16  ;;  %v7725_v31 = vld [vmem:[%s10207_s14 + $0x1e8] ss:$12 sps:$4 sm:$0xff]  }
 0x833   : > { %5569 = vmatprep.subr.bf16.mxu1 %v7678_v44  ;;  %v7728_v16 = vld [vmem:[%s10207_s14 + $0x1fc] ss:$12 sps:$4 sm:$0xff]   ;;  %v7726_v44 = vld [vmem:[%s10207_s14 + $0x1f8] ss:$12 sps:$4 sm:$0xff]  }
 0x834   : > { %4964 = vmatmul.mubr.bf16.vlgmr.msra.gmra.mrb[36].mxu0 %v9645_v58  ;;  %v7691_v58 = vld [vmem:[%s10207_s14 + $0x138] ss:$12 sps:$4 sm:$0xff]  }
 0x835   : > { %7152 = vmatpush3.bf16.msra.mxu0 %v7670_v29  ;;  %v7729_v29 = vld [vmem:[%s10207_s14 + $0x200] ss:$12 sps:$4 sm:$0xff]  }
 0x836   : > { %7153 = vmatprep.subr.bf16.mxu0 %v7674_v15  ;;  %5570 = vmatpush1.bf16.msra.mxu1 %v7676_v46  ;;  %v7732_v15 = vld [vmem:[%s10207_s14 + $0x214] ss:$12 sps:$4 sm:$0xff]   ;;  %v7730_v46 = vld [vmem:[%s10207_s14 + $0x210] ss:$12 sps:$4 sm:$0xff]  }
 0x837   : > { %5571 = vmatprep.subr.bf16.mxu1 %v7683_v26  ;;  %v7733_v26 = vld [vmem:[%s10207_s14 + $0x218] ss:$12 sps:$4 sm:$0xff]  }
 0x839   : > { %7154 = vmatpush3.bf16.msra.mxu0 %v7675_v48  ;;  %v7736_v48 = vld [vmem:[%s10207_s14 + $0x22c] ss:$12 sps:$4 sm:$0xff]  }
 0x83a   : > { %7155 = vmatprep.subr.bf16.mxu0 %v7679_v45  ;;  %5572 = vmatpush1.bf16.msra.mxu1 %v7681_v33  ;;  %v7734_v45 = vld [vmem:[%s10207_s14 + $0x228] ss:$12 sps:$4 sm:$0xff]   ;;  %v7737_v33 = vld [vmem:[%s10207_s14 + $0x230] ss:$12 sps:$4 sm:$0xff]  }
 0x83b   : > { %5573 = vmatprep.subr.bf16.mxu1 %v7688_v50  ;;  %v7740_v50 = vld [vmem:[%s10207_s14 + $0x244] ss:$12 sps:$4 sm:$0xff]  }
 0x83d   : > { %7156 = vmatpush3.bf16.msra.mxu0 %v7680_v54 }
 0x83e   : > { %7157 = vmatprep.subr.bf16.mxu0 %v7684_v52  ;;  %5574 = vmatpush1.bf16.msra.mxu1 %v7686_v14 }
 0x83f   : > { %5575 = vmatprep.subr.bf16.mxu1 %v7693_v53  ;;  %v7738_v53 = vld [vmem:[%s10207_s14 + $0x240] ss:$12 sps:$4 sm:$0xff]  }
 0x841   : > { %7158 = vmatpush3.bf16.msra.mxu0 %v7685_v9  ;;  %v7741_v9 = vld [vmem:[%s10207_s14 + $0x248] ss:$12 sps:$4 sm:$0xff]  }
 0x842   : > { %7159 = vmatprep.subr.bf16.mxu0 %v7689_v56  ;;  %5576 = vmatpush1.bf16.msra.mxu1 %v7691_v58 }
 0x843   : > { %5577 = vmatprep.subr.bf16.mxu1 %v7698_v40 }
 0x845   : > { %7160 = vmatpush3.bf16.msra.mxu0 %v7690_v38  ;;  %v7744_v38 = vld [vmem:[%s10207_s14 + $0x25c] ss:$12 sps:$4 sm:$0xff]  }
 0x846   : > { %7161 = vmatprep.subr.bf16.mxu0 %v7694_v59  ;;  %5578 = vmatpush1.bf16.msra.mxu1 %v7696_v24 }
 0x847   : > { %5579 = vmatprep.subr.bf16.mxu1 %v7703_v36  ;;  %v7745_v36 = vld [vmem:[%s10207_s14 + $0x260] ss:$12 sps:$4 sm:$0xff]  }
 0x849   : > { %7162 = vmatpush3.bf16.msra.mxu0 %v7695_v21 }
 0x84a   : > { %7163 = vmatprep.subr.bf16.mxu0 %v7699_v60  ;;  %5580 = vmatpush1.bf16.msra.mxu1 %v7701_v1 }
 0x84b   : > { %5592 = vmatprep.subr.bf16.mxu1 %v7708_v2  ;;  %v7748_v2 = vld [vmem:[%s10207_s14 + $0x274] ss:$12 sps:$4 sm:$0xff]  }
 0x84d   : > { %7164 = vmatpush3.bf16.msra.mxu0 %v7700_v61  ;;  %v7742_v61 = vld [vmem:[%s10207_s14 + $0x258] ss:$12 sps:$4 sm:$0xff]  }
 0x84e   : > { %7165 = vmatprep.subr.bf16.mxu0 %v7704_v62 }
 0x851   : > { %7166 = vmatpush3.bf16.msra.mxu0 %v7705_v49 }
 0x852   : > { %5676 = vmatprep.subr.bf16.mxu0 %v9810_v3 }
 0x8e0   : > { %v4922_v11 = vpop.f32.mrb[44].mxu1 }
 0x8e1   : > { %v4923_v47 = vadd.f32 %v4922_v11, %v9813_v4  ;;  %v4924_v32 = vpop.f32.mrb[45].mxu1 }
 0x8e2   : > { %v4925_v6 = vadd.f32 %v4924_v32, %v9813_v4  ;;  %v4926_v7 = vpop.f32.mrb[46].mxu1  ;;  %v7749_v32 = vld [vmem:[%s10207_s14 + $0x278] ss:$12 sps:$4 sm:$0xff]  }
 0x8e3   : > { %v4927_v5 = vadd.f32 %v4926_v7, %v9816_v30  ;;  %v4928_v8 = vpop.f32.mrb[47].mxu1  ;;  %v4974_v57 = vmax.f32 %v4923_v47, 0.0  ;;  %v7746_v47 = vld [vmem:[%s10207_s14 + $0x270] ss:$12 sps:$4 sm:$0xff]  }
 0x8e4   : > { %v4929_v39 = vadd.f32 %v4928_v8, %v9816_v30  ;;  %v4975_v37 = vmax.f32 %v4925_v6, 0.0  ;;  %v7752_v7 = vld [vmem:[%s10207_s14 + $0x290] ss:$0 sps:$4 sm:$0xff]  }
 0x8e5   : > { %v4978_v55 = vmax.f32 %v4927_v5, 0.0  ;;  %v5547_v8 = vsel %vm10233_vm5, %v7752_v7, 0 }
 0x8e6   : > { %v4979_v12 = vmax.f32 %v4929_v39, 0.0 }
 0x8e7   : > { %v4982_v19 = vpack.c.bf16 %v4978_v55, %v4974_v57 }
 0x8e8   : > { %v4983_v17 = vpack.c.bf16 %v4979_v12, %v4975_v37 }
 0x8ea   : > { %5581 = vmatprep.mubr.bf16.mxu1 %v4983_v17  ;;  %5667 = vmatprep.mubr.bf16.mxu0 %v4983_v17 }
 0x8eb   : > { %5582 = vmatmul.mubr.bf16.vlgmr.msra.gmra.mrb[48].mxu1 %v4982_v19  ;;  %5668 = vmatmul.mubr.bf16.vlgmr.msra.gmra.mrb[40].mxu0 %v4982_v19 }
 0x8ec   : > { %5593 = vmatpush1.bf16.msra.mxu1 %v7706_v18  ;;  %5677 = vmatpush1.bf16.msra.mxu0 %v7709_v23 }
 0x8ed   : > { %5594 = vmatprep.subr.bf16.mxu1 %v7712_v20  ;;  %5678 = vmatprep.subr.bf16.mxu0 %v9810_v3 }
 0x8f0   : > { %5595 = vmatpush1.bf16.msra.mxu1 %v7710_v0  ;;  %5679 = vmatpush1.bf16.msra.mxu0 %v7713_v27 }
 0x8f1   : > { %5596 = vmatprep.subr.bf16.mxu1 %v7716_v28  ;;  %5680 = vmatprep.subr.bf16.mxu0 %v9810_v3 }
 0x8f4   : > { %5597 = vmatpush1.bf16.msra.mxu1 %v7714_v13  ;;  %5681 = vmatpush1.bf16.msra.mxu0 %v7717_v10 }
 0x8f5   : > { %5598 = vmatprep.subr.bf16.mxu1 %v7720_v22  ;;  %5682 = vmatprep.subr.bf16.mxu0 %v9810_v3 }
 0x8f8   : > { %5599 = vmatpush1.bf16.msra.mxu1 %v7718_v51  ;;  %5683 = vmatpush1.bf16.msra.mxu0 %v7721_v63 }
 0x8f9   : > { %5600 = vmatprep.subr.bf16.mxu1 %v7724_v34  ;;  %5684 = vmatprep.subr.bf16.mxu0 %v9810_v3 }
 0x8fc   : > { %5601 = vmatpush1.bf16.msra.mxu1 %v7722_v35  ;;  %5685 = vmatpush1.bf16.msra.mxu0 %v7725_v31 }
 0x8fd   : > { %5602 = vmatprep.subr.bf16.mxu1 %v7728_v16  ;;  %5686 = vmatprep.subr.bf16.mxu0 %v9810_v3  ;;  %v7753_v16 = vld [vmem:[%s10198_s5 + $0x4] ss:$8 sps:$4 sm:$0xff]  }
 0x900   : > { %5603 = vmatpush1.bf16.msra.mxu1 %v7726_v44  ;;  %5687 = vmatpush1.bf16.msra.mxu0 %v7729_v29  ;;  %v5926_v44 = vld [vmem:[%s10204_s11 + $0x8] sm:$0xff]  ;;  %v5925_v29 = vld [vmem:[%s10204_s11] sm:$0xff] }
 0x901   : > { %5604 = vmatprep.subr.bf16.mxu1 %v7732_v15  ;;  %5688 = vmatprep.subr.bf16.mxu0 %v9810_v3 }
 0x904   : > { %5605 = vmatpush1.bf16.msra.mxu1 %v7730_v46  ;;  %5689 = vmatpush1.bf16.msra.mxu0 %v7733_v26 }
 0x905   : > { %5606 = vmatprep.subr.bf16.mxu1 %v7736_v48  ;;  %5690 = vmatprep.subr.bf16.mxu0 %v9810_v3 }
 0x907   : > { %v4965_v54 = vpop.f32.mrb[36].mxu0 }
 0x908   : > { %v4966_v52 = vadd.f32 %v4965_v54, %v9813_v4  ;;  %v4967_v14 = vpop.f32.mrb[37].mxu0  ;;  %5607 = vmatpush1.bf16.msra.mxu1 %v7734_v45  ;;  %5691 = vmatpush1.bf16.msra.mxu0 %v7737_v33 }
 0x909   : > { %v4968_v56 = vadd.f32 %v4967_v14, %v9813_v4  ;;  %v4969_v58 = vpop.f32.mrb[38].mxu0  ;;  %5608 = vmatprep.subr.bf16.mxu1 %v7740_v50  ;;  %5692 = vmatprep.subr.bf16.mxu0 %v9810_v3  ;;  %v5094_v4 = vld [vmem:[%s10207_s14 + $0x288] sm:$0xff] }
 0x90a   : > { %v4970_v59 = vadd.f32 %v4969_v58, %v9816_v30  ;;  %v4971_v21 = vpop.f32.mrb[39].mxu0  ;;  %v4976_v60 = vmax.f32 %v4966_v52, 0.0  ;;  %v7069_v6 = vcombine.low %v5094_v4, %v5094_v4 }
 0x90b   : > { %v4972_v40 = vadd.f32 %v4971_v21, %v9816_v30  ;;  %v4977_v62 = vmax.f32 %v4968_v56, 0.0  ;;  %v7070_v30 = vcombine.high %v5094_v4, %v5094_v4 }
 0x90c   : > { %v4980_v24 = vmax.f32 %v4970_v59, 0.0  ;;  %5609 = vmatpush1.bf16.msra.mxu1 %v7738_v53  ;;  %5693 = vmatpush1.bf16.msra.mxu0 %v7741_v9  ;;  %v5541_v5 = vsel %vm10233_vm5, %v7069_v6, 0 }
 0x90d   : > { %v4981_v1 = vmax.f32 %v4972_v40, 0.0  ;;  %5610 = vmatprep.subr.bf16.mxu1 %v7744_v38  ;;  %5694 = vmatprep.subr.bf16.mxu0 %v9810_v3 }
 0x90e   : > { %v4984_v49 = vpack.c.bf16 %v4980_v24, %v4976_v60 }
 0x90f   : > { %v4985_v11 = vpack.c.bf16 %v4981_v1, %v4977_v62 }
 0x910   : > { %5611 = vmatpush1.bf16.msra.mxu1 %v7742_v61  ;;  %5695 = vmatpush1.bf16.msra.mxu0 %v7745_v36 }
 0x911   : > { %7073 = vmatprep.mubr.msk.bf16.mxu1 %vm4608_vm7, %v4985_v11  ;;  %7074 = vmatprep.mubr.msk.bf16.mxu0 %vm4608_vm7, %v4985_v11  ;;  %vm10235_vm7 = vcmask 703488  }
 0x912   : > { %5612 = vmatprep.subr.bf16.mxu1 %v7748_v2  ;;  %5696 = vmatprep.subr.bf16.mxu0 %v9810_v3 }
 0x914   : > { %5613 = vmatpush1.bf16.msra.mxu1 %v7746_v47  ;;  %5697 = vmatpush1.bf16.msra.mxu0 %v7749_v32 }
 0x915   : > { %7072 = vmatprep.subr.msk.bf16.mxu1 %vm10233_vm5, %v7070_v30  ;;  %5698 = vmatprep.subr.bf16.mxu0 %v9810_v3 }
 0x918   : > { %5615 = vmatpush1.bf16.msra.mxu1 %v5541_v5  ;;  %5699 = vmatpush1.bf16.msra.mxu0 %v5547_v8 }
 0x919   : > { %5992 = vmatprep.subr.bf16.mxu1 %v9810_v3 }
 0x91b   : > { %5625 = vmatmul.mubr.bf16.vlgmr.msra.gmra.mrb[48].mxu1 %v4984_v49  ;;  %5709 = vmatmul.mubr.bf16.vlgmr.msra.gmra.mrb[44].mxu0 %v4984_v49 }
 0x91c   : > { %7077 = vmatprep.mubr.msk.bf16.mxu0 %vm10295_vm0, %v7753_v16 }
 0x9be   : > { %v7167_v39 = vpop.f32.mrb[40].mxu0 }
 0x9bf   : > { %v7168_v57 = vpop.f32.mrb[41].mxu0 }
 0x9c0   : > { %v7169_v55 = vadd.f32 %v7168_v57, %v7167_v39  ;;  %v7170_v37 = vpop.f32.mrb[42].mxu0 }
 0x9c1   : > { %v7171_v12 = vpop.f32.mrb[43].mxu0 }
 0x9c2   : > { %v7172_v19 = vadd.f32 %v7171_v12, %v7170_v37 }
 0x9ee   : > { %v5626_v17 = vpop.f32.mrb[48].mxu1  ;;  %v5710_v18 = vpop.f32.mrb[44].mxu0 }
 0x9ef   : > { %v5711_v23 = vadd.f32 %v7169_v55, %v5710_v18  ;;  %v5628_v20 = vpop.f32.mrb[49].mxu1  ;;  %v5712_v0 = vpop.f32.mrb[45].mxu0 }
 0x9f0   : > { %v5630_v27 = vpop.f32.mrb[50].mxu1  ;;  %v5713_v28 = vpop.f32.mrb[46].mxu0 }
 0x9f1   : > { %v5717_v13 = vpack.c.bf16 %v5630_v27, %v5626_v17  ;;  %v5714_v10 = vadd.f32 %v7172_v19, %v5713_v28  ;;  %v5632_v22 = vpop.f32.mrb[51].mxu1  ;;  %v5715_v51 = vpop.f32.mrb[47].mxu0  ;;  %v7755_v27 = vld [vmem:[%s10198_s5] ss:$8 sps:$4 sm:$0xff]  }
 0x9f2   : > { %v5718_v63 = vpack.c.bf16 %v5632_v22, %v5628_v20 }
 0x9f3   : > { %v5719_v34 = vpack.c.bf16 %v5714_v10, %v5711_v23  ;;  %5757 = vrot.lane.b32.xlu1 %v5717_v13, %s10260_s23  ;;  %5737 = vrot.lane.b32.xlu0 %v5717_v13, %s10259_s29  ;;  %v10018_v10 = vmul.u32.u64.low 3435973837, %v8192_v41  ;;  %v10019_v22 = vmul.u32.u64.high 3435973837, %v8192_v41, %v10018_v10 }
 0x9f4   : > { %5949 = vmatprep.subr.bf16.mxu0 %v5718_v63 }
 0x9f5   : > { %5723 = vst.msk [vmem:[#allocation3 + $0x10] sm:$0xff] %vm4118_vm14, %v5719_v34  ;;  %5950 = vmatpush1.bf16.msra.mxu0 %v5717_v13  ;;  %vm10294_vm14 = vmmov %vm10292_vm4 }
 0x9f6   : > { %7078 = vmatprep.mubr.msk.bf16.mxu1 %vm10294_vm14, %v7753_v16 }
 0x9f7   : > { %5777 = vrot.lane.b32.xlu0 %v5717_v13, %s7850_s28  ;;  %5759 = vrot.lane.b32.xlu1 %v5718_v63, %s10260_s23 }
 0x9fb   : > { %5800 = vrot.lane.b32.xlu1 %v5718_v63, %s7851_s19  ;;  %5739 = vrot.lane.b32.xlu0 %v5718_v63, %s10259_s29 }
 0x9fc   : > { %v5726_v35 = vld [vmem:[#allocation3 + $0x10] sm:$0xff] }
 0x9fd   : > { %5730 = vst.msk [vmem:[#allocation4 + $0x10] sm:$0xff] %vm5729_vm6, %v5726_v35 }
 0x9ff   : > { %5741 = vrot.lane.b32.xlu1 %v5726_v35, %s10259_s29  ;;  %5779 = vrot.lane.b32.xlu0 %v5718_v63, %s7850_s28 }
 0xa03   : > { %5798 = vrot.lane.b32.xlu1 %v5717_v13, %s7851_s19  ;;  %5821 = vrot.lane.b32.xlu0 %v5718_v63, %s10293_s26 }
 0xa04   : > { %v5900_v31 = vld [vmem:[#allocation4 + $0x10] sm:$0xff] }
 0xa05   : > { %5993 = vmatpush1.bf16.msra.mxu1 %v5900_v31  ;;  %v6045_v31 = vshrl.u32 %v10019_v22, 4  ;;  %v7756_v22 = vld [vmem:[%s10199_s6 + $0x4] ss:$8 sps:$4 sm:$0xff]  }
 0xa06   : > { %5994 = vmatprep.subr.bf16.mxu1 %v9810_v3 }
 0xa07   : > { %5781 = vrot.lane.b32.xlu1 %v5726_v35, %s7850_s28  ;;  %5761 = vrot.lane.b32.xlu0 %v5726_v35, %s10260_s23 }
 0xa0b   : > { %5841 = vrot.lane.b32.xlu1 %v5718_v63, %s7852_s7  ;;  %5819 = vrot.lane.b32.xlu0 %v5717_v13, %s10293_s26 }
 0xa0f   : > { %5823 = vrot.lane.b32.xlu1 %v5726_v35, %s10293_s26  ;;  %5802 = vrot.lane.b32.xlu0 %v5726_v35, %s7851_s19 }
 0xa13   : > { %5839 = vrot.lane.b32.xlu1 %v5717_v13, %s7852_s7  ;;  %5862 = vrot.lane.b32.xlu0 %v5718_v63, %s7853_s1 }
 0xa17   : > { %5864 = vrot.lane.b32.xlu1 %v5726_v35, %s7853_s1  ;;  %5843 = vrot.lane.b32.xlu0 %v5726_v35, %s7852_s7 }
 0xa1b   : > { %5883 = vrot.lane.b32.xlu1 %v5718_v63, %s7854_s17  ;;  %5860 = vrot.lane.b32.xlu0 %v5717_v13, %s7853_s1  ;;  %v10022_v51 = vmul.u32.u64.low 3435973837, %v8195_v42  ;;  %v10023_v63 = vmul.u32.u64.high 3435973837, %v8195_v42, %v10022_v51 }
 0xa1c   : > { %v6348_v51 = vld [vmem:[%s10205_s12] sm:$0xff] }
 0xa1d   : > { %v6056_v16 = vshrl.u32 %v10023_v63, 4  ;;  %v6349_v63 = vld [vmem:[%s10205_s12 + $0x8] sm:$0xff] }
 0xa1f   : > { %5881 = vrot.lane.b32.xlu1 %v5717_v13, %s7854_s17  ;;  %5885 = vrot.lane.b32.xlu0 %v5726_v35, %s7854_s17  ;;  %v10026_v34 = vmul.u32.u64.low 3435973837, %v8198_v43  ;;  %v10027_v35 = vmul.u32.u64.high 3435973837, %v8198_v43, %v10026_v34 }
 0xa23   : > { %5934 = vperm.xlu1 %7371, %v5926_v44   ;;  %5929 = vperm.xlu0 %7370, %v5925_v29   ;;  %v6046_v44 = vmul.u32 20, %v6045_v31  ;;  %v6057_v29 = vmul.u32 20, %v6056_v16 }
 0xa65   : > { %v5758_v15 = vpop.permute.xlu1 %5757  ;;  %v5738_v46 = vpop.permute.xlu0 %5737 }
 0xa69   : > { %v5778_v26 = vpop.permute.xlu0 %5777  ;;  %v5760_v48 = vpop.permute.xlu1 %5759 }
 0xa6a   : > { %v5763_v21 = vsel %vm664_vm3, %v5758_v15, %v5760_v48  ;;  %v6067_v15 = vshrl.u32 %v10027_v35, 4 }
 0xa6d   : > { %v5801_v45 = vpop.permute.xlu1 %5800  ;;  %v5740_v33 = vpop.permute.xlu0 %5739 }
 0xa6e   : > { %v5743_v14 = vsel %vm612_vm2, %v5738_v46, %v5740_v33  ;;  %v6047_v46 = vsub.s32 %v8192_v41, %v6046_v44 }
 0xa70   : > { %vm6072_vm11 = vcmp.ne.s32.totalorder %v6047_v46, 0  ;;  %vm6075_vm4 = vcmp.lt.s32.totalorder %v6047_v46, 0 }
 0xa71   : > { %v5742_v50 = vpop.permute.xlu1 %5741  ;;  %v5780_v54 = vpop.permute.xlu0 %5779  ;;  %vm6078_vm0 = vmand %vm6075_vm4, %vm6072_vm11 }
 0xa72   : > { %v5744_v52 = vsel %vm612_vm2, %v5740_v33, %v5742_v50  ;;  %5750 = vst.msk [vmem:[#allocation4 + $0x38] sm:$0xff] %vm5729_vm6, %v5742_v50  ;;  %v5784_v61 = vsel %vm5783_vm12, %v5778_v26, %v5780_v54  ;;  %v6058_v26 = vsub.s32 %v8195_v42, %v6057_v29  ;;  %v6081_v33 = vadd.s32 20, %v6047_v46 }
 0xa73   : > { %5951 = vmatprep.subr.bf16.mxu0 %v5744_v52 }
 0xa74   : > { %5952 = vmatpush1.bf16.msra.mxu0 %v5743_v14  ;;  %vm6076_vm14 = vcmp.lt.s32.totalorder %v6058_v26, 0  ;;  %v6082_v50 = vadd.s32 20, %v6058_v26 }
 0xa75   : > { %v5799_v53 = vpop.permute.xlu1 %5798  ;;  %v5822_v9 = vpop.permute.xlu0 %5821 }
 0xa76   : > { %v5805_v2 = vsel %vm5804_vm8, %v5799_v53, %v5801_v45 }
 0xa79   : > { %v5782_v56 = vpop.permute.xlu1 %5781  ;;  %v5762_v58 = vpop.permute.xlu0 %5761  ;;  %v5903_v38 = vld [vmem:[#allocation4 + $0x38] sm:$0xff] }
 0xa7a   : > { %5791 = vst.msk [vmem:[#allocation4 + $0x88] sm:$0xff] %vm5729_vm6, %v5782_v56  ;;  %v5764_v59 = vsel %vm664_vm3, %v5760_v48, %v5762_v58  ;;  %5770 = vst.msk [vmem:[#allocation4 + $0x60] sm:$0xff] %vm5729_vm6, %v5762_v58  ;;  %5995 = vmatpush1.bf16.msra.mxu1 %v5903_v38  ;;  %v5785_v40 = vsel %vm5783_vm12, %v5780_v54, %v5782_v56  ;;  %v6068_v48 = vmul.u32 20, %v6067_v15 }
 0xa7b   : > { %5996 = vmatprep.subr.bf16.mxu1 %v9810_v3  ;;  %5953 = vmatprep.subr.bf16.mxu0 %v5764_v59  ;;  %v10035_v54 = vsel %vm6078_vm0, %v6081_v33, %v6047_v46 }
 0xa7c   : > { %5954 = vmatpush1.bf16.msra.mxu0 %v5763_v21 }
 0xa7d   : > { %v5842_v60 = vpop.permute.xlu1 %5841  ;;  %v5820_v24 = vpop.permute.xlu0 %5819  ;;  %5955 = vmatprep.subr.bf16.mxu0 %v5785_v40 }
 0xa7e   : > { %v5825_v30 = vsel %vm10237_vm15, %v5820_v24, %v5822_v9 }
 0xa80   : > { %5956 = vmatpush1.bf16.msra.mxu0 %v5784_v61 }
 0xa81   : > { %v5824_v36 = vpop.permute.xlu1 %5823  ;;  %v5803_v62 = vpop.permute.xlu0 %5802  ;;  %v5906_v1 = vld [vmem:[#allocation4 + $0x60] sm:$0xff]  ;;  %v5909_v32 = vld [vmem:[#allocation4 + $0x88] sm:$0xff] }
 0xa82   : > { %5832 = vst.msk [vmem:[#allocation4 + $0xd8] sm:$0xff] %vm5729_vm6, %v5824_v36  ;;  %v5806_v49 = vsel %vm5804_vm8, %v5801_v45, %v5803_v62  ;;  %5812 = vst.msk [vmem:[#allocation4 + $0xb0] sm:$0xff] %vm5729_vm6, %v5803_v62  ;;  %5997 = vmatpush1.bf16.msra.mxu1 %v5906_v1  ;;  %v5826_v4 = vsel %vm10237_vm15, %v5822_v9, %v5824_v36  ;;  %v6069_v45 = vsub.s32 %v8198_v43, %v6068_v48 }
 0xa83   : > { %5998 = vmatprep.subr.bf16.mxu1 %v9810_v3  ;;  %5957 = vmatprep.subr.bf16.mxu0 %v5806_v49  ;;  %vm6087_vm15 = vcmp.lt.s32.totalorder %v10035_v54, 14 }
 0xa84   : > { %5958 = vmatpush1.bf16.msra.mxu0 %v5805_v2  ;;  %vm6074_vm10 = vcmp.ne.s32.totalorder %v6069_v45, 0  ;;  %v6083_v14 = vadd.s32 20, %v6069_v45 }
 0xa85   : > { %v5840_v11 = vpop.permute.xlu1 %5839  ;;  %v5863_v47 = vpop.permute.xlu0 %5862  ;;  %5959 = vmatprep.subr.bf16.mxu0 %v5826_v4 }
 0xa86   : > { %5999 = vmatpush1.bf16.msra.mxu1 %v5909_v32  ;;  %v5846_v39 = vsel %vm10236_vm9, %v5840_v11, %v5842_v60 }
 0xa87   : > { %6000 = vmatprep.subr.bf16.mxu1 %v9810_v3 }
 0xa88   : > { %5960 = vmatpush1.bf16.msra.mxu0 %v5825_v30 }
 0xa89   : > { %v5865_v6 = vpop.permute.xlu1 %5864  ;;  %v5844_v7 = vpop.permute.xlu0 %5843  ;;  %v5912_v5 = vld [vmem:[#allocation4 + $0xb0] sm:$0xff]  ;;  %v5915_v12 = vld [vmem:[#allocation4 + $0xd8] sm:$0xff] }
 0xa8a   : > { %5874 = vst.msk [vmem:[#allocation4 + $0x128] sm:$0xff] %vm5729_vm6, %v5865_v6  ;;  %v5847_v8 = vsel %vm10236_vm9, %v5842_v60, %v5844_v7  ;;  %5853 = vst.msk [vmem:[#allocation4 + $0x100] sm:$0xff] %vm5729_vm6, %v5844_v7  ;;  %6001 = vmatpush1.bf16.msra.mxu1 %v5912_v5  ;;  %v5868_v57 = vsel %vm5866_vm1, %v5863_v47, %v5865_v6  ;;  %v7079_v60 = vsel %vm6087_vm15, 1.0, %v7840_v25  ;;  %vm6132_vm15 = vcmask 1048056  }
 0xa8b   : > { %6002 = vmatprep.subr.bf16.mxu1 %v9810_v3  ;;  %5961 = vmatprep.subr.bf16.mxu0 %v5847_v8 }
 0xa8c   : > { %5962 = vmatpush1.bf16.msra.mxu0 %v5846_v39 }
 0xa8d   : > { %v5884_v55 = vpop.permute.xlu1 %5883  ;;  %v5861_v37 = vpop.permute.xlu0 %5860  ;;  %5963 = vmatprep.subr.bf16.mxu0 %v5868_v57 }
 0xa8e   : > { %v5867_v19 = vsel %vm5866_vm1, %v5861_v37, %v5863_v47  ;;  %6003 = vmatpush1.bf16.msra.mxu1 %v5915_v12 }
 0xa8f   : > { %6004 = vmatprep.subr.bf16.mxu1 %v9810_v3 }
 0xa90   : > { %5964 = vmatpush1.bf16.msra.mxu0 %v5867_v19 }
 0xa91   : > { %v5882_v17 = vpop.permute.xlu1 %5881  ;;  %v5886_v18 = vpop.permute.xlu0 %5885  ;;  %v5918_v23 = vld [vmem:[#allocation4 + $0x100] sm:$0xff]  ;;  %v5921_v28 = vld [vmem:[#allocation4 + $0x128] sm:$0xff] }
 0xa92   : > { %v5888_v20 = vsel %vm10235_vm7, %v5882_v17, %v5884_v55  ;;  %v5889_v0 = vsel %vm10235_vm7, %v5884_v55, %v5886_v18  ;;  %5895 = vst.msk [vmem:[#allocation4 + $0x150] sm:$0xff] %vm5729_vm6, %v5886_v18  ;;  %6005 = vmatpush1.bf16.msra.mxu1 %v5918_v23  ;;  %vm6073_vm6 = vcmp.ne.s32.totalorder %v6058_v26, 0  ;;  %vm6077_vm7 = vcmp.lt.s32.totalorder %v6069_v45, 0 }
 0xa93   : > { %6006 = vmatprep.subr.bf16.mxu1 %v9810_v3  ;;  %5965 = vmatprep.subr.bf16.mxu0 %v5889_v0  ;;  %vm6079_vm5 = vmand %vm6076_vm14, %vm6073_vm6  ;;  %vm10303_vm6 = vcmask 703488  }
 0xa94   : > { %5966 = vmatpush1.bf16.msra.mxu0 %v5888_v20  ;;  %v10037_v52 = vsel %vm6079_vm5, %v6082_v50, %v6058_v26  ;;  %vm6080_vm9 = vmand %vm6077_vm7, %vm6074_vm10  ;;  %vm6126_vm5 = vcmask 515072  }
 0xa95   : > { %vm6088_vm11 = vcmp.lt.s32.totalorder %v10037_v52, 14  ;;  %v10041_v40 = vsel %vm6080_vm9, %v6083_v14, %v6069_v45  ;;  %vm10296_vm9 = vcmask 130048   ;;  %vm10304_vm14 = vmmov %vm10303_vm6 }
 0xa96   : > { %6007 = vmatpush1.bf16.msra.mxu1 %v5921_v28  ;;  %v7080_v36 = vsel %vm6088_vm11, 1.0, %v7840_v25  ;;  %vm6089_vm10 = vcmp.lt.s32.totalorder %v10041_v40, 14  ;;  %vm10297_vm7 = vmmov %vm10296_vm9 }
 0xa97   : > { %6008 = vmatprep.subr.bf16.mxu1 %v9810_v3  ;;  %5982 = vmatmul.mubr.bf16.vlgmr.msra.gmra.mrb[48].mxu0 %v7755_v27  ;;  %v7081_v57 = vsel %vm6089_vm10, 1.0, %v7840_v25  ;;  %vm10305_vm0 = vmmov %vm10303_vm6  ;;  %vm6607_vm10 = vcmp.lt.s32.totalorder %v10035_v54, 18 }
 0xa98   : > { %7084 = vmatprep.mubr.msk.bf16.mxu0 %vm10296_vm9, %v7756_v22  ;;  %vm10308_vm11 = vmmov %vm10297_vm7 }
 0xa99   : > { %v5924_v13 = vld [vmem:[#allocation4 + $0x150] sm:$0xff] }
 0xa9a   : > { %6009 = vmatpush1.bf16.msra.mxu1 %v5924_v13 }
 0xa9b   : > { %6415 = vmatprep.subr.bf16.mxu1 %v9810_v3 }
 0xa9d   : > { %6025 = vmatmul.mubr.bf16.vlgmr.msra.gmra.mrb[52].mxu1 %v7755_v27 }
 0xa9e   : > { %7085 = vmatprep.mubr.msk.bf16.mxu1 %vm10297_vm7, %v7756_v22 }
 0xaa2   : > { %v5930_v41 = vpop.permute.xlu0 %5929  ;;  %v5935_v56 = vpop.permute.xlu1 %5934 }
 0xb6a   : > { %v5983_v42 = vpop.f32.mrb[48].mxu0 }
 0xb6b   : > { %v5984_v53 = vadd.f32 %v5983_v42, %v5930_v41  ;;  %v5985_v9 = vpop.f32.mrb[49].mxu0 }
 0xb6c   : > { %v5986_v43 = vadd.f32 %v5985_v9, %v5930_v41  ;;  %v5987_v58 = vpop.f32.mrb[50].mxu0 }
 0xb6d   : > { %v6033_v38 = vmax.f32 %v5984_v53, 0.0  ;;  %v5988_v59 = vadd.f32 %v5987_v58, %v5935_v56  ;;  %v5989_v21 = vpop.f32.mrb[51].mxu0 }
 0xb6e   : > { %v6034_v24 = vmax.f32 %v5986_v43, 0.0  ;;  %v5990_v61 = vadd.f32 %v5989_v21, %v5935_v56 }
 0xb6f   : > { %v6036_v62 = vmax.f32 %v5988_v59, 0.0  ;;  %v6096_v11 = vmul.f32 %v7079_v60, %v6033_v38 }
 0xb70   : > { %v6026_v1 = vpop.f32.mrb[52].mxu1  ;;  %v6037_v49 = vmax.f32 %v5990_v61, 0.0  ;;  %v6097_v30 = vmul.f32 %v7080_v36, %v6034_v24 }
 0xb71   : > { %v6027_v2 = vadd.f32 %v6026_v1, %v5930_v41  ;;  %v6028_v4 = vpop.f32.mrb[53].mxu1  ;;  %v6099_v47 = vmul.f32 %v7079_v60, %v6036_v62 }
 0xb72   : > { %v6029_v32 = vpop.f32.mrb[54].mxu1  ;;  %v6100_v6 = vmul.f32 %v7080_v36, %v6037_v49 }
 0xb73   : > { %v6035_v7 = vmax.f32 %v6027_v2, 0.0  ;;  %v6030_v5 = vadd.f32 %v6029_v32, %v5935_v56  ;;  %v6114_v8 = vpack.c.bf16 %v6099_v47, %v6096_v11  ;;  %v6031_v39 = vpop.f32.mrb[55].mxu1 }
 0xb74   : > { %v6115_v55 = vpack.c.bf16 %v6100_v6, %v6097_v30 }
 0xb75   : > { %v6038_v37 = vmax.f32 %v6030_v5, 0.0  ;;  %6120 = vrot.lane.b32.xlu0 %v6114_v8, %s7855_s27  ;;  %v6098_v12 = vmul.f32 %v7081_v57, %v6035_v7 }
 0xb76   : > { %6122 = vrot.lane.b32.xlu1 %v6115_v55, %s7855_s27 }
 0xb77   : > { %v6101_v19 = vmul.f32 %v7081_v57, %v6038_v37 }
 0xb79   : > { %v6116_v17 = vpack.c.bf16 %v6101_v19, %v6098_v12 }
 0xb7b   : > { %6124 = vrot.lane.b32.xlu0 %v6116_v17, %s7855_s27  ;;  %s535_s27 = scalar_lea.vmem %s10208_s15, %s6743_s2 }
 0xb7f   : > { %6258 = vrot.lane.b32.xlu0 %v9810_v3, %s7852_s7 }
 0xbe7   : > { %v6121_v18 = vpop.permute.xlu0 %6120 }
 0xbe8   : > { %6133 = vst.msk [vmem:[#allocation2] sm:$0xff] %vm6132_vm15, %v6121_v18  ;;  %v6123_v23 = vpop.permute.xlu1 %6122  ;;  %vm6608_vm15 = vcmp.lt.s32.totalorder %v10037_v52, 18 }
 0xbe9   : > { %v6127_v20 = vsel %vm6126_vm5, %v6121_v18, %v6123_v23 }
 0xbea   : > { %6372 = vmatprep.subr.bf16.mxu0 %v6127_v20 }
 0xbed   : > { %v6125_v0 = vpop.permute.xlu0 %6124 }
 0xbee   : > { %v6128_v27 = vsel %vm6126_vm5, %v6123_v23, %v6125_v0  ;;  %vm10309_vm5 = vcmask 1043456  }
 0xbef   : > { %v6137_v28 = vld [vmem:[#allocation2] sm:$0xff]  ;;  %6136 = vst.msk [vmem:[#allocation2 + $0x10] sm:$0xff] %vm5866_vm1, %v6128_v27  ;;  %vm10310_vm9 = vmmov %vm10309_vm5 }
 0xbf0   : > { %6170 = vrot.lane.b32.xlu0 %v6137_v28, %s10260_s23  ;;  %6150 = vrot.lane.b32.xlu1 %v6137_v28, %s10259_s29 }
 0xbf1   : > { %6373 = vmatpush1.bf16.msra.mxu0 %v6137_v28  ;;  %v6259_v34 = vpop.permute.xlu0 %6258 }
 0xbf4   : > { %6210 = vrot.lane.b32.xlu0 %v6137_v28, %s7851_s19  ;;  %6190 = vrot.lane.b32.xlu1 %v6137_v28, %s7850_s28 }
 0xbf6   : > { %v6139_v13 = vld [vmem:[#allocation2 + $0x10] sm:$0xff] }
 0xbf7   : > { %6143 = vst.msk [vmem:[#allocation4 + $0x10] sm:$0xff] %vm4069_vm13, %v6139_v13 }
 0xbf8   : > { %6252 = vrot.lane.b32.xlu0 %v6137_v28, %s7852_s7  ;;  %6230 = vrot.lane.b32.xlu1 %v6137_v28, %s10293_s26 }
 0xbfc   : > { %6277 = vrot.lane.b32.xlu1 %v6137_v28, %s7853_s1  ;;  %6154 = vrot.lane.b32.xlu0 %v6139_v13, %s10259_s29 }
 0xbfe   : > { %v6323_v10 = vld [vmem:[#allocation4 + $0x10] sm:$0xff] }
 0xbff   : > { %6416 = vmatpush1.bf16.msra.mxu1 %v6323_v10 }
 0xc00   : > { %6152 = vrot.lane.b32.xlu1 %v6127_v20, %s10259_s29  ;;  %6172 = vrot.lane.b32.xlu0 %v6127_v20, %s10260_s23  ;;  %s7091_s29 = sshll.u32 %s7964_s25, 4  ;;  %s7857_s25 = smov [#allocation5]  }
 0xc01   : > { %6417 = vmatprep.subr.bf16.mxu1 %v9810_v3  ;;  %s7771_s2 = sshll.u32 %s7857_s25, 4  ;;  %s7772_s2 = int_to_ptr.vmem [resolvable:$false] %s7771_s2 }
 0xc02   : > { %s7773_s30 = scalar_lea.vmem %s7772_s2, 32 }
 0xc04   : > { %6174 = vrot.lane.b32.xlu1 %v6139_v13, %s10260_s23  ;;  %6194 = vrot.lane.b32.xlu0 %v6139_v13, %s7850_s28  ;;  %s526_s23 = scalar_lea.vmem [#allocation5], %s525_s18 }
 0xc08   : > { %6192 = vrot.lane.b32.xlu1 %v6127_v20, %s7850_s28  ;;  %6212 = vrot.lane.b32.xlu0 %v6127_v20, %s7851_s19  ;;  %s6671_s28 = sshll.u32 %s526_s23, 4  ;;  %s10153_s28 = int_to_ptr.vmem [resolvable:$true] %s6671_s28 }
 0xc09   : > { %p7774_p0 = scmp.lt.s32.totalorder %s10153_s28, %s7772_s2 }
 0xc0c   : > { %6214 = vrot.lane.b32.xlu1 %v6139_v13, %s7851_s19  ;;  %6234 = vrot.lane.b32.xlu0 %v6139_v13, %s10293_s26 }
 0xc10   : > { %6232 = vrot.lane.b32.xlu1 %v6127_v20, %s10293_s26  ;;  %6254 = vrot.lane.b32.xlu0 %v6127_v20, %s7852_s7 }
 0xc14   : > { %6256 = vrot.lane.b32.xlu1 %v6139_v13, %s7852_s7  ;;  %6281 = vrot.lane.b32.xlu0 %v6139_v13, %s7853_s1  ;;  %s10151_s7 = scalar_lea.hbm %s10209_s16, %s7091_s29 }
 0xc18   : > { %6279 = vrot.lane.b32.xlu1 %v6127_v20, %s7853_s1  ;;  %6306 = vrot.lane.b32.xlu0 %v6139_v13, %s7854_s17  ;;  %v7766_v13 = vld [vmem:[#allocation2 + $0x40] sm:$0xff] }
 0xc1c   : > { %6304 = vrot.lane.b32.xlu1 %v6127_v20, %s7854_s17  ;;  %6283 = vrot.lane.b32.xlu0 %v9810_v3, %s7853_s1  ;;  %v7758_v20 = vld [vmem:[%s10199_s6] ss:$8 sps:$4 sm:$0xff]   ;;  %s6659_s1 = scalar_lea.sflag [#allocation6], %s525_s18 }
 0xc20   : > { %6302 = vrot.lane.b32.xlu1 %v6137_v28, %s7854_s17  ;;  %6352 = vperm.xlu0 %7370, %v6348_v51  }
 0xc24   : > { %6308 = vrot.lane.b32.xlu1 %v9810_v3, %s7854_s17  ;;  %s7767_s17 = scalar_lea.vmem %s10153_s28, 16 }
 0xc25   : > { %p7768_p11 = scmp.ne.s32.totalorder %s10153_s28, %s7767_s17  ;;  %p7775_p1 = scmp.lt.s32.totalorder %s7773_s30, %s7767_s17 }
 0xc27   : > { %p7769_p12 = pnand %p7768_p11, %p7981_p5  ;;  %p7776_p2 = por %p7775_p1, %p7774_p0 }
 0xc28   : > { %6357 = vperm.xlu1 %7371, %v6349_v63  }
 0xc29   : > { %p7770_p13 = pneg %p7769_p12 }
 0xc2b   : > { %p7777_p3 = pnand %p7776_p2, %p7770_p13 }
 0xc62   : > { %v6151_v35 = vpop.permute.xlu1 %6150  ;;  %v6171_v31 = vpop.permute.xlu0 %6170 }
 0xc66   : > { %v6191_v16 = vpop.permute.xlu1 %6190  ;;  %v6211_v44 = vpop.permute.xlu0 %6210 }
 0xc6a   : > { %v6231_v29 = vpop.permute.xlu1 %6230  ;;  %v6253_v15 = vpop.permute.xlu0 %6252 }
 0xc6e   : > { %v6278_v46 = vpop.permute.xlu1 %6277  ;;  %v6155_v26 = vpop.permute.xlu0 %6154 }
 0xc6f   : > { %6163 = vst.msk [vmem:[#allocation4 + $0x38] sm:$0xff] %vm4069_vm13, %v6155_v26 }
 0xc72   : > { %v6153_v48 = vpop.permute.xlu1 %6152  ;;  %v6173_v45 = vpop.permute.xlu0 %6172 }
 0xc73   : > { %v6156_v33 = vsel %vm612_vm2, %v6151_v35, %v6153_v48  ;;  %v6157_v50 = vsel %vm612_vm2, %v6153_v48, %v6155_v26  ;;  %v6176_v41 = vsel %vm664_vm3, %v6171_v31, %v6173_v45  ;;  %vm10298_vm2 = vcmask 867328  }
 0xc74   : > { %6374 = vmatprep.subr.bf16.mxu0 %v6157_v50  ;;  %v6462_v50 = vld [vmem:[%s535_s27] sm:$0xf] }
 0xc75   : > { %6375 = vmatpush1.bf16.msra.mxu0 %v6156_v33 }
 0xc76   : > { %v6175_v14 = vpop.permute.xlu1 %6174  ;;  %v6195_v42 = vpop.permute.xlu0 %6194  ;;  %v6326_v53 = vld [vmem:[#allocation4 + $0x38] sm:$0xff] }
 0xc77   : > { %v6177_v9 = vsel %vm664_vm3, %v6173_v45, %v6175_v14  ;;  %6183 = vst.msk [vmem:[#allocation4 + $0x60] sm:$0xff] %vm4069_vm13, %v6175_v14  ;;  %6203 = vst.msk [vmem:[#allocation4 + $0x88] sm:$0xff] %vm4069_vm13, %v6195_v42  ;;  %6418 = vmatpush1.bf16.msra.mxu1 %v6326_v53  ;;  %v7856_v14 = vmov 0.0|0.0  }
 0xc78   : > { %6419 = vmatprep.subr.bf16.mxu1 %v9810_v3  ;;  %6376 = vmatprep.subr.bf16.mxu0 %v6177_v9  ;;  %vm10299_vm3 = vmmov %vm10298_vm2 }
 0xc79   : > { %6377 = vmatpush1.bf16.msra.mxu0 %v6176_v41 }
 0xc7a   : > { %v6193_v56 = vpop.permute.xlu1 %6192  ;;  %v6213_v43 = vpop.permute.xlu0 %6212 }
 0xc7b   : > { %v6196_v58 = vsel %vm5783_vm12, %v6191_v16, %v6193_v56  ;;  %v6197_v38 = vsel %vm5783_vm12, %v6193_v56, %v6195_v42  ;;  %v6216_v59 = vsel %vm5804_vm8, %v6211_v44, %v6213_v43  ;;  %vm10300_vm12 = vcmask 719872  }
 0xc7c   : > { %6378 = vmatprep.subr.bf16.mxu0 %v6197_v38 }
 0xc7d   : > { %6379 = vmatpush1.bf16.msra.mxu0 %v6196_v58 }
 0xc7e   : > { %v6215_v21 = vpop.permute.xlu1 %6214  ;;  %v6235_v60 = vpop.permute.xlu0 %6234  ;;  %v6329_v24 = vld [vmem:[#allocation4 + $0x60] sm:$0xff]  ;;  %v6332_v1 = vld [vmem:[#allocation4 + $0x88] sm:$0xff] }
 0xc7f   : > { %v6217_v61 = vsel %vm5804_vm8, %v6213_v43, %v6215_v21  ;;  %6223 = vst.msk [vmem:[#allocation4 + $0xb0] sm:$0xff] %vm4069_vm13, %v6215_v21  ;;  %6243 = vst.msk [vmem:[#allocation4 + $0xd8] sm:$0xff] %vm4069_vm13, %v6235_v60  ;;  %6420 = vmatpush1.bf16.msra.mxu1 %v6329_v24  ;;  %v7088_v21 = vsel %vm6607_vm10, 1.0, %v7840_v25 }
 0xc80   : > { %6421 = vmatprep.subr.bf16.mxu1 %v9810_v3  ;;  %6380 = vmatprep.subr.bf16.mxu0 %v6217_v61  ;;  %vm10301_vm8 = vmmov %vm10300_vm12 }
 0xc81   : > { %6381 = vmatpush1.bf16.msra.mxu0 %v6216_v59  ;;  %vm10302_vm4 = vmmov %vm10301_vm8 }
 0xc82   : > { %v6233_v36 = vpop.permute.xlu1 %6232  ;;  %v6255_v62 = vpop.permute.xlu0 %6254 }
 0xc83   : > { %v6236_v49 = vsel %vm10298_vm2, %v6231_v29, %v6233_v36  ;;  %v6237_v2 = vsel %vm10299_vm3, %v6233_v36, %v6235_v60  ;;  %v6260_v4 = vsel %vm10300_vm12, %v6253_v15, %v6255_v62  ;;  %6422 = vmatpush1.bf16.msra.mxu1 %v6332_v1  ;;  %v7089_v60 = vsel %vm6608_vm15, 1.0, %v7840_v25  ;;  %vm10311_vm3 = vmmov %vm10309_vm5 }
 0xc84   : > { %6423 = vmatprep.subr.bf16.mxu1 %v9810_v3  ;;  %6382 = vmatprep.subr.bf16.mxu0 %v6237_v2  ;;  %vm6622_vm2 = vcmask 846848   ;;  %vm10312_vm12 = vmmov %vm10311_vm3 }
 0xc85   : > { %6383 = vmatpush1.bf16.msra.mxu0 %v6236_v49 }
 0xc86   : > { %v6257_v11 = vpop.permute.xlu1 %6256  ;;  %v6282_v47 = vpop.permute.xlu0 %6281  ;;  %v6335_v32 = vld [vmem:[#allocation4 + $0xb0] sm:$0xff]  ;;  %v6338_v8 = vld [vmem:[#allocation4 + $0xd8] sm:$0xff] }
 0xc87   : > { %v6261_v30 = vsel %vm10301_vm8, %v6255_v62, %v6257_v11  ;;  %v6262_v6 = vsel %vm10302_vm4, %v6257_v11, %v6259_v34  ;;  %6424 = vmatpush1.bf16.msra.mxu1 %v6335_v32  ;;  %vm6648_vm8 = vcmask 125952   ;;  %vm6656_vm4 = vcmask 122880  }
 0xc88   : > { %6268 = vst.msk [vmem:[#allocation4 + $0x100] sm:$0xff] %vm4069_vm13, %v6262_v6  ;;  %6425 = vmatprep.subr.bf16.mxu1 %v9810_v3  ;;  %6384 = vmatprep.subr.bf16.mxu0 %v6261_v30 }
 0xc89   : > { %6385 = vmatpush1.bf16.msra.mxu0 %v6260_v4 }
 0xc8a   : > { %v6280_v7 = vpop.permute.xlu1 %6279  ;;  %v6307_v5 = vpop.permute.xlu0 %6306 }
 0xc8b   : > { %v6285_v39 = vsel %vm5866_vm1, %v6278_v46, %v6280_v7  ;;  %v6286_v57 = vsel %vm5866_vm1, %v6280_v7, %v6282_v47  ;;  %6426 = vmatpush1.bf16.msra.mxu1 %v6338_v8 }
 0xc8c   : > { %6427 = vmatprep.subr.bf16.mxu1 %v9810_v3  ;;  %6386 = vmatprep.subr.bf16.mxu0 %v6286_v57 }
 0xc8d   : > { %6387 = vmatpush1.bf16.msra.mxu0 %v6285_v39 }
 0xc8e   : > { %v6305_v55 = vpop.permute.xlu1 %6304  ;;  %v6284_v37 = vpop.permute.xlu0 %6283 }
 0xc8f   : > { %v6311_v12 = vsel %vm10303_vm6, %v6305_v55, %v6307_v5  ;;  %v6287_v19 = vsel %vm5866_vm1, %v6282_v47, %v6284_v37  ;;  %v6341_v17 = vld [vmem:[#allocation4 + $0x100] sm:$0xff]  ;;  %vm10307_vm1 = vmmov 0  }
 0xc90   : > { %6293 = vst.msk [vmem:[#allocation4 + $0x128] sm:$0xff] %vm4069_vm13, %v6287_v19  ;;  %6428 = vmatpush1.bf16.msra.mxu1 %v6341_v17  ;;  %6388 = vmatprep.subr.bf16.mxu0 %v6311_v12 }
 0xc91   : > { %6429 = vmatprep.subr.bf16.mxu1 %v9810_v3 }
 0xc92   : > { %v6303_v18 = vpop.permute.xlu1 %6302 }
 0xc93   : > { %v6310_v23 = vsel %vm10304_vm14, %v6303_v18, %v6305_v55 }
 0xc94   : > { %6389 = vmatpush1.bf16.msra.mxu0 %v6310_v23 }
 0xc96   : > { %v6309_v0 = vpop.permute.xlu1 %6308 }
 0xc97   : > { %v6312_v27 = vsel %vm10305_vm0, %v6307_v5, %v6309_v0  ;;  %v6344_v28 = vld [vmem:[#allocation4 + $0x128] sm:$0xff]  ;;  %6405 = vmatmul.mubr.bf16.vlgmr.msra.gmra.mrb[52].mxu0 %v7758_v20 }
 0xc98   : > { %6318 = vst.msk [vmem:[#allocation4 + $0x150] sm:$0xff] %vm4069_vm13, %v6312_v27  ;;  %6430 = vmatpush1.bf16.msra.mxu1 %v6344_v28  ;;  %6530 = vmatprep.mubr.f32.mxu0 %v7840_v25  ;;  %vm10306_vm13 = vmmov %vm10297_vm7  ;;  %vm6609_vm7 = vcmp.lt.s32.totalorder %v10041_v40, 18 }
 0xc99   : > { %6431 = vmatprep.subr.bf16.mxu1 %v7766_v13  ;;  %v7090_v4 = vsel %vm6609_vm7, 1.0, %v7840_v25 }
 0xc9f   : > { %v6347_v3 = vld [vmem:[#allocation4 + $0x150] sm:$0xff]  ;;  %v6353_v10 = vpop.permute.xlu0 %6352 }
 0xca0   : > { %6432 = vmatpush1.bf16.msra.mxu1 %v6347_v3 }
 0xca3   : > { %6448 = vmatmul.mubr.bf16.vlgmr.msra.gmra.mrb[56].mxu1 %v7758_v20 }
 0xca7   : > { %v6358_v34 = vpop.permute.xlu1 %6357 }
 0xd6a   : > { %v6406_v22 = vpop.f32.mrb[52].mxu0 }
 0xd6b   : > { %v6407_v51 = vadd.f32 %v6406_v22, %v6353_v10  ;;  %v6408_v63 = vpop.f32.mrb[53].mxu0 }
 0xd6c   : > { %v6409_v35 = vadd.f32 %v6408_v63, %v6353_v10  ;;  %v6410_v31 = vpop.f32.mrb[54].mxu0 }
 0xd6d   : > { %v6411_v16 = vadd.f32 %v6410_v31, %v6358_v34  ;;  %v6412_v44 = vpop.f32.mrb[55].mxu0  ;;  %v6456_v15 = vmax.f32 %v6407_v51, 0.0 }
 0xd6e   : > { %v6413_v29 = vadd.f32 %v6412_v44, %v6358_v34  ;;  %v6457_v26 = vmax.f32 %v6409_v35, 0.0 }
 0xd6f   : > { %v6459_v46 = vmax.f32 %v6411_v16, 0.0 }
 0xd70   : > { %v6460_v48 = vmax.f32 %v6413_v29, 0.0 }
 0xd71   : > { %v7201_v45 = vpack.c.bf16 %v6459_v46, %v6456_v15 }
 0xd72   : > { %v7199_v33 = vpack.c.bf16 %v6460_v48, %v6457_v26 }
 0xd74   : > { %7200 = vmatprep.subr.bf16.mxu0 %v7199_v33 }
 0xd75   : > { %7202 = vmatpush1.bf16.msra.mxu0 %v7201_v45 }
 0xd76   : > { %v6449_v41 = vpop.f32.mrb[56].mxu1  ;;  %7203 = vmatprep.subr.bf16.mxu0 %v7856_v14 }
 0xd77   : > { %v6450_v42 = vadd.f32 %v6449_v41, %v6353_v10  ;;  %v6451_v53 = vpop.f32.mrb[57].mxu1 }
 0xd78   : > { %v6452_v9 = vpop.f32.mrb[58].mxu1  ;;  %7086 = vmatmul.mubr.msk.f32.vlgmr.msra.gmra.mrb[56].mxu0 %vm10306_vm13, %v6462_v50 }
 0xd79   : > { %v6453_v56 = vadd.f32 %v6452_v9, %v6358_v34  ;;  %v6454_v43 = vpop.f32.mrb[59].mxu1  ;;  %7196 = vmatprep.mubr.msk.f32.mxu0 %vm10307_vm1, %v7840_v25  ;;  %v6458_v58 = vmax.f32 %v6450_v42, 0.0 }
 0xd7b   : > { %v6461_v38 = vmax.f32 %v6453_v56, 0.0 }
 0xd7d   : > { %v7204_v59 = vpack.c.bf16 %v6461_v38, %v6458_v58 }
 0xd7f   : > { %7205 = vmatpush3.bf16.msra.mxu0 %v7204_v59 }
 0xd82   : > { %7197 = vmatmul.mubr.msk.f32.vlgmr.msra.gmra.mrb[58].mxu0 %vm10308_vm11, %v6462_v50 }
 0xe4b   : > { %v6532_v24 = vpop.f32.mrb[56].mxu0 }
 0xe4c   : > { %v6616_v61 = vmul.f32 %v7088_v21, %v6532_v24  ;;  %v6534_v36 = vpop.f32.mrb[57].mxu0 }
 0xe4d   : > { %v6617_v62 = vmul.f32 %v7089_v60, %v6534_v36 }
 0xe4e   : > { %v6619_v1 = vsel %vm10309_vm5, %v6616_v61, 0.0 }
 0xe4f   : > { %v6620_v49 = vsel %vm10310_vm9, %v6617_v62, 0.0 }
 0xe50   : > { %v6621_v2 = vadd.f32 %v6620_v49, %v6619_v1 }
 0xe55   : > { %v6603_v54 = vpop.f32.mrb[58].mxu0 }
 0xe56   : > { %v6618_v52 = vmul.f32 %v7090_v4, %v6603_v54  ;;  %v7198_v11 = vpop.f32.mrb[59].mxu0 }
 0xe58   : > { %v6623_v47 = vsel %vm6622_vm2, %v6618_v52, 0.0 }
 0xe59   : > { %v6624_v32 = vadd.f32 %v6623_v47, %v6621_v2 }
 0xe5b   : > { %6625 = vadd.xlane.f32.xlu0 %v6624_v32 }
 0xee8   : > { %v6626_v30 = vpop.xlane.xlu0 %6625 }
 0xee9   : > { %v6627_v6 = vmul.f32 0.0030864198, %v6626_v30 }
 0xeeb   : > { %v6628_v7 = vsel %vm10311_vm3, %v6627_v6, -inf }
 0xeec   : > { %v6629_v5 = vrot.slane %v6628_v7, 4 }
 0xeee   : > { %v6630_v8 = vmax.f32 %v6628_v7, %v6629_v5 }
 0xef0   : > { %v6631_v39 = vrot.slane %v6630_v8, 2 }
 0xef2   : > { %v6632_v57 = vmax.f32 %v6630_v8, %v6631_v39 }
 0xef4   : > { %v6633_v55 = vrot.slane %v6632_v57, 1 }
 0xef6   : > { %v6634_v37 = vmax.f32 %v6632_v57, %v6633_v55 }
 0xef8   : > { %v6635_v40 = vsub.f32 %v6627_v6, %v6634_v37 }
 0xefa   : > { %v6636_v12 = vmul.f32 1.442695, %v6635_v40 }
 0xefc   : > { %7759 = vpow2.f32 %v6636_v12 }
 0xf06   : > { %v7760_v25 = vpop.eup %7759 }
 0xf07   : > { %v6638_v19 = vsel %vm10312_vm12, %v7760_v25, 0.0 }
 0xf08   : > { %v6639_v17 = vrot.slane %v6638_v19, 4 }
 0xf0a   : > { %v6640_v18 = vadd.f32 %v6639_v17, %v6638_v19 }
 0xf0c   : > { %v6641_v23 = vrot.slane %v6640_v18, 2 }
 0xf0e   : > { %v6642_v20 = vadd.f32 %v6641_v23, %v6640_v18 }
 0xf10   : > { %v6643_v0 = vrot.slane %v6642_v20, 1 }
 0xf12   : > { %v6644_v27 = vadd.f32 %v6643_v0, %v6642_v20 }
 0xf14   : > { %7761 = vrcp.f32 %v6644_v27 }
 0xf1e   : > { %v7762_v28 = vpop.eup %7761 }
 0xf1f   : > { %v6646_v13 = vmul.f32 %v7762_v28, %v7760_v25 }
 0xf21   : > { %v6647_v3 = vmul.f32 %v6646_v13, %v6462_v50 }
 0xf23   : > { %v6649_v10 = vsel %vm6648_vm8, %v6647_v3, 0.0 }
 0xf24   : > { %v6650_v22 = vrot.slane %v6649_v10, 4 }
 0xf26   : > { %v6651_v51 = vadd.f32 %v6650_v22, %v6649_v10 }
 0xf28   : > { %v6652_v63 = vrot.slane %v6651_v51, 2 }
 0xf2a   : > { %v6653_v34 = vadd.f32 %v6652_v63, %v6651_v51 }
 0xf2c   : > { %v6654_v35 = vrot.slane %v6653_v34, 1 }
 0xf2e   : > { %v6655_v31 = vadd.f32 %v6654_v35, %v6653_v34 }
 0xf30   : > { %6657 = vst.msk [vmem:[%s526_s23] sm:$0x1] %vm6656_vm4, %v6655_v31 }
 0xf31   : > { %7780 = shalt.err (!%p7777_p3)
}
 0xf32   : > { %s7781_s20 = scalar_lea.hbm %s10151_s7, 16  ;;  %s7785_s29 = scalar_lea.hbm %s10209_s16, 32 }
 0xf33   : > { %p7782_p4 = scmp.ne.s32.totalorder %s10151_s7, %s7781_s20  ;;  %p7786_p9 = scmp.lt.u32.totalorder %s10151_s7, %s10209_s16 }
 0xf34   : > { %p7787_p10 = scmp.lt.u32.totalorder %s7785_s29, %s7781_s20  ;;  %p7789_p12 = scmp.lt.u32.totalorder %s7781_s20, %s10151_s7 }
 0xf35   : > { %p7783_p7 = pnand %p7782_p4, %p7981_p5 }
 0xf36   : > { %p7788_p11 = por %p7787_p10, %p7786_p9 }
 0xf37   : > { %p7784_p8 = pneg %p7783_p7 }
 0xf38   : > { %p7790_p13 = por %p7789_p12, %p7788_p11 }
 0xf3a   : > { %p7791_p0 = pnand %p7790_p13, %p7784_p8 }
 0xf3c   : > { %7794 = shalt.err (!%p7791_p0)
}
 0xf3d   : > { %7305 = dma.vmem_to_hbm [thread:$0]  (%p7981_p5), %s10153_s28, 16, %s10151_s7, %s6659_s1  }
 0xf3e PF: > { %p7311_p1 = scmp.ge.s32.totalorder %s7829_s24, 2  ;;  %s6683_s17 = sand.u32 1, %s7817_s21  }
 0xf3f   : > { %s6684_s25 = scalar_lea.sflag [#allocation6], %s6683_s17 }
 0xf40   : > { %p7308_p2 = pnand %p7311_p1, %p7985_p6 }
 0xf42   : > { %7812 = dma.done.wait (!%p7308_p2), %s6684_s25, 16  }
 0xf43   : > { %7814 = vsyncadd (!%p7308_p2), %s6684_s25, 4294967280  ;;  %s10314_s24 = sld [smem:[#allocation9_spill]]  ;;  %s10315_s2 = sld [smem:[#allocation8_spill]] }
 0xf44   : > { %s10316_s23 = sld [smem:[#allocation10_spill]]  ;;  %s10317_s21 = smov %s7821_s22 }
 0xf49   : > { %p26_p3 = scmp.ge.s32.totalorder %s10314_s24, 4   ;;  %s10318_s22 = smov %s10315_s2 }
 0xf4b   :  { %28 = sbr.rel (!%p26_p3) target bundleno = 8 (0x8), region = 122 }
 0xf52   :  { %6688 = vsyncpa [#allocation6], 1 }
 0xf53   :  { %6690 = vsyncpa [#allocation6 + $0x1], 1 }

</bundles_post_ra>
